<compile_context>
chip_gen: v7x
topology: tpu7x:2x2x1
jax: 0.10.0
libtpu: 0.0.40
codegen_flags: <defaults>
</compile_context>

<pallas_src>
import functools

import jax
import jax.numpy as jnp
import numpy as np
from jax import lax
from jax.experimental import pallas as pl
from jax.experimental.pallas import tpu as pltpu


# ------------------------------ fused kernel ---------------------------------
def _dqn_fused_kernel(*refs, n_hidden, ksize, pad, W, M, padr):
    # Unpack refs: inputs..., output, scratches.
    idx = 0
    xpadT = refs[idx]; idx += 1          # (CinP, M + 2*padr)  zero-padded input
    masks = refs[idx]; idx += 1          # (K*K, M)            per-tap validity
    w0 = refs[idx]; idx += 1             # (Chid, K*K*CinP)    fused first-layer weight
    b0 = refs[idx]; idx += 1             # (Chid, 1)
    wh, bh = [], []
    for _ in range(n_hidden):
        wh.append(refs[idx]); idx += 1   # (Chid, K*K*Chid)
        bh.append(refs[idx]); idx += 1   # (Chid, 1)
    wf = refs[idx]; idx += 1             # (1, Chid)   1x1-conv weight (row)
    bf = refs[idx]; idx += 1             # (1, 1)
    wbd = refs[idx]; idx += 1            # (M, B*A)    block-diag linear weight
    bbd = refs[idx]; idx += 1            # (1, B*A)    tiled linear bias
    out_ref = refs[idx]; idx += 1        # (1, B*A)
    h_a = refs[idx]; idx += 1            # (Chid, M + 2*padr) scratch
    h_b = refs[idx]; idx += 1            # (Chid, M + 2*padr) scratch
    patch = refs[idx]; idx += 1          # (K*K*max(CinP,Chid), M) im2col scratch

    # Zero ONLY the halo columns of the resident feature maps; the interior
    # [padr, padr+M) is fully overwritten by every layer.
    for hbuf in (h_a, h_b):
        z = jnp.zeros((hbuf.shape[0], padr), hbuf.dtype)
        hbuf[:, pl.ds(0, padr)] = z
        hbuf[:, pl.ds(padr + M, padr)] = z

    def conv_layer(src_ref, w_ref, b_ref, dst_ref):
        # One contraction-dense GEMM per layer:
        #   patch[t*cin:(t+1)*cin, :] = shifted/masked src for tap t
        #   y = w_fused @ patch     (Chid, K*K*cin) @ (K*K*cin, M)
        cin = src_ref.shape[0]
        t = 0
        for kh in range(ksize):
            for kw in range(ksize):
                s = (kh - pad) * W + (kw - pad)        # flattened spatial shift
                src = src_ref[:, pl.ds(padr + s, M)]   # (cin, M)
                if kh == pad and kw == pad:
                    # center tap: mask is all ones, skip the multiply
                    patch[pl.ds(t * cin, cin), :] = src
                else:
                    patch[pl.ds(t * cin, cin), :] = src * masks[pl.ds(t, 1), :]
                t += 1
        y = jnp.dot(w_ref[...], patch[pl.ds(0, ksize * ksize * cin), :],
                    preferred_element_type=jnp.float32)      # (Chid, M)
        dst_ref[:, pl.ds(padr, M)] = jnp.maximum(y + b_ref[...], 0.0)

    # hidden_layers: (Conv + ReLU) x (1 + n_hidden)
    conv_layer(xpadT, w0, b0, h_a)
    cur, nxt = h_a, h_b
    for l in range(n_hidden):
        conv_layer(cur, wh[l], bh[l], nxt)
        cur, nxt = nxt, cur

    # final_conv_block: 1x1 Conv (-> 1 channel) + ReLU, as an MXU dot.
    hv = cur[:, pl.ds(padr, M)]                                # (Chid, M)
    u = jnp.maximum(
        jnp.dot(wf[...], hv, preferred_element_type=jnp.float32) + bf[...],
        0.0)                                                   # (1, M)

    # output_head: Flatten + Linear for ALL batch rows in one dot against the
    # block-diagonal weight; single store.
    o = jnp.dot(u, wbd[...], preferred_element_type=jnp.float32) + bbd[...]
    out_ref[...] = o.astype(out_ref.dtype)                     # (1, B*A)


def _build_masks(B, H, W, K, pad):
    """Static per-tap validity masks for the flattened (b,i,j) column order."""
    i = np.arange(H).reshape(1, H, 1)
    j = np.arange(W).reshape(1, 1, W)
    rows = []
    for kh in range(K):
        for kw in range(K):
            dkh, dkw = kh - pad, kw - pad
            valid = ((i + dkh >= 0) & (i + dkh < H) &
                     (j + dkw >= 0) & (j + dkw < W))
            valid = np.broadcast_to(valid, (B, H, W)).reshape(-1)
            rows.append(valid.astype(np.float32))
    return np.stack(rows, axis=0)                              # (K*K, B*H*W)


def _full_spec(a):
    zeros = (0,) * a.ndim
    return pl.BlockSpec(a.shape, lambda i, _z=zeros: _z)


# ------------------------------ forward (wrapper) -----------------------------
def dqn_forward(x_nchw, params):
    """Forward pass matching DQN.forward; input is NCHW like PyTorch."""
    x = x_nchw.astype(jnp.float32)
    B, Cin, H, W = x.shape
    K, pad = params["ksize"], params["pad"]
    assert 2 * pad == K - 1, "fused kernel assumes spatial-preserving convs"

    HW = H * W
    M = B * HW
    # Halo width: must cover the max flattened shift pad*(W+1); keep it a
    # multiple of 128 so all scratch stores stay lane-aligned.
    PADR = max(128, ((pad * (W + 1) + 127) // 128) * 128)
    Ntot = M + 2 * PADR

    convs = params["convs"]
    w0, b0 = convs[0]
    Chid = w0.shape[3]
    n_hidden = len(convs) - 1

    # Pad input channels to a sublane multiple so im2col patch stores align.
    CinP = ((Cin + 7) // 8) * 8

    # Transposed, flattened, zero-padded input: (CinP, Ntot), col r = b*HW+i*W+j.
    xT = jnp.transpose(x, (1, 0, 2, 3)).reshape(Cin, M)
    xT = jnp.pad(xT, ((0, CinP - Cin), (0, 0)))
    xpadT = jnp.pad(xT, ((0, 0), (PADR, PADR)))

    masks = jnp.asarray(_build_masks(B, H, W, K, pad), jnp.float32)

    def fuse_w(w, cin_pad):
        # (K,K,ci,co) -> zero-pad ci -> (co, K*K*cin_pad); row order matches
        # the kernel's patch layout (tap-major, channel-minor).
        ci = w.shape[2]
        co = w.shape[3]
        wp = jnp.pad(w, ((0, 0), (0, 0), (0, cin_pad - ci), (0, 0)))
        return jnp.transpose(wp, (3, 0, 1, 2)).reshape(co, K * K * cin_pad)

    args = [xpadT, masks, fuse_w(w0, CinP), b0.reshape(Chid, 1)]
    for (w, b) in convs[1:]:
        args += [fuse_w(w, Chid), b.reshape(Chid, 1)]

    wf, bf = params["final"]
    wl, bl = params["linear"]
    A = wl.shape[1]

    # Block-diagonal head weight (M, B*A) and tiled bias (1, B*A):
    #   out[b, a] = sum_p u[0, b*HW + p] * wl[p, a] + bl[a]
    wbd = jnp.zeros((M, B * A), jnp.float32)
    for b in range(B):
        wbd = wbd.at[b * HW:(b + 1) * HW, b * A:(b + 1) * A].set(wl)
    bbd = jnp.tile(bl.reshape(1, A), (1, B))

    args += [wf.reshape(1, Chid), bf.reshape(1, 1), wbd, bbd]

    kernel = functools.partial(
        _dqn_fused_kernel, n_hidden=n_hidden, ksize=K, pad=pad,
        W=W, M=M, padr=PADR)

    patch_rows = K * K * max(CinP, Chid)

    out_flat = pl.pallas_call(
        kernel,
        out_shape=jax.ShapeDtypeStruct((1, B * A), jnp.float32),
        grid_spec=pltpu.PrefetchScalarGridSpec(
            num_scalar_prefetch=0,
            grid=(1,),
            in_specs=[_full_spec(a) for a in args],
            out_specs=pl.BlockSpec((1, B * A), lambda i: (0, 0)),
            scratch_shapes=[
                pltpu.VMEM((Chid, Ntot), jnp.float32),
                pltpu.VMEM((Chid, Ntot), jnp.float32),
                pltpu.VMEM((patch_rows, M), jnp.float32),
            ]),
        compiler_params=pltpu.CompilerParams(
            dimension_semantics=("arbitrary",)),
    )(*args)

    return out_flat.reshape(B, A)


# ------------------------------ params ---------------------------------------
def init_dqn_params(key, *, input_channels, n_hidden_conv_channels,
                    kernel_size, n_hidden_conv_layers, n_rows, n_columns,
                    hidden_conv_padding, n_actions):
    n_out_rows = n_rows + 2 * hidden_conv_padding - kernel_size + 1
    n_out_cols = n_columns + 2 * hidden_conv_padding - kernel_size + 1

    keys = jax.random.split(key, 2 * (n_hidden_conv_layers + 3))
    ki = iter(range(len(keys)))
    params = {"convs": [], "pad": hidden_conv_padding, "ksize": kernel_size}

    cin = input_channels
    for _ in range(1 + n_hidden_conv_layers):   # first block + hidden blocks
        w = 0.1 * jax.random.normal(
            keys[next(ki)], (kernel_size, kernel_size, cin,
                             n_hidden_conv_channels), jnp.float32)
        bb = 0.1 * jax.random.normal(
            keys[next(ki)], (n_hidden_conv_channels,), jnp.float32)
        params["convs"].append((w, bb))
        cin = n_hidden_conv_channels

    wf = 0.1 * jax.random.normal(
        keys[next(ki)], (1, 1, n_hidden_conv_channels, 1), jnp.float32)
    bf = 0.1 * jax.random.normal(keys[next(ki)], (1,), jnp.float32)
    params["final"] = (wf, bf)

    wl = 0.1 * jax.random.normal(
        keys[next(ki)], (n_out_rows * n_out_cols, n_actions), jnp.float32)
    bl = 0.1 * jax.random.normal(keys[next(ki)], (n_actions,), jnp.float32)
    params["linear"] = (wl, bl)
    return params


# ------------------------- pure-JAX reference --------------------------------
def dqn_reference(x_nchw, params):
    x = jnp.transpose(x_nchw, (0, 2, 3, 1)).astype(jnp.float32)
    ksize, pad = params["ksize"], params["pad"]
    dn = ("NHWC", "HWIO", "NHWC")
    for (w, b) in params["convs"]:
        x = lax.conv_general_dilated(
            x, w, (1, 1), [(pad, pad), (pad, pad)], dimension_numbers=dn,
            precision=lax.Precision.HIGHEST) + b
        x = jnp.maximum(x, 0.0)
    wf, bf = params["final"]
    x = lax.conv_general_dilated(
        x, wf, (1, 1), [(0, 0), (0, 0)], dimension_numbers=dn,
        precision=lax.Precision.HIGHEST) + bf
    x = jnp.maximum(x, 0.0)
    B = x.shape[0]
    feat = x.reshape(B, -1)
    wl, bl = params["linear"]
    return jnp.dot(feat, wl, precision=lax.Precision.HIGHEST) + bl


# --------------------------------- main ---------------------------------------
if __name__ == "__main__":
    # Small config consistent with the module's __init__.
    cfg = dict(n_rows=16, n_columns=16, kernel_size=3, input_channels=4,
               n_actions=8, n_hidden_conv_layers=1,
               n_hidden_conv_channels=32, hidden_conv_padding=1)

    key = jax.random.PRNGKey(0)
    kx, kp = jax.random.split(key)
    x = jax.random.normal(
        kx, (2, cfg["input_channels"], cfg["n_rows"], cfg["n_columns"]),
        jnp.float32)                                    # NCHW, like PyTorch

    params = init_dqn_params(kp, **cfg)

    out = jax.block_until_ready(dqn_forward(x, params))
    ref = jax.block_until_ready(dqn_reference(x, params))

    assert out.shape == (2, cfg["n_actions"]), out.shape
    np.testing.assert_allclose(np.asarray(out), np.asarray(ref),
                               rtol=1e-3, atol=1e-3)
    print("KERNEL_OK")
</pallas_src>

<mosaic_0001>
module attributes {stable_mosaic.version = 11 : i64} {
  func.func @_dqn_fused_kernel(%arg0: i32, %arg1: memref<8x768xf32, #tpu.memory_space<vmem>>, %arg2: memref<9x512xf32, #tpu.memory_space<vmem>>, %arg3: memref<32x72xf32, #tpu.memory_space<vmem>>, %arg4: memref<32x1xf32, #tpu.memory_space<vmem>>, %arg5: memref<32x288xf32, #tpu.memory_space<vmem>>, %arg6: memref<32x1xf32, #tpu.memory_space<vmem>>, %arg7: memref<1x32xf32, #tpu.memory_space<vmem>>, %arg8: memref<1x1xf32, #tpu.memory_space<vmem>>, %arg9: memref<512x16xf32, #tpu.memory_space<vmem>>, %arg10: memref<1x16xf32, #tpu.memory_space<vmem>>, %arg11: memref<1x16xf32, #tpu.memory_space<vmem>>, %arg12: memref<32x768xf32, #tpu.memory_space<vmem>>, %arg13: memref<32x768xf32, #tpu.memory_space<vmem>>, %arg14: memref<288x512xf32, #tpu.memory_space<vmem>>) attributes {dimension_semantics = [#tpu.dimension_semantics<arbitrary>], iteration_bounds = array<i64: 1>, scalar_prefetch = 0 : i64, scratch_operands = 3 : i64, tpu.core_type = #tpu.core_type<tc>, window_params = [{pipeline_mode = #tpu.pipeline_mode<synchronous>, transform_indices = @transform_0, window_bounds = array<i64: 8, 768>}, {pipeline_mode = #tpu.pipeline_mode<synchronous>, transform_indices = @transform_1, window_bounds = array<i64: 9, 512>}, {pipeline_mode = #tpu.pipeline_mode<synchronous>, transform_indices = @transform_2, window_bounds = array<i64: 32, 72>}, {pipeline_mode = #tpu.pipeline_mode<synchronous>, transform_indices = @transform_3, window_bounds = array<i64: 32, 1>}, {pipeline_mode = #tpu.pipeline_mode<synchronous>, transform_indices = @transform_4, window_bounds = array<i64: 32, 288>}, {pipeline_mode = #tpu.pipeline_mode<synchronous>, transform_indices = @transform_5, window_bounds = array<i64: 32, 1>}, {pipeline_mode = #tpu.pipeline_mode<synchronous>, transform_indices = @transform_6, window_bounds = array<i64: 1, 32>}, {pipeline_mode = #tpu.pipeline_mode<synchronous>, transform_indices = @transform_7, window_bounds = array<i64: 1, 1>}, {pipeline_mode = #tpu.pipeline_mode<synchronous>, transform_indices = @transform_8, window_bounds = array<i64: 512, 16>}, {pipeline_mode = #tpu.pipeline_mode<synchronous>, transform_indices = @transform_9, window_bounds = array<i64: 1, 16>}, {pipeline_mode = #tpu.pipeline_mode<synchronous>, transform_indices = @transform_10, window_bounds = array<i64: 1, 16>}]} {
    %cst = arith.constant 0.000000e+00 : f32
    %0 = vector.broadcast %cst : f32 to vector<32x128xf32>
    %c0 = arith.constant 0 : index
    %c0_0 = arith.constant 0 : index
    %1 = vector.load %arg12[%c0, %c0_0] : memref<32x768xf32, #tpu.memory_space<vmem>>, vector<32x128xf32>
    tpu.vector_store %arg12[%c0, %c0_0], %0 {strides = array<i32>} : memref<32x768xf32, #tpu.memory_space<vmem>>, vector<32x128xf32>,
    %c0_1 = arith.constant 0 : index
    %c640 = arith.constant 640 : index
    %2 = vector.load %arg12[%c0_1, %c640] : memref<32x768xf32, #tpu.memory_space<vmem>>, vector<32x128xf32>
    tpu.vector_store %arg12[%c0_1, %c640], %0 {strides = array<i32>} : memref<32x768xf32, #tpu.memory_space<vmem>>, vector<32x128xf32>,
    %cst_2 = arith.constant 0.000000e+00 : f32
    %3 = vector.broadcast %cst_2 : f32 to vector<32x128xf32>
    %c0_3 = arith.constant 0 : index
    %c0_4 = arith.constant 0 : index
    %4 = vector.load %arg13[%c0_3, %c0_4] : memref<32x768xf32, #tpu.memory_space<vmem>>, vector<32x128xf32>
    tpu.vector_store %arg13[%c0_3, %c0_4], %3 {strides = array<i32>} : memref<32x768xf32, #tpu.memory_space<vmem>>, vector<32x128xf32>,
    %c0_5 = arith.constant 0 : index
    %c640_6 = arith.constant 640 : index
    %5 = vector.load %arg13[%c0_5, %c640_6] : memref<32x768xf32, #tpu.memory_space<vmem>>, vector<32x128xf32>
    tpu.vector_store %arg13[%c0_5, %c640_6], %3 {strides = array<i32>} : memref<32x768xf32, #tpu.memory_space<vmem>>, vector<32x128xf32>,
    %c0_7 = arith.constant 0 : index
    %c111 = arith.constant 111 : index
    %6 = vector.load %arg1[%c0_7, %c111] : memref<8x768xf32, #tpu.memory_space<vmem>>, vector<8x512xf32>
    %c0_8 = arith.constant 0 : index
    %c0_9 = arith.constant 0 : index
    %7 = vector.load %arg2[%c0_8, %c0_9] : memref<9x512xf32, #tpu.memory_space<vmem>>, vector<1x512xf32>
    %8 = vector.broadcast %7 : vector<1x512xf32> to vector<8x512xf32>
    %9 = arith.mulf %6, %8 : vector<8x512xf32>
    %c0_10 = arith.constant 0 : index
    %c0_11 = arith.constant 0 : index
    %10 = vector.load %arg14[%c0_10, %c0_11] : memref<288x512xf32, #tpu.memory_space<vmem>>, vector<8x512xf32>
    tpu.vector_store %arg14[%c0_10, %c0_11], %9 {strides = array<i32>} : memref<288x512xf32, #tpu.memory_space<vmem>>, vector<8x512xf32>,
    %c0_12 = arith.constant 0 : index
    %c112 = arith.constant 112 : index
    %11 = vector.load %arg1[%c0_12, %c112] : memref<8x768xf32, #tpu.memory_space<vmem>>, vector<8x512xf32>
    %c1 = arith.constant 1 : index
    %c0_13 = arith.constant 0 : index
    %12 = vector.load %arg2[%c1, %c0_13] : memref<9x512xf32, #tpu.memory_space<vmem>>, vector<1x512xf32>
    %13 = vector.broadcast %12 : vector<1x512xf32> to vector<8x512xf32>
    %14 = arith.mulf %11, %13 : vector<8x512xf32>
    %c8 = arith.constant 8 : index
    %c0_14 = arith.constant 0 : index
    %15 = vector.load %arg14[%c8, %c0_14] : memref<288x512xf32, #tpu.memory_space<vmem>>, vector<8x512xf32>
    tpu.vector_store %arg14[%c8, %c0_14], %14 {strides = array<i32>} : memref<288x512xf32, #tpu.memory_space<vmem>>, vector<8x512xf32>,
    %c0_15 = arith.constant 0 : index
    %c113 = arith.constant 113 : index
    %16 = vector.load %arg1[%c0_15, %c113] : memref<8x768xf32, #tpu.memory_space<vmem>>, vector<8x512xf32>
    %c2 = arith.constant 2 : index
    %c0_16 = arith.constant 0 : index
    %17 = vector.load %arg2[%c2, %c0_16] : memref<9x512xf32, #tpu.memory_space<vmem>>, vector<1x512xf32>
    %18 = vector.broadcast %17 : vector<1x512xf32> to vector<8x512xf32>
    %19 = arith.mulf %16, %18 : vector<8x512xf32>
    %c16 = arith.constant 16 : index
    %c0_17 = arith.constant 0 : index
    %20 = vector.load %arg14[%c16, %c0_17] : memref<288x512xf32, #tpu.memory_space<vmem>>, vector<8x512xf32>
    tpu.vector_store %arg14[%c16, %c0_17], %19 {strides = array<i32>} : memref<288x512xf32, #tpu.memory_space<vmem>>, vector<8x512xf32>,
    %c0_18 = arith.constant 0 : index
    %c127 = arith.constant 127 : index
    %21 = vector.load %arg1[%c0_18, %c127] : memref<8x768xf32, #tpu.memory_space<vmem>>, vector<8x512xf32>
    %c3 = arith.constant 3 : index
    %c0_19 = arith.constant 0 : index
    %22 = vector.load %arg2[%c3, %c0_19] : memref<9x512xf32, #tpu.memory_space<vmem>>, vector<1x512xf32>
    %23 = vector.broadcast %22 : vector<1x512xf32> to vector<8x512xf32>
    %24 = arith.mulf %21, %23 : vector<8x512xf32>
    %c24 = arith.constant 24 : index
    %c0_20 = arith.constant 0 : index
    %25 = vector.load %arg14[%c24, %c0_20] : memref<288x512xf32, #tpu.memory_space<vmem>>, vector<8x512xf32>
    tpu.vector_store %arg14[%c24, %c0_20], %24 {strides = array<i32>} : memref<288x512xf32, #tpu.memory_space<vmem>>, vector<8x512xf32>,
    %c0_21 = arith.constant 0 : index
    %c128 = arith.constant 128 : index
    %26 = vector.load %arg1[%c0_21, %c128] : memref<8x768xf32, #tpu.memory_space<vmem>>, vector<8x512xf32>
    %c32 = arith.constant 32 : index
    %c0_22 = arith.constant 0 : index
    %27 = vector.load %arg14[%c32, %c0_22] : memref<288x512xf32, #tpu.memory_space<vmem>>, vector<8x512xf32>
    tpu.vector_store %arg14[%c32, %c0_22], %26 {strides = array<i32>} : memref<288x512xf32, #tpu.memory_space<vmem>>, vector<8x512xf32>,
    %c0_23 = arith.constant 0 : index
    %c129 = arith.constant 129 : index
    %28 = vector.load %arg1[%c0_23, %c129] : memref<8x768xf32, #tpu.memory_space<vmem>>, vector<8x512xf32>
    %c5 = arith.constant 5 : index
    %c0_24 = arith.constant 0 : index
    %29 = vector.load %arg2[%c5, %c0_24] : memref<9x512xf32, #tpu.memory_space<vmem>>, vector<1x512xf32>
    %30 = vector.broadcast %29 : vector<1x512xf32> to vector<8x512xf32>
    %31 = arith.mulf %28, %30 : vector<8x512xf32>
    %c40 = arith.constant 40 : index
    %c0_25 = arith.constant 0 : index
    %32 = vector.load %arg14[%c40, %c0_25] : memref<288x512xf32, #tpu.memory_space<vmem>>, vector<8x512xf32>
    tpu.vector_store %arg14[%c40, %c0_25], %31 {strides = array<i32>} : memref<288x512xf32, #tpu.memory_space<vmem>>, vector<8x512xf32>,
    %c0_26 = arith.constant 0 : index
    %c143 = arith.constant 143 : index
    %33 = vector.load %arg1[%c0_26, %c143] : memref<8x768xf32, #tpu.memory_space<vmem>>, vector<8x512xf32>
    %c6 = arith.constant 6 : index
    %c0_27 = arith.constant 0 : index
    %34 = vector.load %arg2[%c6, %c0_27] : memref<9x512xf32, #tpu.memory_space<vmem>>, vector<1x512xf32>
    %35 = vector.broadcast %34 : vector<1x512xf32> to vector<8x512xf32>
    %36 = arith.mulf %33, %35 : vector<8x512xf32>
    %c48 = arith.constant 48 : index
    %c0_28 = arith.constant 0 : index
    %37 = vector.load %arg14[%c48, %c0_28] : memref<288x512xf32, #tpu.memory_space<vmem>>, vector<8x512xf32>
    tpu.vector_store %arg14[%c48, %c0_28], %36 {strides = array<i32>} : memref<288x512xf32, #tpu.memory_space<vmem>>, vector<8x512xf32>,
    %c0_29 = arith.constant 0 : index
    %c144 = arith.constant 144 : index
    %38 = vector.load %arg1[%c0_29, %c144] : memref<8x768xf32, #tpu.memory_space<vmem>>, vector<8x512xf32>
    %c7 = arith.constant 7 : index
    %c0_30 = arith.constant 0 : index
    %39 = vector.load %arg2[%c7, %c0_30] : memref<9x512xf32, #tpu.memory_space<vmem>>, vector<1x512xf32>
    %40 = vector.broadcast %39 : vector<1x512xf32> to vector<8x512xf32>
    %41 = arith.mulf %38, %40 : vector<8x512xf32>
    %c56 = arith.constant 56 : index
    %c0_31 = arith.constant 0 : index
    %42 = vector.load %arg14[%c56, %c0_31] : memref<288x512xf32, #tpu.memory_space<vmem>>, vector<8x512xf32>
    tpu.vector_store %arg14[%c56, %c0_31], %41 {strides = array<i32>} : memref<288x512xf32, #tpu.memory_space<vmem>>, vector<8x512xf32>,
    %c0_32 = arith.constant 0 : index
    %c145 = arith.constant 145 : index
    %43 = vector.load %arg1[%c0_32, %c145] : memref<8x768xf32, #tpu.memory_space<vmem>>, vector<8x512xf32>
    %c8_33 = arith.constant 8 : index
    %c0_34 = arith.constant 0 : index
    %44 = vector.load %arg2[%c8_33, %c0_34] : memref<9x512xf32, #tpu.memory_space<vmem>>, vector<1x512xf32>
    %45 = vector.broadcast %44 : vector<1x512xf32> to vector<8x512xf32>
    %46 = arith.mulf %43, %45 : vector<8x512xf32>
    %c64 = arith.constant 64 : index
    %c0_35 = arith.constant 0 : index
    %47 = vector.load %arg14[%c64, %c0_35] : memref<288x512xf32, #tpu.memory_space<vmem>>, vector<8x512xf32>
    tpu.vector_store %arg14[%c64, %c0_35], %46 {strides = array<i32>} : memref<288x512xf32, #tpu.memory_space<vmem>>, vector<8x512xf32>,
    %c0_36 = arith.constant 0 : index
    %c0_37 = arith.constant 0 : index
    %48 = vector.load %arg3[%c0_36, %c0_37] : memref<32x72xf32, #tpu.memory_space<vmem>>, vector<32x72xf32>
    %c0_38 = arith.constant 0 : index
    %c0_39 = arith.constant 0 : index
    %49 = vector.load %arg14[%c0_38, %c0_39] : memref<288x512xf32, #tpu.memory_space<vmem>>, vector<72x512xf32>
    %cst_40 = arith.constant dense<0.000000e+00> : vector<32x512xf32>
    %50 = tpu.matmul %48, %49, %cst_40 {dimension_numbers = #tpu.dot_dimension_numbers<[1], [0], [0], [1], [0, 0, 1, 1], [], []>} : vector<32x72xf32>, vector<72x512xf32>, vector<32x512xf32> -> vector<32x512xf32>
    %c0_41 = arith.constant 0 : index
    %c0_42 = arith.constant 0 : index
    %51 = vector.load %arg4[%c0_41, %c0_42] : memref<32x1xf32, #tpu.memory_space<vmem>>, vector<32x1xf32>
    %52 = vector.broadcast %51 : vector<32x1xf32> to vector<32x512xf32>
    %53 = arith.addf %50, %52 : vector<32x512xf32>
    %cst_43 = arith.constant 0.000000e+00 : f32
    %54 = vector.broadcast %cst_43 : f32 to vector<32x512xf32>
    %55 = arith.maximumf %53, %54 : vector<32x512xf32>
    %c0_44 = arith.constant 0 : index
    %c128_45 = arith.constant 128 : index
    %56 = vector.load %arg12[%c0_44, %c128_45] : memref<32x768xf32, #tpu.memory_space<vmem>>, vector<32x512xf32>
    tpu.vector_store %arg12[%c0_44, %c128_45], %55 {strides = array<i32>} : memref<32x768xf32, #tpu.memory_space<vmem>>, vector<32x512xf32>,
    %c0_46 = arith.constant 0 : index
    %c111_47 = arith.constant 111 : index
    %57 = vector.load %arg12[%c0_46, %c111_47] : memref<32x768xf32, #tpu.memory_space<vmem>>, vector<32x512xf32>
    %c0_48 = arith.constant 0 : index
    %c0_49 = arith.constant 0 : index
    %58 = vector.load %arg2[%c0_48, %c0_49] : memref<9x512xf32, #tpu.memory_space<vmem>>, vector<1x512xf32>
    %59 = vector.broadcast %58 : vector<1x512xf32> to vector<32x512xf32>
    %60 = arith.mulf %57, %59 : vector<32x512xf32>
    %c0_50 = arith.constant 0 : index
    %c0_51 = arith.constant 0 : index
    %61 = vector.load %arg14[%c0_50, %c0_51] : memref<288x512xf32, #tpu.memory_space<vmem>>, vector<32x512xf32>
    tpu.vector_store %arg14[%c0_50, %c0_51], %60 {strides = array<i32>} : memref<288x512xf32, #tpu.memory_space<vmem>>, vector<32x512xf32>,
    %c0_52 = arith.constant 0 : index
    %c112_53 = arith.constant 112 : index
    %62 = vector.load %arg12[%c0_52, %c112_53] : memref<32x768xf32, #tpu.memory_space<vmem>>, vector<32x512xf32>
    %c1_54 = arith.constant 1 : index
    %c0_55 = arith.constant 0 : index
    %63 = vector.load %arg2[%c1_54, %c0_55] : memref<9x512xf32, #tpu.memory_space<vmem>>, vector<1x512xf32>
    %64 = vector.broadcast %63 : vector<1x512xf32> to vector<32x512xf32>
    %65 = arith.mulf %62, %64 : vector<32x512xf32>
    %c32_56 = arith.constant 32 : index
    %c0_57 = arith.constant 0 : index
    %66 = vector.load %arg14[%c32_56, %c0_57] : memref<288x512xf32, #tpu.memory_space<vmem>>, vector<32x512xf32>
    tpu.vector_store %arg14[%c32_56, %c0_57], %65 {strides = array<i32>} : memref<288x512xf32, #tpu.memory_space<vmem>>, vector<32x512xf32>,
    %c0_58 = arith.constant 0 : index
    %c113_59 = arith.constant 113 : index
    %67 = vector.load %arg12[%c0_58, %c113_59] : memref<32x768xf32, #tpu.memory_space<vmem>>, vector<32x512xf32>
    %c2_60 = arith.constant 2 : index
    %c0_61 = arith.constant 0 : index
    %68 = vector.load %arg2[%c2_60, %c0_61] : memref<9x512xf32, #tpu.memory_space<vmem>>, vector<1x512xf32>
    %69 = vector.broadcast %68 : vector<1x512xf32> to vector<32x512xf32>
    %70 = arith.mulf %67, %69 : vector<32x512xf32>
    %c64_62 = arith.constant 64 : index
    %c0_63 = arith.constant 0 : index
    %71 = vector.load %arg14[%c64_62, %c0_63] : memref<288x512xf32, #tpu.memory_space<vmem>>, vector<32x512xf32>
    tpu.vector_store %arg14[%c64_62, %c0_63], %70 {strides = array<i32>} : memref<288x512xf32, #tpu.memory_space<vmem>>, vector<32x512xf32>,
    %c0_64 = arith.constant 0 : index
    %c127_65 = arith.constant 127 : index
    %72 = vector.load %arg12[%c0_64, %c127_65] : memref<32x768xf32, #tpu.memory_space<vmem>>, vector<32x512xf32>
    %c3_66 = arith.constant 3 : index
    %c0_67 = arith.constant 0 : index
    %73 = vector.load %arg2[%c3_66, %c0_67] : memref<9x512xf32, #tpu.memory_space<vmem>>, vector<1x512xf32>
    %74 = vector.broadcast %73 : vector<1x512xf32> to vector<32x512xf32>
    %75 = arith.mulf %72, %74 : vector<32x512xf32>
    %c96 = arith.constant 96 : index
    %c0_68 = arith.constant 0 : index
    %76 = vector.load %arg14[%c96, %c0_68] : memref<288x512xf32, #tpu.memory_space<vmem>>, vector<32x512xf32>
    tpu.vector_store %arg14[%c96, %c0_68], %75 {strides = array<i32>} : memref<288x512xf32, #tpu.memory_space<vmem>>, vector<32x512xf32>,
    %c0_69 = arith.constant 0 : index
    %c128_70 = arith.constant 128 : index
    %77 = vector.load %arg12[%c0_69, %c128_70] : memref<32x768xf32, #tpu.memory_space<vmem>>, vector<32x512xf32>
    %c128_71 = arith.constant 128 : index
    %c0_72 = arith.constant 0 : index
    %78 = vector.load %arg14[%c128_71, %c0_72] : memref<288x512xf32, #tpu.memory_space<vmem>>, vector<32x512xf32>
    tpu.vector_store %arg14[%c128_71, %c0_72], %77 {strides = array<i32>} : memref<288x512xf32, #tpu.memory_space<vmem>>, vector<32x512xf32>,
    %c0_73 = arith.constant 0 : index
    %c129_74 = arith.constant 129 : index
    %79 = vector.load %arg12[%c0_73, %c129_74] : memref<32x768xf32, #tpu.memory_space<vmem>>, vector<32x512xf32>
    %c5_75 = arith.constant 5 : index
    %c0_76 = arith.constant 0 : index
    %80 = vector.load %arg2[%c5_75, %c0_76] : memref<9x512xf32, #tpu.memory_space<vmem>>, vector<1x512xf32>
    %81 = vector.broadcast %80 : vector<1x512xf32> to vector<32x512xf32>
    %82 = arith.mulf %79, %81 : vector<32x512xf32>
    %c160 = arith.constant 160 : index
    %c0_77 = arith.constant 0 : index
    %83 = vector.load %arg14[%c160, %c0_77] : memref<288x512xf32, #tpu.memory_space<vmem>>, vector<32x512xf32>
    tpu.vector_store %arg14[%c160, %c0_77], %82 {strides = array<i32>} : memref<288x512xf32, #tpu.memory_space<vmem>>, vector<32x512xf32>,
    %c0_78 = arith.constant 0 : index
    %c143_79 = arith.constant 143 : index
    %84 = vector.load %arg12[%c0_78, %c143_79] : memref<32x768xf32, #tpu.memory_space<vmem>>, vector<32x512xf32>
    %c6_80 = arith.constant 6 : index
    %c0_81 = arith.constant 0 : index
    %85 = vector.load %arg2[%c6_80, %c0_81] : memref<9x512xf32, #tpu.memory_space<vmem>>, vector<1x512xf32>
    %86 = vector.broadcast %85 : vector<1x512xf32> to vector<32x512xf32>
    %87 = arith.mulf %84, %86 : vector<32x512xf32>
    %c192 = arith.constant 192 : index
    %c0_82 = arith.constant 0 : index
    %88 = vector.load %arg14[%c192, %c0_82] : memref<288x512xf32, #tpu.memory_space<vmem>>, vector<32x512xf32>
    tpu.vector_store %arg14[%c192, %c0_82], %87 {strides = array<i32>} : memref<288x512xf32, #tpu.memory_space<vmem>>, vector<32x512xf32>,
    %c0_83 = arith.constant 0 : index
    %c144_84 = arith.constant 144 : index
    %89 = vector.load %arg12[%c0_83, %c144_84] : memref<32x768xf32, #tpu.memory_space<vmem>>, vector<32x512xf32>
    %c7_85 = arith.constant 7 : index
    %c0_86 = arith.constant 0 : index
    %90 = vector.load %arg2[%c7_85, %c0_86] : memref<9x512xf32, #tpu.memory_space<vmem>>, vector<1x512xf32>
    %91 = vector.broadcast %90 : vector<1x512xf32> to vector<32x512xf32>
    %92 = arith.mulf %89, %91 : vector<32x512xf32>
    %c224 = arith.constant 224 : index
    %c0_87 = arith.constant 0 : index
    %93 = vector.load %arg14[%c224, %c0_87] : memref<288x512xf32, #tpu.memory_space<vmem>>, vector<32x512xf32>
    tpu.vector_store %arg14[%c224, %c0_87], %92 {strides = array<i32>} : memref<288x512xf32, #tpu.memory_space<vmem>>, vector<32x512xf32>,
    %c0_88 = arith.constant 0 : index
    %c145_89 = arith.constant 145 : index
    %94 = vector.load %arg12[%c0_88, %c145_89] : memref<32x768xf32, #tpu.memory_space<vmem>>, vector<32x512xf32>
    %c8_90 = arith.constant 8 : index
    %c0_91 = arith.constant 0 : index
    %95 = vector.load %arg2[%c8_90, %c0_91] : memref<9x512xf32, #tpu.memory_space<vmem>>, vector<1x512xf32>
    %96 = vector.broadcast %95 : vector<1x512xf32> to vector<32x512xf32>
    %97 = arith.mulf %94, %96 : vector<32x512xf32>
    %c256 = arith.constant 256 : index
    %c0_92 = arith.constant 0 : index
    %98 = vector.load %arg14[%c256, %c0_92] : memref<288x512xf32, #tpu.memory_space<vmem>>, vector<32x512xf32>
    tpu.vector_store %arg14[%c256, %c0_92], %97 {strides = array<i32>} : memref<288x512xf32, #tpu.memory_space<vmem>>, vector<32x512xf32>,
    %c0_93 = arith.constant 0 : index
    %c0_94 = arith.constant 0 : index
    %99 = vector.load %arg5[%c0_93, %c0_94] : memref<32x288xf32, #tpu.memory_space<vmem>>, vector<32x288xf32>
    %c0_95 = arith.constant 0 : index
    %c0_96 = arith.constant 0 : index
    %100 = vector.load %arg14[%c0_95, %c0_96] : memref<288x512xf32, #tpu.memory_space<vmem>>, vector<288x512xf32>
    %cst_97 = arith.constant dense<0.000000e+00> : vector<32x512xf32>
    %101 = tpu.matmul %99, %100, %cst_97 {dimension_numbers = #tpu.dot_dimension_numbers<[1], [0], [0], [1], [0, 0, 1, 1], [], []>} : vector<32x288xf32>, vector<288x512xf32>, vector<32x512xf32> -> vector<32x512xf32>
    %c0_98 = arith.constant 0 : index
    %c0_99 = arith.constant 0 : index
    %102 = vector.load %arg6[%c0_98, %c0_99] : memref<32x1xf32, #tpu.memory_space<vmem>>, vector<32x1xf32>
    %103 = vector.broadcast %102 : vector<32x1xf32> to vector<32x512xf32>
    %104 = arith.addf %101, %103 : vector<32x512xf32>
    %cst_100 = arith.constant 0.000000e+00 : f32
    %105 = vector.broadcast %cst_100 : f32 to vector<32x512xf32>
    %106 = arith.maximumf %104, %105 : vector<32x512xf32>
    %c0_101 = arith.constant 0 : index
    %c128_102 = arith.constant 128 : index
    %107 = vector.load %arg13[%c0_101, %c128_102] : memref<32x768xf32, #tpu.memory_space<vmem>>, vector<32x512xf32>
    tpu.vector_store %arg13[%c0_101, %c128_102], %106 {strides = array<i32>} : memref<32x768xf32, #tpu.memory_space<vmem>>, vector<32x512xf32>,
    %c0_103 = arith.constant 0 : index
    %c128_104 = arith.constant 128 : index
    %108 = vector.load %arg13[%c0_103, %c128_104] : memref<32x768xf32, #tpu.memory_space<vmem>>, vector<32x512xf32>
    %c0_105 = arith.constant 0 : index
    %c0_106 = arith.constant 0 : index
    %109 = vector.load %arg7[%c0_105, %c0_106] : memref<1x32xf32, #tpu.memory_space<vmem>>, vector<1x32xf32>
    %cst_107 = arith.constant dense<0.000000e+00> : vector<1x512xf32>
    %110 = tpu.matmul %109, %108, %cst_107 {dimension_numbers = #tpu.dot_dimension_numbers<[1], [0], [0], [1], [0, 0, 1, 1], [], []>} : vector<1x32xf32>, vector<32x512xf32>, vector<1x512xf32> -> vector<1x512xf32>
    %c0_108 = arith.constant 0 : index
    %c0_109 = arith.constant 0 : index
    %111 = vector.load %arg8[%c0_108, %c0_109] : memref<1x1xf32, #tpu.memory_space<vmem>>, vector<1x1xf32>
    %112 = vector.broadcast %111 : vector<1x1xf32> to vector<1x512xf32>
    %113 = arith.addf %110, %112 : vector<1x512xf32>
    %cst_110 = arith.constant 0.000000e+00 : f32
    %114 = vector.broadcast %cst_110 : f32 to vector<1x512xf32>
    %115 = arith.maximumf %113, %114 : vector<1x512xf32>
    %c0_111 = arith.constant 0 : index
    %c0_112 = arith.constant 0 : index
    %116 = vector.load %arg9[%c0_111, %c0_112] : memref<512x16xf32, #tpu.memory_space<vmem>>, vector<512x16xf32>
    %cst_113 = arith.constant dense<0.000000e+00> : vector<1x16xf32>
    %117 = tpu.matmul %115, %116, %cst_113 {dimension_numbers = #tpu.dot_dimension_numbers<[1], [0], [0], [1], [0, 0, 1, 1], [], []>} : vector<1x512xf32>, vector<512x16xf32>, vector<1x16xf32> -> vector<1x16xf32>
    %c0_114 = arith.constant 0 : index
    %c0_115 = arith.constant 0 : index
    %118 = vector.load %arg10[%c0_114, %c0_115] : memref<1x16xf32, #tpu.memory_space<vmem>>, vector<1x16xf32>
    %119 = arith.addf %117, %118 : vector<1x16xf32>
    %c0_116 = arith.constant 0 : index
    %c0_117 = arith.constant 0 : index
    %120 = vector.load %arg11[%c0_116, %c0_117] : memref<1x16xf32, #tpu.memory_space<vmem>>, vector<1x16xf32>
    tpu.vector_store %arg11[%c0_116, %c0_117], %119 {strides = array<i32>} : memref<1x16xf32, #tpu.memory_space<vmem>>, vector<1x16xf32>,
    return
  }
  func.func @transform_0(%arg0: i32) -> (i32, i32) {
    %c0_i32 = arith.constant 0 : i32
    %c0_i32_0 = arith.constant 0 : i32
    %c0_i32_1 = arith.constant 0 : i32
    return %c0_i32, %c0_i32_0 : i32, i32
  }
  func.func @transform_1(%arg0: i32) -> (i32, i32) {
    %c0_i32 = arith.constant 0 : i32
    %c0_i32_0 = arith.constant 0 : i32
    %c0_i32_1 = arith.constant 0 : i32
    return %c0_i32, %c0_i32_0 : i32, i32
  }
  func.func @transform_2(%arg0: i32) -> (i32, i32) {
    %c0_i32 = arith.constant 0 : i32
    %c0_i32_0 = arith.constant 0 : i32
    %c0_i32_1 = arith.constant 0 : i32
    return %c0_i32, %c0_i32_0 : i32, i32
  }
  func.func @transform_3(%arg0: i32) -> (i32, i32) {
    %c0_i32 = arith.constant 0 : i32
    %c0_i32_0 = arith.constant 0 : i32
    %c0_i32_1 = arith.constant 0 : i32
    return %c0_i32, %c0_i32_0 : i32, i32
  }
  func.func @transform_4(%arg0: i32) -> (i32, i32) {
    %c0_i32 = arith.constant 0 : i32
    %c0_i32_0 = arith.constant 0 : i32
    %c0_i32_1 = arith.constant 0 : i32
    return %c0_i32, %c0_i32_0 : i32, i32
  }
  func.func @transform_5(%arg0: i32) -> (i32, i32) {
    %c0_i32 = arith.constant 0 : i32
    %c0_i32_0 = arith.constant 0 : i32
    %c0_i32_1 = arith.constant 0 : i32
    return %c0_i32, %c0_i32_0 : i32, i32
  }
  func.func @transform_6(%arg0: i32) -> (i32, i32) {
    %c0_i32 = arith.constant 0 : i32
    %c0_i32_0 = arith.constant 0 : i32
    %c0_i32_1 = arith.constant 0 : i32
    return %c0_i32, %c0_i32_0 : i32, i32
  }
  func.func @transform_7(%arg0: i32) -> (i32, i32) {
    %c0_i32 = arith.constant 0 : i32
    %c0_i32_0 = arith.constant 0 : i32
    %c0_i32_1 = arith.constant 0 : i32
    return %c0_i32, %c0_i32_0 : i32, i32
  }
  func.func @transform_8(%arg0: i32) -> (i32, i32) {
    %c0_i32 = arith.constant 0 : i32
    %c0_i32_0 = arith.constant 0 : i32
    %c0_i32_1 = arith.constant 0 : i32
    return %c0_i32, %c0_i32_0 : i32, i32
  }
  func.func @transform_9(%arg0: i32) -> (i32, i32) {
    %c0_i32 = arith.constant 0 : i32
    %c0_i32_0 = arith.constant 0 : i32
    %c0_i32_1 = arith.constant 0 : i32
    return %c0_i32, %c0_i32_0 : i32, i32
  }
  func.func @transform_10(%arg0: i32) -> (i32, i32) {
    %c0_i32 = arith.constant 0 : i32
    %c0_i32_0 = arith.constant 0 : i32
    %c0_i32_1 = arith.constant 0 : i32
    return %c0_i32, %c0_i32_0 : i32, i32
  }
}

</mosaic_0001>

<bundles_post_ra>
// kernel: tpu_custom_call.1
= control target key start
LH: loop header
LB: loop body
LE: loop exit
PB: predicated region body
PF: predicated region fallthrough
CT: control target
= control target key end

     0   :  { %s6532_s0 = inlined_call_operand.vmem [shape: f32[8,768], index: 0, kind: input, shape index: {}]   ;;  %s6533_s1 = inlined_call_operand.vmem [shape: f32[9,512], index: 1, kind: input, shape index: {}]   ;;  %s6534_s2 = inlined_call_operand.vmem [shape: f32[32,72], index: 2, kind: input, shape index: {}]   ;;  %s6535_s3 = inlined_call_operand.vmem [shape: f32[32,1], index: 3, kind: input, shape index: {}]   ;;  %s6536_s4 = inlined_call_operand.vmem [shape: f32[32,288], index: 4, kind: input, shape index: {}]   ;;  %s6537_s5 = inlined_call_operand.vmem [shape: f32[32,1], index: 5, kind: input, shape index: {}]   ;;  %s6538_s6 = inlined_call_operand.vmem [shape: f32[1,32], index: 6, kind: input, shape index: {}]   ;;  %s6539_s7 = inlined_call_operand.<no memory space> [shape: f32[1,1], index: 7, kind: input, shape index: {}]   ;;  %s6540_s8 = inlined_call_operand.vmem [shape: f32[512,16], index: 8, kind: input, shape index: {}]   ;;  %s6541_s9 = inlined_call_operand.vmem [shape: f32[1,16], index: 9, kind: input, shape index: {}]   ;;  %s6542_s10 = inlined_call_operand.hbm [shape: f32[1,16], index: 10, kind: output, shape index: {}]  }
   0x1   :  { %v15_v0 = vstv %s6539_s7 }
   0x2   :  { %16 = vst [vmem:[#allocation5] sm:$0x1] %v15_v0 }
   0x3   :  { %v61_v1 = vlaneseq  ;;  %v59_v3 = vld [vmem:[%s6533_s1] ss:$8 sm:$0xf]  ;;  %v3398_v7 = vld [vmem:[%s6533_s1 + $0x1] ss:$8 sm:$0xf] }
   0x5   :  { %v62_v2 = vshrl.u32 %v61_v1, 7 }
   0x7   :  { %v4367_v4 = vsub.s32 0, %v62_v2  ;;  %v4369_v5 = vsub.s32 2, %v62_v2  ;;  %v4371_v6 = vsub.s32 1, %v62_v2 }
   0x9   :  { %6626 = vst [vmem:[#allocation9_spill] sm:$0xff] %v4367_v4  ;;  %v72_v8 = vrot.slane %v59_v3, %v4369_v5  ;;  %v64_v9 = vrot.slane %v59_v3, %v4367_v4 }
   0xa   :  { %17 = vsyncpa [#allocation7], 0  ;;  %s4295_s7 = smov 111   ;;  %v138_v10 = vrot.slane %v3398_v7, %v4367_v4  ;;  %v68_v11 = vrot.slane %v59_v3, %v4371_v6  ;;  %s4296_s19 = smov 112   ;;  %v146_v12 = vrot.slane %v3398_v7, %v4369_v5  ;;  %v142_v13 = vrot.slane %v3398_v7, %v4371_v6  ;;  %v4467_v53 = vld [vmem:[%s6532_s0 + $0x20] sm:$0xff] }
   0xb   :  { %81 = vrot.lane.b32.xlu1 %v72_v8, %s4295_s7  ;;  %77 = vrot.lane.b32.xlu0 %v64_v9, %s4295_s7  ;;  %v4386_v14 = vsub.s32 3, %v62_v2  ;;  %v3399_v17 = vld [vmem:[%s6533_s1 + $0x2] ss:$8 sm:$0xf]  ;;  %s4297_s24 = smov 113   ;;  %s4298_s25 = smov 127  }
   0xc   :  { %v216_v18 = vrot.slane %v3399_v17, %v4371_v6  ;;  %v212_v19 = vrot.slane %v3399_v17, %v4367_v4  ;;  %v3400_v20 = vld [vmem:[%s6533_s1 + $0x3] ss:$8 sm:$0xf]  ;;  %v220_v22 = vrot.slane %v3399_v17, %v4369_v5  ;;  %v3401_v27 = vld [vmem:[%s6533_s1 + $0x5] ss:$8 sm:$0xf] }
   0xd   :  { %v150_v15 = vrot.slane %v3398_v7, %v4386_v14  ;;  %v76_v16 = vrot.slane %v59_v3, %v4386_v14  ;;  %v286_v21 = vrot.slane %v3400_v20, %v4367_v4  ;;  %v294_v23 = vrot.slane %v3400_v20, %v4369_v5  ;;  %s4299_s28 = smov 1   ;;  %v3402_v32 = vld [vmem:[%s6533_s1 + $0x6] ss:$8 sm:$0xf]  ;;  %s4300_s13 = smov 15  }
   0xe   :  { %v290_v24 = vrot.slane %v3400_v20, %v4371_v6  ;;  %v298_v25 = vrot.slane %v3400_v20, %v4386_v14  ;;  %v224_v26 = vrot.slane %v3399_v17, %v4386_v14  ;;  %v372_v28 = vrot.slane %v3401_v27, %v4371_v6  ;;  %v3403_v35 = vld [vmem:[%s6533_s1 + $0x7] ss:$8 sm:$0xf]  ;;  %s4301_s14 = smov 16   ;;  %s4302_s17 = smov 17  }
   0xf   :  { %151 = vrot.lane.b32.xlu1 %v138_v10, %s4296_s19  ;;  %79 = vrot.lane.b32.xlu0 %v68_v11, %s4295_s7  ;;  %v368_v29 = vrot.slane %v3401_v27, %v4367_v4  ;;  %v380_v30 = vrot.slane %v3401_v27, %v4386_v14  ;;  %v376_v31 = vrot.slane %v3401_v27, %v4369_v5  ;;  %v3404_v42 = vld [vmem:[%s6533_s1 + $0x20] ss:$8 sm:$0xf]  ;;  %v4303_v0 = vmov 0  }
  0x10   :  { %v444_v33 = vrot.slane %v3402_v32, %v4371_v6  ;;  %v440_v34 = vrot.slane %v3402_v32, %v4367_v4  ;;  %v512_v36 = vrot.slane %v3403_v35, %v4367_v4  ;;  %v448_v37 = vrot.slane %v3402_v32, %v4369_v5  ;;  %3870 = vset.pattern.permute.xlu1 %v4303_v0  ;;  %v4497_v10 = vld [vmem:[%s6532_s0 + $0x28] sm:$0xff] }
  0x11   :  { %v520_v38 = vrot.slane %v3403_v35, %v4369_v5  ;;  %v516_v39 = vrot.slane %v3403_v35, %v4371_v6  ;;  %v524_v40 = vrot.slane %v3403_v35, %v4386_v14  ;;  %v452_v41 = vrot.slane %v3402_v32, %v4386_v14  ;;  %3869 = vset.pattern.permute.xlu0 %v4303_v0  ;;  %v54_v35 = vld [vmem:[%s6532_s0] sm:$0xff] }
  0x12   :  { %v588_v43 = vrot.slane %v3404_v42, %v4371_v6  ;;  %v584_v44 = vrot.slane %v3404_v42, %v4367_v4  ;;  %v592_v45 = vrot.slane %v3404_v42, %v4369_v5  ;;  %v596_v46 = vrot.slane %v3404_v42, %v4386_v14 }
  0x13   :  { %155 = vrot.lane.b32.xlu1 %v146_v12, %s4296_s19  ;;  %153 = vrot.lane.b32.xlu0 %v142_v13, %s4296_s19  ;;  %vm85_vm0 = vcmask 908288   ;;  %vm159_vm1 = vcmask 916480   ;;  %vm233_vm2 = vcmask 924672   ;;  %vm307_vm3 = vcmask 1039360  }
  0x14   :  { %vm336_vm4 = vcmask 7168   ;;  %vm188_vm5 = vcmask 130048   ;;  %vm262_vm6 = vcmask 121856   ;;  %vm114_vm7 = vcmask 138240  }
  0x15   :  { %vm709_vm8 = vcmask 588800   ;;  %vm2600_vm9 = vcmask 261120   ;;  %vm3382_vm10 = vcmask 122880  }
  0x17   :  { %157 = vrot.lane.b32.xlu1 %v150_v15, %s4296_s19  ;;  %83 = vrot.lane.b32.xlu0 %v76_v16, %s4295_s7 }
  0x1b   :  { %227 = vrot.lane.b32.xlu1 %v216_v18, %s4297_s24  ;;  %225 = vrot.lane.b32.xlu0 %v212_v19, %s4297_s24 }
  0x1f   :  { %299 = vrot.lane.b32.xlu1 %v286_v21, %s4298_s25  ;;  %229 = vrot.lane.b32.xlu0 %v220_v22, %s4297_s24  ;;  %v4521_v21 = vld [vmem:[%s6532_s0 + $0x8] sm:$0xff]  ;;  %v4526_v22 = vld [vmem:[%s6532_s0 + $0x10] sm:$0xff] }
  0x23   :  { %303 = vrot.lane.b32.xlu1 %v294_v23, %s4298_s25  ;;  %301 = vrot.lane.b32.xlu0 %v290_v24, %s4298_s25 }
  0x27   :  { %305 = vrot.lane.b32.xlu1 %v298_v25, %s4298_s25  ;;  %231 = vrot.lane.b32.xlu0 %v224_v26, %s4297_s24 }
  0x2b   :  { %383 = vrot.lane.b32.xlu1 %v372_v28, %s4299_s28  ;;  %381 = vrot.lane.b32.xlu0 %v368_v29, %s4299_s28 }
  0x2f   :  { %387 = vrot.lane.b32.xlu1 %v380_v30, %s4299_s28  ;;  %385 = vrot.lane.b32.xlu0 %v376_v31, %s4299_s28 }
  0x33   :  { %455 = vrot.lane.b32.xlu1 %v444_v33, %s4300_s13  ;;  %453 = vrot.lane.b32.xlu0 %v440_v34, %s4300_s13  ;;  %v4547_v33 = vld [vmem:[%s6532_s0 + $0x18] sm:$0xff]  ;;  %s4305_s0 = smov [#allocation6]  }
  0x34   :  { %s3390_s16 = sshll.u32 %s4305_s0, 4  ;;  %s3391_s16 = int_to_ptr.vmem [resolvable:$true] %s3390_s16 }
  0x35   :  { %p4276_p1 = scmp.lt.s32.totalorder %s3391_s16, %s3391_s16 }
  0x37   :  { %525 = vrot.lane.b32.xlu1 %v512_v36, %s4301_s14  ;;  %457 = vrot.lane.b32.xlu0 %v448_v37, %s4300_s13 }
  0x3b   :  { %529 = vrot.lane.b32.xlu1 %v520_v38, %s4301_s14  ;;  %527 = vrot.lane.b32.xlu0 %v516_v39, %s4301_s14 }
  0x3f   :  { %531 = vrot.lane.b32.xlu1 %v524_v40, %s4301_s14  ;;  %459 = vrot.lane.b32.xlu0 %v452_v41, %s4300_s13 }
  0x43   :  { %599 = vrot.lane.b32.xlu1 %v588_v43, %s4302_s17  ;;  %597 = vrot.lane.b32.xlu0 %v584_v44, %s4302_s17 }
  0x47   :  { %601 = vrot.lane.b32.xlu0 %v592_v45, %s4302_s17  ;;  %603 = vrot.lane.b32.xlu1 %v596_v46, %s4302_s17 }
  0x7d   :  { %v82_v47 = vpop.permute.xlu1 %81  ;;  %v4460_v48 = vpop.permute.xlu0 %77 }
  0x7e   :  { %v94_v44 = vmul.f32 %v4460_v48, %v54_v35 }
  0x81   :  { %v4462_v49 = vpop.permute.xlu1 %151  ;;  %v80_v50 = vpop.permute.xlu0 %79 }
  0x82   :  { %v86_v23 = vsel %vm85_vm0, %v4460_v48, %v80_v50  ;;  %v87_v24 = vsel %vm85_vm0, %v80_v50, %v82_v47  ;;  %v168_v50 = vmul.f32 %v4462_v49, %v54_v35 }
  0x83   :  { %v95_v25 = vmul.f32 %v86_v23, %v4521_v21  ;;  %v96_v26 = vmul.f32 %v87_v24, %v4526_v22 }
  0x85   :  { %v156_v51 = vpop.permute.xlu1 %155  ;;  %v154_v52 = vpop.permute.xlu0 %153  ;;  %v3799_v39 = vpack.i.bf16 %v96_v26, %v95_v25 }
  0x86   :  { %v160_v29 = vsel %vm159_vm1, %v4462_v49, %v154_v52  ;;  %v161_v30 = vsel %vm159_vm1, %v154_v52, %v156_v51 }
  0x87   :  { %v169_v36 = vmul.f32 %v160_v29, %v4521_v21  ;;  %v170_v37 = vmul.f32 %v161_v30, %v4526_v22 }
  0x89   :  { %v158_v54 = vpop.permute.xlu1 %157  ;;  %v84_v55 = vpop.permute.xlu0 %83 }
  0x8a   :  { %v172_v56 = vmul.f32 %v158_v54, %v4467_v53  ;;  %v98_v57 = vmul.f32 %v4467_v53, %v84_v55  ;;  %v88_v34 = vsel %vm85_vm0, %v82_v47, %v84_v55  ;;  %v162_v40 = vsel %vm159_vm1, %v156_v51, %v158_v54 }
  0x8b   :  { %v97_v41 = vmul.f32 %v4547_v33, %v88_v34  ;;  %v171_v46 = vmul.f32 %v162_v40, %v4547_v33  ;;  %v3804_v51 = vpack.i.bf16 %v170_v37, %v169_v36 }
  0x8c   :  { %112 = vrot.lane.b32.xlu0 %v98_v57, %s4302_s17  ;;  %186 = vrot.lane.b32.xlu1 %v172_v56, %s4301_s14 }
  0x8d   :  { %v228_v58 = vpop.permute.xlu1 %227  ;;  %v4473_v59 = vpop.permute.xlu0 %225  ;;  %v3809_v52 = vpack.i.bf16 %v97_v41, %v94_v44  ;;  %v3814_v49 = vpack.i.bf16 %v171_v46, %v168_v50  ;;  %v6543_v46 = vmov 0.0  }
  0x8e   :  { %v234_v45 = vsel %vm233_vm2, %v4473_v59, %v228_v58  ;;  %786 = vmatprep.mubr.f32.mxu0 %v6543_v46  ;;  %875 = vmatprep.mubr.f32.mxu1 %v6543_v46 }
  0x8f   :  { %v243_v54 = vmul.f32 %v234_v45, %v4521_v21 }
  0x91   :  { %v4475_v60 = vpop.permute.xlu1 %299  ;;  %v4477_v61 = vpop.permute.xlu0 %229 }
  0x92   :  { %v235_v42 = vsel %vm233_vm2, %v228_v58, %v4477_v61  ;;  %v316_v24 = vmul.f32 %v4475_v60, %v54_v35 }
  0x93   :  { %v244_v47 = vmul.f32 %v235_v42, %v4526_v22 }
  0x95   :  { %v4479_v62 = vpop.permute.xlu1 %303  ;;  %v4481_v63 = vpop.permute.xlu0 %301  ;;  %v3819_v57 = vpack.i.bf16 %v244_v47, %v243_v54  ;;  %v685_v54 = vld [vmem:[%s6535_s3] sm:$0xff] }
  0x96   :  { %v308_v48 = vsel %vm307_vm3, %v4475_v60, %v4481_v63  ;;  %v309_v55 = vsel %vm307_vm3, %v4481_v63, %v4479_v62 }
  0x97   :  { %v317_v58 = vmul.f32 %v308_v48, %v4521_v21  ;;  %v318_v0 = vmul.f32 %v309_v55, %v4526_v22  ;;  %v688_v48 = vld [vmem:[%s6535_s3 + $0x18] sm:$0xff] }
  0x98   :  { %v952_v55 = vld [vmem:[%s6533_s1] ss:$8 sm:$0xf] }
  0x99   :  { %v4483_v1 = vpop.permute.xlu1 %305  ;;  %v232_v2 = vpop.permute.xlu0 %231 }
  0x9a   :  { %v320_v3 = vmul.f32 %v4483_v1, %v4467_v53  ;;  %v246_v7 = vmul.f32 %v232_v2, %v4467_v53  ;;  %v236_v56 = vsel %vm233_vm2, %v4477_v61, %v232_v2  ;;  %v242_v2 = vmul.f32 %v4473_v59, %v54_v35 }
  0x9b   :  { %v245_v63 = vmul.f32 %v236_v56, %v4547_v33  ;;  %v961_v56 = vrot.slane %v952_v55, %v4371_v6 }
  0x9c   :  { %260 = vrot.lane.b32.xlu0 %v246_v7, %s4300_s13  ;;  %334 = vrot.lane.b32.xlu1 %v320_v3, %s4299_s28  ;;  %v310_v3 = vsel %vm307_vm3, %v4479_v62, %v4483_v1  ;;  %v3824_v1 = vpack.i.bf16 %v318_v0, %v317_v58  ;;  %v965_v58 = vrot.slane %v952_v55, %v4369_v5  ;;  %v3413_v0 = vld [vmem:[%s6533_s1 + $0x1] ss:$8 sm:$0xf] }
  0x9d   :  { %v4490_v8 = vpop.permute.xlu1 %383  ;;  %v4492_v9 = vpop.permute.xlu0 %381  ;;  %v319_v7 = vmul.f32 %v310_v3, %v4547_v33  ;;  %v3829_v23 = vpack.i.bf16 %v245_v63, %v242_v2  ;;  %v1143_v3 = vrot.slane %v3413_v0, %v4371_v6  ;;  %v1139_v63 = vrot.slane %v3413_v0, %v4367_v4  ;;  %v3414_v2 = vld [vmem:[%s6533_s1 + $0x2] ss:$8 sm:$0xf] }
  0x9f   :  { %v3834_v60 = vpack.i.bf16 %v319_v7, %v316_v24  ;;  %v1147_v7 = vrot.slane %v3413_v0, %v4369_v5  ;;  %v1329_v24 = vrot.slane %v3414_v2, %v4369_v5 }
  0xa1   :  { %v4499_v11 = vpop.permute.xlu1 %387  ;;  %v4501_v12 = vpop.permute.xlu0 %385 }
  0xa2   :  { %v401_v13 = vmul.f32 %v4499_v11, %v4497_v10  ;;  %v390_v61 = vsel %vm336_vm4, %v4490_v8, %v4501_v12  ;;  %v391_v59 = vsel %vm336_vm4, %v4501_v12, %v4499_v11 }
  0xa3   :  { %v399_v62 = vmul.f32 %v390_v61, %v4547_v33  ;;  %v400_v29 = vmul.f32 %v391_v59, %v4467_v53  ;;  %v1151_v61 = vrot.slane %v3413_v0, %v4386_v14 }
  0xa4   :  { %415 = vrot.lane.b32.xlu0 %v401_v13, %s4298_s25  ;;  %v389_v13 = vsel %vm336_vm4, %v4492_v9, %v4490_v8 }
  0xa5   :  { %v4506_v15 = vpop.permute.xlu1 %455  ;;  %v4508_v16 = vpop.permute.xlu0 %453  ;;  %v398_v8 = vmul.f32 %v389_v13, %v4526_v22  ;;  %v1325_v13 = vrot.slane %v3414_v2, %v4371_v6 }
  0xa6   :  { %v461_v34 = vsel %vm262_vm6, %v4508_v16, %v4506_v15 }
  0xa7   :  { %v3839_v30 = vpack.i.bf16 %v399_v62, %v398_v8  ;;  %v1321_v62 = vrot.slane %v3414_v2, %v4367_v4  ;;  %v3416_v8 = vld [vmem:[%s6533_s1 + $0x5] ss:$8 sm:$0xf] }
  0xa9   :  { %v4510_v17 = vpop.permute.xlu1 %525  ;;  %v4512_v18 = vpop.permute.xlu0 %457 }
  0xad   :  { %v4514_v19 = vpop.permute.xlu1 %529  ;;  %v4516_v20 = vpop.permute.xlu0 %527 }
  0xae   :  { %v533_v25 = vsel %vm188_vm5, %v4510_v17, %v4516_v20  ;;  %v534_v26 = vsel %vm188_vm5, %v4516_v20, %v4514_v19 }
  0xaf   :  { %v542_v11 = vmul.f32 %v533_v25, %v4526_v22  ;;  %v543_v12 = vmul.f32 %v534_v26, %v4547_v33 }
  0xb1   :  { %v4533_v27 = vpop.permute.xlu1 %531  ;;  %v4535_v28 = vpop.permute.xlu0 %459  ;;  %v3854_v40 = vpack.i.bf16 %v543_v12, %v542_v11  ;;  %v1717_v11 = vrot.slane %v3416_v8, %v4367_v4  ;;  %v1729_v12 = vrot.slane %v3416_v8, %v4386_v14 }
  0xb2   :  { %v545_v31 = vmul.f32 %v4533_v27, %v4497_v10  ;;  %v473_v32 = vmul.f32 %v4535_v28, %v4497_v10  ;;  %v535_v20 = vsel %vm188_vm5, %v4514_v19, %v4533_v27  ;;  %v470_v19 = vmul.f32 %v461_v34, %v4526_v22 }
  0xb3   :  { %v544_v36 = vmul.f32 %v535_v20, %v4467_v53  ;;  %v541_v27 = vmul.f32 %v4510_v17, %v4521_v21 }
  0xb4   :  { %487 = vrot.lane.b32.xlu1 %v473_v32, %s4297_s24  ;;  %559 = vrot.lane.b32.xlu0 %v545_v31, %s4296_s19  ;;  %v462_v31 = vsel %vm262_vm6, %v4506_v15, %v4512_v18  ;;  %v397_v32 = vmul.f32 %v4492_v9, %v4521_v21  ;;  %v463_v9 = vsel %vm262_vm6, %v4512_v18, %v4535_v28 }
  0xb5   :  { %v4557_v38 = vpop.permute.xlu0 %597  ;;  %v471_v35 = vmul.f32 %v462_v31, %v4547_v33  ;;  %v600_v37 = vpop.permute.xlu1 %599  ;;  %v472_v42 = vmul.f32 %v463_v9, %v4467_v53  ;;  %v3864_v44 = vpack.i.bf16 %v544_v36, %v541_v27  ;;  %v469_v18 = vmul.f32 %v4508_v16, %v4521_v21 }
  0xb6   :  { %v613_v43 = vmul.f32 %v4557_v38, %v4521_v21  ;;  %v605_v50 = vsel %vm114_vm7, %v4557_v38, %v600_v37  ;;  %v686_v38 = vld [vmem:[%s6535_s3 + $0x8] sm:$0xff]  ;;  %v1725_v31 = vrot.slane %v3416_v8, %v4369_v5 }
  0xb7   :  { %v3859_v47 = vpack.i.bf16 %v472_v42, %v469_v18 }
  0xb8   :  { %623 = vrot.lane.b32.xlu1 %v613_v43, %s4295_s7  ;;  %3800 = vrot.lane.b32.xlu0 %v3799_v39, %s4302_s17  ;;  %v3844_v39 = vpack.i.bf16 %v400_v29, %v397_v32  ;;  %v3849_v43 = vpack.i.bf16 %v471_v35, %v470_v19  ;;  %v1721_v29 = vrot.slane %v3416_v8, %v4371_v6  ;;  %v3418_v35 = vld [vmem:[%s6533_s1 + $0x7] ss:$8 sm:$0xf] }
  0xb9   :  { %v602_v41 = vpop.permute.xlu0 %601  ;;  %v604_v45 = vpop.permute.xlu1 %603 }
  0xba   :  { %v606_v15 = vsel %vm114_vm7, %v600_v37, %v602_v41  ;;  %v607_v28 = vsel %vm114_vm7, %v602_v41, %v604_v45  ;;  %v2085_v37 = vrot.slane %v3418_v35, %v4371_v6  ;;  %v2089_v41 = vrot.slane %v3418_v35, %v4369_v5 }
  0xbb   :  { %v615_v17 = vmul.f32 %v606_v15, %v4547_v33  ;;  %v616_v16 = vmul.f32 %v607_v28, %v4467_v53 }
  0xbc   :  { %3805 = vrot.lane.b32.xlu1 %v3804_v51, %s4301_s14  ;;  %3810 = vrot.lane.b32.xlu0 %v3809_v52, %s4302_s17  ;;  %v614_v51 = vmul.f32 %v605_v50, %v4526_v22  ;;  %v617_v52 = vmul.f32 %v604_v45, %v4497_v10  ;;  %v687_v10 = vld [vmem:[%s6535_s3 + $0x10] sm:$0xff] }
  0xc0   :  { %3815 = vrot.lane.b32.xlu1 %v3814_v49, %s4301_s14  ;;  %3820 = vrot.lane.b32.xlu0 %v3819_v57, %s4300_s13  ;;  %v957_v49 = vrot.slane %v952_v55, %v4367_v4  ;;  %v969_v57 = vrot.slane %v952_v55, %v4386_v14 }
  0xc4   :  { %3825 = vrot.lane.b32.xlu1 %v3824_v1, %s4299_s28  ;;  %3830 = vrot.lane.b32.xlu0 %v3829_v23, %s4300_s13  ;;  %v1333_v1 = vrot.slane %v3414_v2, %v4386_v14  ;;  %v3415_v23 = vld [vmem:[%s6533_s1 + $0x3] ss:$8 sm:$0xf] }
  0xc5   :  { %v1507_v59 = vrot.slane %v3415_v23, %v4371_v6  ;;  %v1503_v25 = vrot.slane %v3415_v23, %v4367_v4  ;;  %v1515_v26 = vrot.slane %v3415_v23, %v4386_v14 }
  0xc8   :  { %3835 = vrot.lane.b32.xlu1 %v3834_v60, %s4299_s28  ;;  %3840 = vrot.lane.b32.xlu0 %v3839_v30, %s4298_s25  ;;  %v1511_v60 = vrot.slane %v3415_v23, %v4369_v5  ;;  %v3417_v30 = vld [vmem:[%s6533_s1 + $0x6] ss:$8 sm:$0xf] }
  0xc9   :  { %v1903_v20 = vrot.slane %v3417_v30, %v4371_v6  ;;  %v1899_v32 = vrot.slane %v3417_v30, %v4367_v4  ;;  %v1911_v34 = vrot.slane %v3417_v30, %v4386_v14  ;;  %v1907_v36 = vrot.slane %v3417_v30, %v4369_v5 }
  0xcc   :  { %3845 = vrot.lane.b32.xlu1 %v3844_v39, %s4298_s25  ;;  %3855 = vrot.lane.b32.xlu0 %v3854_v40, %s4296_s19  ;;  %v2081_v39 = vrot.slane %v3418_v35, %v4367_v4  ;;  %v2093_v40 = vrot.slane %v3418_v35, %v4386_v14 }
  0xd0   :  { %3850 = vrot.lane.b32.xlu1 %v3849_v43, %s4297_s24  ;;  %3865 = vrot.lane.b32.xlu0 %v3864_v44, %s4296_s19 }
  0xd4   :  { %3860 = vrot.lane.b32.xlu1 %v3859_v47, %s4297_s24  ;;  %627 = vrot.lane.b32.xlu0 %v615_v17, %s4295_s7 }
  0xd8   :  { %625 = vrot.lane.b32.xlu1 %v614_v51, %s4295_s7  ;;  %629 = vrot.lane.b32.xlu0 %v616_v16, %s4295_s7 }
  0xdc   :  { %631 = vrot.lane.b32.xlu1 %v617_v52, %s4295_s7  ;;  %691 = vperm.xlu0 %3869, %v685_v54  }
  0xe0   :  { %696 = vperm.xlu1 %3870, %v686_v38   ;;  %706 = vperm.xlu0 %3869, %v688_v48  }
  0xe4   :  { %701 = vperm.xlu1 %3870, %v687_v10   ;;  %972 = vrot.lane.b32.xlu0 %v961_v56, %s4295_s7 }
  0xe8   :  { %970 = vrot.lane.b32.xlu1 %v957_v49, %s4295_s7  ;;  %976 = vrot.lane.b32.xlu0 %v969_v57, %s4295_s7 }
  0xec   :  { %974 = vrot.lane.b32.xlu1 %v965_v58, %s4295_s7  ;;  %1154 = vrot.lane.b32.xlu0 %v1143_v3, %s4296_s19 }
  0xf0   :  { %1152 = vrot.lane.b32.xlu1 %v1139_v63, %s4296_s19  ;;  %1158 = vrot.lane.b32.xlu0 %v1151_v61, %s4296_s19 }
  0xf4   :  { %1156 = vrot.lane.b32.xlu1 %v1147_v7, %s4296_s19  ;;  %1336 = vrot.lane.b32.xlu0 %v1325_v13, %s4297_s24 }
  0xf8   :  { %1334 = vrot.lane.b32.xlu1 %v1321_v62, %s4297_s24  ;;  %1340 = vrot.lane.b32.xlu0 %v1333_v1, %s4297_s24 }
  0xfc   :  { %1338 = vrot.lane.b32.xlu1 %v1329_v24, %s4297_s24  ;;  %1518 = vrot.lane.b32.xlu0 %v1507_v59, %s4298_s25 }
  0xfe   :  { %v113_v9 = vpop.permute.xlu0 %112  ;;  %v187_v19 = vpop.permute.xlu1 %186 }
 0x100   :  { %1516 = vrot.lane.b32.xlu1 %v1503_v25, %s4298_s25  ;;  %1522 = vrot.lane.b32.xlu0 %v1515_v26, %s4298_s25 }
 0x104   :  { %1520 = vrot.lane.b32.xlu1 %v1511_v60, %s4298_s25  ;;  %1732 = vrot.lane.b32.xlu0 %v1721_v29, %s4299_s28 }
 0x108   :  { %1730 = vrot.lane.b32.xlu1 %v1717_v11, %s4299_s28  ;;  %1736 = vrot.lane.b32.xlu0 %v1729_v12, %s4299_s28 }
 0x10c   :  { %1734 = vrot.lane.b32.xlu1 %v1725_v31, %s4299_s28  ;;  %1914 = vrot.lane.b32.xlu0 %v1903_v20, %s4300_s13 }
 0x10e   :  { %v261_v27 = vpop.permute.xlu0 %260  ;;  %v335_v15 = vpop.permute.xlu1 %334 }
 0x110   :  { %1912 = vrot.lane.b32.xlu1 %v1899_v32, %s4300_s13  ;;  %1918 = vrot.lane.b32.xlu0 %v1911_v34, %s4300_s13 }
 0x114   :  { %1916 = vrot.lane.b32.xlu1 %v1907_v36, %s4300_s13  ;;  %2096 = vrot.lane.b32.xlu0 %v2085_v37, %s4301_s14 }
 0x116   :  { %v4749_v42 = vpop.permute.xlu0 %415 }
 0x118   :  { %2094 = vrot.lane.b32.xlu1 %v2081_v39, %s4301_s14  ;;  %2100 = vrot.lane.b32.xlu0 %v2093_v40, %s4301_s14 }
 0x11c   :  { %2098 = vrot.lane.b32.xlu1 %v2089_v41, %s4301_s14 }
 0x126   :  { %v4751_v43 = vpop.permute.xlu1 %487  ;;  %v4753_v44 = vpop.permute.xlu0 %559 }
 0x12a   :  { %v4755_v45 = vpop.permute.xlu1 %623  ;;  %v3801_v18 = vpop.permute.xlu0 %3800 }
 0x12b   :  { %v3803_v17 = vunpack.i.h.bf16 %v3801_v18  ;;  %v3802_v28 = vunpack.i.l.bf16 %v3801_v18 }
 0x12d   :  { %v116_v54 = vsel %vm114_vm7, %v3802_v28, %v3803_v17 }
 0x12e   :  { %v3806_v47 = vpop.permute.xlu1 %3805  ;;  %v3811_v50 = vpop.permute.xlu0 %3810 }
 0x12f   :  { %v3808_v16 = vunpack.i.h.bf16 %v3806_v47  ;;  %v3807_v51 = vunpack.i.l.bf16 %v3806_v47  ;;  %v3813_v52 = vunpack.i.h.bf16 %v3811_v50  ;;  %v3812_v38 = vunpack.i.l.bf16 %v3811_v50 }
 0x131   :  { %v190_v48 = vsel %vm188_vm5, %v3807_v51, %v3808_v16  ;;  %v115_v0 = vsel %vm114_vm7, %v3812_v38, %v3802_v28  ;;  %v118_v3 = vsel %vm114_vm7, %v3813_v52, %v113_v9  ;;  %v117_v63 = vsel %vm114_vm7, %v3803_v17, %v3813_v52 }
 0x132   :  { %v3816_v10 = vpop.permute.xlu1 %3815  ;;  %v3821_v55 = vpop.permute.xlu0 %3820  ;;  %v3500_v56 = vpack.c.bf16 %v190_v48, %v116_v54 }
 0x133   :  { %v3818_v49 = vunpack.i.h.bf16 %v3816_v10  ;;  %v3817_v57 = vunpack.i.l.bf16 %v3816_v10  ;;  %v3823_v58 = vunpack.i.h.bf16 %v3821_v55  ;;  %v3822_v61 = vunpack.i.l.bf16 %v3821_v55 }
 0x134   :  { %3501 = vmatprep.subr.bf16.mxu0 %v3500_v56 }
 0x135   :  { %v189_v2 = vsel %vm188_vm5, %v3817_v57, %v3807_v51  ;;  %v192_v7 = vsel %vm188_vm5, %v3818_v49, %v187_v19  ;;  %v191_v13 = vsel %vm188_vm5, %v3808_v16, %v3818_v49  ;;  %v264_v29 = vsel %vm262_vm6, %v3822_v61, %v3823_v58 }
 0x136   :  { %v3826_v62 = vpop.permute.xlu1 %3825  ;;  %v3831_v1 = vpop.permute.xlu0 %3830  ;;  %v3502_v23 = vpack.c.bf16 %v189_v2, %v115_v0  ;;  %v3516_v24 = vpack.c.bf16 %v192_v7, %v118_v3  ;;  %v3518_v59 = vpack.c.bf16 %v191_v13, %v117_v63 }
 0x137   :  { %v3828_v25 = vunpack.i.h.bf16 %v3826_v62  ;;  %v3827_v26 = vunpack.i.l.bf16 %v3826_v62  ;;  %v3833_v8 = vunpack.i.h.bf16 %v3831_v1  ;;  %v3832_v60 = vunpack.i.l.bf16 %v3831_v1 }
 0x138   :  { %3503 = vmatpush1.bf16.msra.mxu0 %v3502_v23  ;;  %3517 = vmatprep.subr.bf16.mxu1 %v3516_v24 }
 0x139   :  { %3519 = vmatpush1.bf16.msra.mxu1 %v3518_v59  ;;  %v338_v11 = vsel %vm336_vm4, %v3827_v26, %v3828_v25  ;;  %v263_v36 = vsel %vm262_vm6, %v3832_v60, %v3822_v61  ;;  %v266_v37 = vsel %vm262_vm6, %v3833_v8, %v261_v27  ;;  %v265_v39 = vsel %vm262_vm6, %v3823_v58, %v3833_v8 }
 0x13a   :  { %v3836_v12 = vpop.permute.xlu1 %3835  ;;  %v3841_v30 = vpop.permute.xlu0 %3840  ;;  %v3504_v31 = vpack.c.bf16 %v338_v11, %v264_v29 }
 0x13b   :  { %v3838_v20 = vunpack.i.h.bf16 %v3836_v12  ;;  %v3837_v32 = vunpack.i.l.bf16 %v3836_v12  ;;  %v3843_v34 = vunpack.i.h.bf16 %v3841_v30  ;;  %v3842_v35 = vunpack.i.l.bf16 %v3841_v30 }
 0x13c   :  { %3505 = vmatprep.subr.bf16.mxu0 %v3504_v31  ;;  %v646_v31 = vld [vmem:[%s6534_s2 + $0x8] sm:$0xff] }
 0x13d   :  { %v337_v40 = vsel %vm336_vm4, %v3837_v32, %v3827_v26  ;;  %v340_v41 = vsel %vm336_vm4, %v3838_v20, %v335_v15  ;;  %v418_v9 = vsel %vm307_vm3, %v3842_v35, %v3843_v34  ;;  %v339_v19 = vsel %vm336_vm4, %v3828_v25, %v3838_v20  ;;  %v648_v20 = vld [vmem:[%s6534_s2 + $0x18] sm:$0xff] }
 0x13e   :  { %v3846_v18 = vpop.permute.xlu1 %3845  ;;  %v3856_v17 = vpop.permute.xlu0 %3855  ;;  %v3506_v28 = vpack.c.bf16 %v337_v40, %v263_v36  ;;  %v3520_v47 = vpack.c.bf16 %v340_v41, %v266_v37  ;;  %v3508_v50 = vpack.c.bf16 %v418_v9, %v4526_v22  ;;  %v3522_v16 = vpack.c.bf16 %v339_v19, %v265_v39  ;;  %v3419_v37 = vld [vmem:[%s6533_s1 + $0x20] ss:$8 sm:$0xf]  ;;  %s4271_s1 = scalar_lea.vmem %s3391_s16, 16 }
 0x13f   :  { %v3848_v51 = vunpack.i.h.bf16 %v3846_v18  ;;  %v3847_v52 = vunpack.i.l.bf16 %v3846_v18  ;;  %v3858_v27 = vunpack.i.h.bf16 %v3856_v17  ;;  %v3857_v38 = vunpack.i.l.bf16 %v3856_v17  ;;  %p4272_p0 = scmp.ne.s32.totalorder %s3391_s16, %s4271_s1 }
 0x140   :  { %3507 = vmatpush1.bf16.msra.mxu0 %v3506_v28  ;;  %3521 = vmatprep.subr.bf16.mxu1 %v3520_v47  ;;  %v2263_v41 = vrot.slane %v3419_v37, %v4367_v4  ;;  %v2271_v18 = vrot.slane %v3419_v37, %v4369_v5  ;;  %v2267_v47 = vrot.slane %v3419_v37, %v4371_v6 }
 0x141   :  { %3509 = vmatprep.subr.bf16.mxu0 %v3508_v50  ;;  %3523 = vmatpush1.bf16.msra.mxu1 %v3522_v16  ;;  %v417_v15 = vsel %vm307_vm3, %v3847_v52, %v3842_v35  ;;  %v420_v54 = vsel %vm307_vm3, %v3848_v51, %v4749_v42  ;;  %v419_v48 = vsel %vm307_vm3, %v3843_v34, %v3848_v51 }
 0x142   :  { %v3851_v10 = vpop.permute.xlu1 %3850  ;;  %v3866_v55 = vpop.permute.xlu0 %3865  ;;  %v3510_v22 = vpack.c.bf16 %v417_v15, %v4521_v21  ;;  %v3524_v56 = vpack.c.bf16 %v420_v54, %v4467_v53  ;;  %v3526_v49 = vpack.c.bf16 %v419_v48, %v4547_v33  ;;  %v562_v42 = vsel %vm159_vm1, %v3857_v38, %v3858_v27 }
 0x143   :  { %v3853_v57 = vunpack.i.h.bf16 %v3851_v10  ;;  %v3852_v58 = vunpack.i.l.bf16 %v3851_v10  ;;  %v3868_v0 = vunpack.i.h.bf16 %v3866_v55  ;;  %v3867_v3 = vunpack.i.l.bf16 %v3866_v55 }
 0x144   :  { %3511 = vmatpush1.bf16.msra.mxu0 %v3510_v22  ;;  %3525 = vmatprep.subr.bf16.mxu1 %v3524_v56  ;;  %v2275_v50 = vrot.slane %v3419_v37, %v4386_v14 }
 0x145   :  { %3527 = vmatpush1.bf16.msra.mxu1 %v3526_v49  ;;  %v490_v63 = vsel %vm233_vm2, %v3852_v58, %v3853_v57  ;;  %v561_v53 = vsel %vm159_vm1, %v3867_v3, %v3857_v38  ;;  %v564_v33 = vsel %vm159_vm1, %v3868_v0, %v4753_v44  ;;  %v563_v24 = vsel %vm159_vm1, %v3858_v27, %v3868_v0 }
 0x146   :  { %v3861_v61 = vpop.permute.xlu1 %3860  ;;  %v3512_v2 = vpack.c.bf16 %v562_v42, %v490_v63  ;;  %v628_v21 = vpop.permute.xlu0 %627 }
 0x147   :  { %v3863_v7 = vunpack.i.h.bf16 %v3861_v61  ;;  %v3862_v13 = vunpack.i.l.bf16 %v3861_v61 }
 0x148   :  { %3513 = vmatprep.subr.bf16.mxu0 %v3512_v2 }
 0x149   :  { %v489_v62 = vsel %vm233_vm2, %v3862_v13, %v3852_v58  ;;  %v492_v1 = vsel %vm233_vm2, %v3863_v7, %v4751_v43  ;;  %v491_v23 = vsel %vm233_vm2, %v3853_v57, %v3863_v7  ;;  %v645_v43 = vld [vmem:[%s6534_s2] sm:$0xff] }
 0x14a   :  { %v626_v59 = vpop.permute.xlu1 %625  ;;  %v3514_v25 = vpack.c.bf16 %v561_v53, %v489_v62  ;;  %v3528_v26 = vpack.c.bf16 %v564_v33, %v492_v1  ;;  %v3530_v8 = vpack.c.bf16 %v563_v24, %v491_v23  ;;  %v630_v29 = vpop.permute.xlu0 %629 }
 0x14b   :  { %v634_v60 = vsel %vm85_vm0, %v626_v59, %v628_v21  ;;  %v633_v11 = vsel %vm85_vm0, %v4755_v45, %v626_v59  ;;  %v635_v30 = vsel %vm85_vm0, %v628_v21, %v630_v29  ;;  %v647_v45 = vld [vmem:[%s6534_s2 + $0x10] sm:$0xff]  ;;  %s4275_s2 = scalar_lea.vmem %s3391_s16, 32 }
 0x14c   :  { %3515 = vmatpush1.bf16.msra.mxu0 %v3514_v25  ;;  %3529 = vmatprep.subr.bf16.mxu1 %v3528_v26  ;;  %p4277_p2 = scmp.lt.s32.totalorder %s4275_s2, %s4271_s1 }
 0x14d   :  { %738 = vmatprep.subr.mxu0 %v634_v60  ;;  %3531 = vmatpush1.bf16.msra.mxu1 %v3530_v8 }
 0x14e   :  { %v632_v44 = vpop.permute.xlu1 %631  ;;  %p4278_p3 = por %p4277_p2, %p4276_p1 }
 0x14f   :  { %v636_v12 = vsel %vm85_vm0, %v630_v29, %v632_v44 }
 0x150   :  { %739 = vmatpush1.msra.mxu0 %v633_v11  ;;  %827 = vmatprep.subr.mxu1 %v636_v12  ;;  %p4279_p4 = pnand %p4278_p3, %p4272_p0 }
 0x151   :  { %3405 = vmatmul.mubr.msk.f32.vlgmr.msra.gmra.mrb[0].mxu0 %vm709_vm8, %v645_v43  ;;  %828 = vmatpush1.msra.mxu1 %v635_v30 }
 0x152   :  { %3409 = vmatmul.mubr.msk.f32.vlgmr.msra.gmra.mrb[0].mxu1 %vm709_vm8, %v645_v43  ;;  %792 = vmatprep.mubr.f32.mxu0 %v6543_v46 }
 0x153   :  { %881 = vmatprep.mubr.f32.mxu1 %v6543_v46 }
 0x155   :  { %3406 = vmatmul.mubr.msk.f32.gmra.mrb[2].mxu0 %vm709_vm8, %v646_v31 }
 0x156   :  { %3410 = vmatmul.mubr.msk.f32.gmra.mrb[2].mxu1 %vm709_vm8, %v646_v31  ;;  %798 = vmatprep.mubr.f32.mxu0 %v6543_v46 }
 0x157   :  { %887 = vmatprep.mubr.f32.mxu1 %v6543_v46 }
 0x159   :  { %3407 = vmatmul.mubr.msk.f32.gmra.mrb[4].mxu0 %vm709_vm8, %v647_v45 }
 0x15a   :  { %3411 = vmatmul.mubr.msk.f32.gmra.mrb[4].mxu1 %vm709_vm8, %v647_v45  ;;  %804 = vmatprep.mubr.f32.mxu0 %v6543_v46 }
 0x15b   :  { %893 = vmatprep.mubr.f32.mxu1 %v6543_v46  ;;  %v692_v6 = vpop.permute.xlu0 %691 }
 0x15d   :  { %3408 = vmatmul.mubr.msk.f32.gmra.mrb[6].mxu0 %vm709_vm8, %v648_v20 }
 0x15e   :  { %3412 = vmatmul.mubr.msk.f32.gmra.mrb[6].mxu1 %vm709_vm8, %v648_v20 }
 0x15f   :  { %v4823_v32 = vpop.permute.xlu1 %696  ;;  %v4846_v14 = vpop.permute.xlu0 %706 }
 0x163   :  { %v4825_v34 = vpop.permute.xlu1 %701  ;;  %v973_v54 = vpop.permute.xlu0 %972 }
 0x167   :  { %v971_v35 = vpop.permute.xlu1 %970  ;;  %v4848_v48 = vpop.permute.xlu0 %976 }
 0x168   :  { %v986_v36 = vmul.f32 0.0, %v971_v35  ;;  %v4859_v61 = vsel %vm85_vm0, %v971_v35, %v973_v54 }
 0x16a   :  { %v3876_v39 = vpack.i.bf16 %v986_v36, %v986_v36 }
 0x16b   :  { %v975_v40 = vpop.permute.xlu1 %974  ;;  %v1155_v10 = vpop.permute.xlu0 %1154 }
 0x16c   :  { %3877 = vrot.lane.b32.xlu0 %v3876_v39, %s4302_s17  ;;  %3872 = vrot.lane.b32.xlu1 %v3876_v39, %s4302_s17  ;;  %v4862_v2 = vsel %vm85_vm0, %v973_v54, %v975_v40  ;;  %v4866_v7 = vsel %vm85_vm0, %v975_v40, %v4848_v48 }
 0x16f   :  { %v1153_v9 = vpop.permute.xlu1 %1152  ;;  %v4850_v55 = vpop.permute.xlu0 %1158 }
 0x170   :  { %v1168_v19 = vmul.f32 0.0, %v1153_v9  ;;  %2276 = vrot.lane.b32.xlu0 %v2263_v41, %s4302_s17  ;;  %v4869_v13 = vsel %vm159_vm1, %v1153_v9, %v1155_v10 }
 0x172   :  { %v3881_v17 = vpack.i.bf16 %v1168_v19, %v1168_v19 }
 0x173   :  { %v1157_v28 = vpop.permute.xlu1 %1156  ;;  %v1337_v22 = vpop.permute.xlu0 %1336 }
 0x174   :  { %3882 = vrot.lane.b32.xlu1 %v3881_v17, %s4301_s14  ;;  %2280 = vrot.lane.b32.xlu0 %v2271_v18, %s4302_s17  ;;  %v4874_v33 = vsel %vm159_vm1, %v1155_v10, %v1157_v28  ;;  %v4878_v62 = vsel %vm159_vm1, %v1157_v28, %v4850_v55 }
 0x177   :  { %v1335_v16 = vpop.permute.xlu1 %1334  ;;  %v4852_v56 = vpop.permute.xlu0 %1340 }
 0x178   :  { %2278 = vrot.lane.b32.xlu1 %v2267_v47, %s4302_s17  ;;  %2282 = vrot.lane.b32.xlu0 %v2275_v50, %s4302_s17  ;;  %v1350_v51 = vmul.f32 0.0, %v1335_v16  ;;  %v4881_v1 = vsel %vm233_vm2, %v1335_v16, %v1337_v22 }
 0x17a   :  { %v3896_v52 = vpack.i.bf16 %v1350_v51, %v1350_v51 }
 0x17b   :  { %v1339_v27 = vpop.permute.xlu1 %1338  ;;  %v1519_v49 = vpop.permute.xlu0 %1518 }
 0x17c   :  { %3887 = vrot.lane.b32.xlu1 %v3881_v17, %s4301_s14  ;;  %3897 = vrot.lane.b32.xlu0 %v3896_v52, %s4300_s13  ;;  %v4884_v25 = vsel %vm233_vm2, %v1337_v22, %v1339_v27  ;;  %v4888_v26 = vsel %vm233_vm2, %v1339_v27, %v4852_v56 }
 0x17f   :  { %v1517_v5 = vpop.permute.xlu1 %1516  ;;  %v4854_v58 = vpop.permute.xlu0 %1522 }
 0x180   :  { %v1532_v38 = vmul.f32 0.0, %v1517_v5  ;;  %3892 = vrot.lane.b32.xlu1 %v3896_v52, %s4300_s13  ;;  %v4891_v44 = vsel %vm307_vm3, %v1517_v5, %v1519_v49 }
 0x182   :  { %v3906_v15 = vpack.i.bf16 %v1532_v38, %v1532_v38 }
 0x183   :  { %v1521_v57 = vpop.permute.xlu1 %1520  ;;  %v1733_v3 = vpop.permute.xlu0 %1732 }
 0x184   :  { %3902 = vrot.lane.b32.xlu1 %v3906_v15, %s4299_s28  ;;  %3907 = vrot.lane.b32.xlu0 %v3906_v15, %s4299_s28  ;;  %v4894_v43 = vsel %vm307_vm3, %v1519_v49, %v1521_v57  ;;  %v4900_v30 = vsel %vm307_vm3, %v1521_v57, %v4854_v58 }
 0x187   :  { %v4856_v0 = vpop.permute.xlu1 %1730  ;;  %v1737_v42 = vpop.permute.xlu0 %1736 }
 0x188   :  { %v4904_v31 = vsel %vm336_vm4, %v4856_v0, %v1733_v3  ;;  %v4910_v37 = vmul.f32 0.0, %v1737_v42 }
 0x18a   :  { %6629 = vst [vmem:[#allocation12_spill] sm:$0xff] %v4910_v37 }
 0x18b   :  { %v1735_v63 = vpop.permute.xlu1 %1734  ;;  %v1915_v45 = vpop.permute.xlu0 %1914 }
 0x18c   :  { %v4918_v18 = vsel %vm336_vm4, %v1733_v3, %v1735_v63  ;;  %v4921_v17 = vsel %vm336_vm4, %v1735_v63, %v1737_v42 }
 0x18d   :  { %6631 = vst [vmem:[#allocation14_spill] sm:$0xff] %v4918_v18  ;;  %6632 = vst [vmem:[#allocation15_spill] sm:$0xff] %v4921_v17 }
 0x18f   :  { %v4871_v21 = vpop.permute.xlu1 %1912 }
 0x190   :  { %v4929_v51 = vsel %vm262_vm6, %v4871_v21, %v1915_v45 }
 0x193   :  { %v4923_v28 = vpop.permute.xlu1 %1916 }
 0x194   :  { %6633 = vst [vmem:[#allocation16_spill] sm:$0xff] %v4923_v28  ;;  %v4933_v52 = vsel %vm262_vm6, %v1915_v45, %v4923_v28 }
 0x224   :  { %v788_v53 = vpop.f32.mrb[0].mxu0 }
 0x225   :  { %v789_v23 = vadd.f32 %v788_v53, %v692_v6  ;;  %v790_v24 = vpop.f32.mrb[1].mxu0  ;;  %v877_v59 = vpop.f32.mrb[0].mxu1 }
 0x226   :  { %v791_v8 = vadd.f32 %v790_v24, %v692_v6  ;;  %v878_v60 = vadd.f32 %v877_v59, %v692_v6  ;;  %v879_v29 = vpop.f32.mrb[1].mxu1 }
 0x227   :  { %v4896_v11 = vmax.f32 %v789_v23, 0.0  ;;  %v880_v12 = vadd.f32 %v879_v29, %v692_v6 }
 0x228   :  { %v4906_v20 = vmax.f32 %v791_v8, 0.0  ;;  %v4908_v35 = vmax.f32 %v878_v60, 0.0  ;;  %v794_v36 = vpop.f32.mrb[2].mxu0 }
 0x229   :  { %6627 = vst [vmem:[#allocation10_spill] sm:$0xff] %v4896_v11  ;;  %v4912_v39 = vmax.f32 %v880_v12, 0.0  ;;  %v795_v40 = vadd.f32 %v794_v36, %v4823_v32  ;;  %v796_v41 = vpop.f32.mrb[3].mxu0  ;;  %v883_v9 = vpop.f32.mrb[2].mxu1  ;;  %v987_v19 = vmul.f32 %v4859_v61, %v4896_v11  ;;  %v1169_v5 = vmul.f32 %v4869_v13, %v4896_v11 }
 0x22a   :  { %6628 = vst [vmem:[#allocation11_spill] sm:$0xff] %v4908_v35  ;;  %v797_v47 = vadd.f32 %v796_v41, %v4823_v32  ;;  %v884_v50 = vadd.f32 %v883_v9, %v4823_v32  ;;  %v885_v16 = vpop.f32.mrb[3].mxu1  ;;  %v988_v27 = vmul.f32 %v4862_v2, %v4906_v20  ;;  %v989_v54 = vmul.f32 %v4866_v7, %v4908_v35 }
 0x22b   :  { %6630 = vst [vmem:[#allocation13_spill] sm:$0xff] %v4912_v39  ;;  %v4939_v38 = vmax.f32 %v795_v40, 0.0  ;;  %v886_v15 = vadd.f32 %v885_v16, %v4823_v32  ;;  %v990_v10 = vmul.f32 %v4848_v48, %v4912_v39  ;;  %v1170_v42 = vmul.f32 %v4874_v33, %v4906_v20 }
 0x22c   :  { %v800_v6 = vpop.f32.mrb[4].mxu0  ;;  %v4946_v22 = vmax.f32 %v797_v47, 0.0  ;;  %v3911_v63 = vpack.i.bf16 %v988_v27, %v987_v19  ;;  %v4951_v53 = vmax.f32 %v884_v50, 0.0  ;;  %v1171_v59 = vmul.f32 %v4878_v62, %v4908_v35 }
 0x22d   :  { %v801_v49 = vadd.f32 %v800_v6, %v4825_v34  ;;  %v802_v57 = vpop.f32.mrb[5].mxu0  ;;  %v889_v3 = vpop.f32.mrb[4].mxu1  ;;  %v3916_v24 = vpack.i.bf16 %v990_v10, %v989_v54  ;;  %v3921_v29 = vpack.i.bf16 %v1170_v42, %v1169_v5  ;;  %v1172_v12 = vmul.f32 %v4850_v55, %v4912_v39 }
 0x22e   :  { %6634 = vst [vmem:[#allocation17_spill] sm:$0xff] %v4951_v53  ;;  %v803_v32 = vadd.f32 %v802_v57, %v4825_v34  ;;  %v891_v23 = vpop.f32.mrb[5].mxu1  ;;  %v890_v8 = vadd.f32 %v889_v3, %v4825_v34  ;;  %3912 = vrot.lane.b32.xlu1 %v3911_v63, %s4302_s17  ;;  %v4961_v45 = vmax.f32 %v886_v15, 0.0  ;;  %v1351_v41 = vmul.f32 %v4881_v1, %v4896_v11 }
 0x22f   :  { %v892_v60 = vadd.f32 %v891_v23, %v4825_v34  ;;  %v4963_v36 = vmax.f32 %v801_v49, 0.0  ;;  %3917 = vrot.lane.b32.xlu0 %v3916_v24, %s4302_s17  ;;  %v1352_v9 = vmul.f32 %v4884_v25, %v4906_v20  ;;  %v3926_v16 = vpack.i.bf16 %v1172_v12, %v1171_v59  ;;  %v4979_v49 = vpop.permute.xlu0 %1918 }
 0x230   :  { %6635 = vst [vmem:[#allocation18_spill] sm:$0xff] %v4961_v45  ;;  %v806_v40 = vpop.f32.mrb[6].mxu0  ;;  %v4970_v34 = vmax.f32 %v803_v32, 0.0  ;;  %v1353_v27 = vmul.f32 %v4888_v26, %v4908_v35  ;;  %v1354_v10 = vmul.f32 %v4852_v56, %v4912_v39  ;;  %6638 = vst [vmem:[#allocation21_spill] sm:$0xff] %v4979_v49  ;;  %v4981_v57 = vmax.f32 %v890_v8, 0.0  ;;  %v4990_v32 = vpop.permute.xlu1 %2094 }
 0x231   :  { %6636 = vst [vmem:[#allocation19_spill] sm:$0xff] %v4963_v36  ;;  %v807_v19 = vadd.f32 %v806_v40, %v4846_v14  ;;  %v808_v47 = vpop.f32.mrb[7].mxu0  ;;  %v895_v50 = vpop.f32.mrb[6].mxu1  ;;  %v3931_v54 = vpack.i.bf16 %v1352_v9, %v1351_v41  ;;  %v4983_v3 = vmax.f32 %v892_v60, 0.0  ;;  %v1533_v63 = vmul.f32 %v4891_v44, %v4896_v11 }
 0x232   :  { %6637 = vst [vmem:[#allocation20_spill] sm:$0xff] %v4970_v34  ;;  %v809_v5 = vadd.f32 %v808_v47, %v4846_v14  ;;  %v896_v15 = vadd.f32 %v895_v50, %v4846_v14  ;;  %v897_v6 = vpop.f32.mrb[7].mxu1  ;;  %6639 = vst [vmem:[#allocation22_spill] sm:$0xff] %v4981_v57  ;;  %3922 = vrot.lane.b32.xlu1 %v3921_v29, %s4301_s14  ;;  %v1534_v42 = vmul.f32 %v4894_v43, %v4906_v20 }
 0x233   :  { %6640 = vst [vmem:[#allocation23_spill] sm:$0xff] %v4983_v3  ;;  %v4992_v23 = vmax.f32 %v807_v19, 0.0  ;;  %v898_v24 = vadd.f32 %v897_v6, %v4846_v14  ;;  %3927 = vrot.lane.b32.xlu0 %v3926_v16, %s4301_s14  ;;  %v3936_v59 = vpack.i.bf16 %v1354_v10, %v1353_v27  ;;  %v1535_v8 = vmul.f32 %v4900_v30, %v4908_v35  ;;  %v5028_v10 = vpop.permute.xlu0 %2096 }
 0x234   :  { %v4998_v60 = vmax.f32 %v809_v5, 0.0  ;;  %v3941_v29 = vpack.i.bf16 %v1534_v42, %v1533_v63  ;;  %v1536_v12 = vmul.f32 %v4854_v58, %v4912_v39  ;;  %v1747_v40 = vmul.f32 %v4904_v31, %v4906_v20 }
 0x235   :  { %6641 = vst [vmem:[#allocation24_spill] sm:$0xff] %v4992_v23  ;;  %v5004_v41 = vmax.f32 %v896_v15, 0.0  ;;  %v1748_v14 = vmul.f32 %v4918_v18, %v4908_v35  ;;  %v1746_v9 = vmul.f32 %v4856_v0, %v4896_v11  ;;  %v1751_v19 = vmul.f32 %v4856_v0, %v4939_v38 }
 0x236   :  { %6642 = vst [vmem:[#allocation25_spill] sm:$0xff] %v4998_v60  ;;  %3932 = vrot.lane.b32.xlu1 %v3931_v54, %s4300_s13  ;;  %v3946_v47 = vpack.i.bf16 %v1536_v12, %v1535_v8  ;;  %v992_v50 = vmul.f32 %v4859_v61, %v4939_v38  ;;  %v993_v16 = vmul.f32 %v4862_v2, %v4946_v22  ;;  %v5042_v12 = vpop.permute.xlu1 %2098 }
 0x237   :  { %6643 = vst [vmem:[#allocation26_spill] sm:$0xff] %v5004_v41  ;;  %v5019_v27 = vmul.f32 %v4866_v7, %v4951_v53  ;;  %3937 = vrot.lane.b32.xlu0 %v3936_v59, %s4300_s13  ;;  %v3951_v5 = vpack.i.bf16 %v1748_v14, %v1747_v40  ;;  %v1749_v15 = vmul.f32 %v4921_v17, %v4912_v39  ;;  %6644 = vst [vmem:[#allocation27_spill] sm:$0xff] %v5042_v12  ;;  %v5111_v17 = vpop.permute.xlu0 %2100 }
 0x238   :  { %v3961_v6 = vpack.i.bf16 %v1751_v19, %v1746_v9  ;;  %v5026_v54 = vmul.f32 %v4848_v48, %v4961_v45  ;;  %v3966_v63 = vpack.i.bf16 %v993_v16, %v992_v50  ;;  %v5032_v42 = vmul.f32 %v4869_v13, %v4939_v38  ;;  %6649 = vst [vmem:[#allocation32_spill] sm:$0xff] %v5111_v17 }
 0x239   :  { %v5036_v8 = vmul.f32 %v4874_v33, %v4946_v22  ;;  %v5040_v59 = vmul.f32 %v4878_v62, %v4951_v53  ;;  %v5048_v14 = vmul.f32 %v4850_v55, %v4961_v45  ;;  %v5052_v9 = vmul.f32 %v4881_v1, %v4939_v38 }
 0x23a   :  { %v3971_v40 = vpack.i.bf16 %v5026_v54, %v5019_v27  ;;  %v5056_v19 = vmul.f32 %v4884_v25, %v4946_v22  ;;  %3942 = vrot.lane.b32.xlu1 %v3941_v29, %s4299_s28  ;;  %v5063_v16 = vmul.f32 %v4888_v26, %v4951_v53  ;;  %v5067_v27 = vmul.f32 %v4852_v56, %v4961_v45 }
 0x23b   :  { %v3976_v50 = vpack.i.bf16 %v5036_v8, %v5032_v42  ;;  %v5071_v54 = vmul.f32 %v4891_v44, %v4939_v38  ;;  %3947 = vrot.lane.b32.xlu0 %v3946_v47, %s4299_s28  ;;  %v5080_v8 = vmul.f32 %v4894_v43, %v4946_v22  ;;  %v5084_v46 = vmul.f32 %v4900_v30, %v4951_v53 }
 0x23c   :  { %v5090_v47 = vmul.f32 %v4854_v58, %v4961_v45  ;;  %v5094_v29 = vmul.f32 %v4904_v31, %v4946_v22  ;;  %v5098_v42 = vmul.f32 %v4918_v18, %v4951_v53  ;;  %v3956_v28 = vpack.i.bf16 %v4910_v37, %v1749_v15 }
 0x23d   :  { %6645 = vst [vmem:[#allocation28_spill] sm:$0xff] %v5071_v54  ;;  %6646 = vst [vmem:[#allocation29_spill] sm:$0xff] %v5080_v8  ;;  %v5105_v4 = vmul.f32 %v4859_v61, %v4963_v36  ;;  %v5109_v39 = vmul.f32 %v4862_v2, %v4970_v34  ;;  %v5120_v49 = vmul.f32 %v4866_v7, %v4981_v57  ;;  %v5126_v54 = vpop.permute.xlu1 %3872  ;;  %v5128_v8 = vmax.f32 %v898_v24, 0.0 }
 0x23e   :  { %3952 = vrot.lane.b32.xlu1 %v3951_v5, %s4298_s25  ;;  %v5124_v37 = vmul.f32 %v4848_v48, %v4983_v3  ;;  %6652 = vst [vmem:[#allocation35_spill] sm:$0xff] %v5126_v54  ;;  %v5135_v15 = vmul.f32 %v4881_v1, %v4963_v36  ;;  %v5139_v45 = vmul.f32 %v4884_v25, %v4970_v34 }
 0x23f   :  { %6647 = vst [vmem:[#allocation30_spill] sm:$0xff] %v5105_v4  ;;  %6648 = vst [vmem:[#allocation31_spill] sm:$0xff] %v5109_v39  ;;  %3957 = vrot.lane.b32.xlu0 %v3956_v28, %s4298_s25  ;;  %v5145_v24 = vmul.f32 %v4869_v13, %v4963_v36  ;;  %v5149_v28 = vmul.f32 %v4874_v33, %v4970_v34  ;;  %v5153_v5 = vmul.f32 %v4891_v44, %v4963_v36  ;;  %v5197_v39 = vpop.permute.xlu0 %3877 }
 0x240   :  { %6650 = vst [vmem:[#allocation33_spill] sm:$0xff] %v5120_v49  ;;  %6651 = vst [vmem:[#allocation34_spill] sm:$0xff] %v5124_v37  ;;  %v5159_v4 = vmul.f32 %v4894_v43, %v4970_v34  ;;  %v5163_v17 = vmul.f32 %v4878_v62, %v4981_v57  ;;  %v5167_v49 = vmul.f32 %v4850_v55, %v4983_v3 }
 0x241   :  { %6653 = vst [vmem:[#allocation36_spill] sm:$0xff] %v5128_v8  ;;  %6654 = vst [vmem:[#allocation37_spill] sm:$0xff] %v5135_v15  ;;  %v5174_v54 = vmul.f32 %v4904_v31, %v4970_v34  ;;  %v5178_v15 = vmul.f32 %v4918_v18, %v4981_v57  ;;  %v5207_v37 = vmul.f32 %v4900_v30, %v4981_v57 }
 0x242   :  { %6655 = vst [vmem:[#allocation38_spill] sm:$0xff] %v5139_v45  ;;  %6656 = vst [vmem:[#allocation39_spill] sm:$0xff] %v5145_v24  ;;  %3962 = vrot.lane.b32.xlu1 %v3961_v6, %s4298_s25  ;;  %v5182_v45 = vmul.f32 %v4888_v26, %v4981_v57  ;;  %v5191_v24 = vmul.f32 %v4852_v56, %v4983_v3  ;;  %v5211_v6 = vmul.f32 %v4854_v58, %v4983_v3 }
 0x243   :  { %6657 = vst [vmem:[#allocation40_spill] sm:$0xff] %v5149_v28  ;;  %6658 = vst [vmem:[#allocation41_spill] sm:$0xff] %v5163_v17  ;;  %3967 = vrot.lane.b32.xlu0 %v3966_v63, %s4302_s17  ;;  %v5195_v28 = vmul.f32 %v4856_v0, %v4963_v36  ;;  %v5203_v63 = vmul.f32 %v4856_v0, %v4992_v23  ;;  %v5213_v17 = vpop.permute.xlu1 %3882  ;;  %v5219_v18 = vmul.f32 %v4929_v51, %v4946_v22 }
 0x244   :  { %6659 = vst [vmem:[#allocation42_spill] sm:$0xff] %v5174_v54  ;;  %6660 = vst [vmem:[#allocation43_spill] sm:$0xff] %v5182_v45  ;;  %v5223_v0 = vmul.f32 %v4933_v52, %v4951_v53  ;;  %v5227_v54 = vmul.f32 %v4859_v61, %v4992_v23  ;;  %v5236_v45 = vmul.f32 %v4862_v2, %v4998_v60 }
 0x245   :  { %6661 = vst [vmem:[#allocation44_spill] sm:$0xff] %v5191_v24  ;;  %6662 = vst [vmem:[#allocation45_spill] sm:$0xff] %v5197_v39  ;;  %v5243_v61 = vmul.f32 %v4866_v7, %v5004_v41  ;;  %v5253_v2 = vmul.f32 %v4929_v51, %v4906_v20  ;;  %v5262_v7 = vsel %vm188_vm5, %v4990_v32, %v5028_v10 }
 0x246   :  { %6663 = vst [vmem:[#allocation46_spill] sm:$0xff] %v5213_v17  ;;  %6664 = vst [vmem:[#allocation47_spill] sm:$0xff] %v5227_v54  ;;  %3972 = vrot.lane.b32.xlu1 %v3971_v40, %s4302_s17  ;;  %v5247_v40 = vmul.f32 %v4848_v48, %v5128_v8  ;;  %v5268_v24 = vmul.f32 %v4869_v13, %v4992_v23  ;;  %v5272_v39 = vmul.f32 %v4874_v33, %v4998_v60  ;;  %v5274_v17 = vpop.permute.xlu0 %2276 }
 0x247   :  { %6665 = vst [vmem:[#allocation48_spill] sm:$0xff] %v5236_v45  ;;  %3977 = vrot.lane.b32.xlu0 %v3976_v50, %s4301_s14  ;;  %6666 = vst [vmem:[#allocation49_spill] sm:$0xff] %v5243_v61  ;;  %v5257_v50 = vmul.f32 %v4933_v52, %v4908_v35  ;;  %v6667_v54 = vpack.i.bf16 %v5048_v14, %v5040_v59  ;;  %v5284_v48 = vmul.f32 %v4871_v21, %v4896_v11  ;;  %v2279_v61 = vpop.permute.xlu1 %2278 }
 0x248   :  { %v5288_v13 = vmul.f32 %v4871_v21, %v4939_v38  ;;  %v5292_v33 = vmul.f32 %v4878_v62, %v5004_v41  ;;  %v6669_v59 = vpack.i.bf16 %v5056_v19, %v5052_v9  ;;  %v5306_v45 = vmul.f32 %v4881_v1, %v4992_v23 }
 0x249   :  { %v5310_v62 = vmul.f32 %v4884_v25, %v4998_v60  ;;  %v2103_v9 = vsel %vm188_vm5, %v5028_v10, %v5042_v12  ;;  %v5331_v10 = vmul.f32 %v4888_v26, %v5004_v41  ;;  %v5335_v19 = vmul.f32 %v4852_v56, %v5128_v8  ;;  %v6675_v56 = vld [vmem:[#allocation29_spill] sm:$0xff] }
 0x24a   :  { %3982 = vrot.lane.b32.xlu1 %v6667_v54, %s4301_s14  ;;  %6668 = vst [vmem:[#allocation50_spill] sm:$0xff] %v5292_v33  ;;  %v5302_v54 = vmul.f32 %v4850_v55, %v5128_v8  ;;  %6671 = vst [vmem:[#allocation52_spill] sm:$0xff] %v5306_v45  ;;  %v5323_v55 = vmul.f32 %v4933_v52, %v4981_v57  ;;  %v2284_v14 = vsel %vm114_vm7, %v5274_v17, %v2279_v61  ;;  %v6676_v45 = vld [vmem:[#allocation28_spill] sm:$0xff]  ;;  %v6678_v33 = vld [vmem:[#allocation18_spill] sm:$0xff] }
 0x24b   :  { %3987 = vrot.lane.b32.xlu0 %v6669_v59, %s4300_s13  ;;  %6672 = vst [vmem:[#allocation53_spill] sm:$0xff] %v5310_v62  ;;  %v5319_v59 = vmul.f32 %v4929_v51, %v4970_v34  ;;  %v6673_v12 = vpack.i.bf16 %v5067_v27, %v5063_v16  ;;  %v5347_v25 = vmul.f32 %v4891_v44, %v4992_v23 }
 0x24c   :  { %6670 = vst [vmem:[#allocation51_spill] sm:$0xff] %v5302_v54  ;;  %v5351_v26 = vmul.f32 %v4894_v43, %v4998_v60  ;;  %v6677_v62 = vpack.i.bf16 %v6675_v56, %v6676_v45  ;;  %v6679_v54 = vld [vmem:[#allocation15_spill] sm:$0xff]  ;;  %v5363_v27 = vmul.f32 %v4871_v21, %v4963_v36  ;;  %v5367_v44 = vmul.f32 %v4871_v21, %v4992_v23  ;;  %v5369_v43 = vpop.permute.xlu0 %2280 }
 0x24d   :  { %6674 = vst [vmem:[#allocation54_spill] sm:$0xff] %v5347_v25  ;;  %v1754_v16 = vmul.f32 %v6679_v54, %v6678_v33  ;;  %6682 = vst [vmem:[#allocation15_spill] sm:$0xff] %v5369_v43  ;;  %v5379_v56 = vmul.f32 %v4854_v58, %v5128_v8  ;;  %v2285_v21 = vsel %vm114_vm7, %v2279_v61, %v5369_v43 }
 0x24e   :  { %3992 = vrot.lane.b32.xlu1 %v6673_v12, %s4300_s13  ;;  %6680 = vst [vmem:[#allocation29_spill] sm:$0xff] %v5363_v27  ;;  %6681 = vst [vmem:[#allocation28_spill] sm:$0xff] %v5367_v44  ;;  %v5383_v12 = vmul.f32 %v5262_v7, %v4906_v20  ;;  %v5390_v45 = vmul.f32 %v2103_v9, %v4908_v35  ;;  %v6685_v58 = vpack.i.bf16 %v5090_v47, %v5084_v46  ;;  %v6689_v46 = vld [vmem:[#allocation12_spill] sm:$0xff] }
 0x24f   :  { %3997 = vrot.lane.b32.xlu0 %v6677_v62, %s4299_s28  ;;  %v5375_v62 = vmul.f32 %v4900_v30, %v5004_v41  ;;  %6684 = vst [vmem:[#allocation56_spill] sm:$0xff] %v5379_v56  ;;  %v5394_v30 = vmul.f32 %v5262_v7, %v4946_v22  ;;  %v5403_v61 = vmul.f32 %v2103_v9, %v4951_v53 }
 0x250   :  { %v5407_v1 = vmul.f32 %v4990_v32, %v4896_v11  ;;  %v5411_v43 = vmul.f32 %v4990_v32, %v4939_v38  ;;  %v6688_v27 = vpack.i.bf16 %v5098_v42, %v5094_v29  ;;  %v4011_v47 = vpack.i.bf16 %v6689_v46, %v1754_v16 }
 0x251   :  { %6683 = vst [vmem:[#allocation55_spill] sm:$0xff] %v5375_v62  ;;  %v5422_v25 = vmul.f32 %v4904_v31, %v4998_v60  ;;  %v6691_v62 = vld [vmem:[#allocation14_spill] sm:$0xff]  ;;  %v5434_v42 = vmul.f32 %v5262_v7, %v4970_v34  ;;  %v5437_v16 = vmul.f32 %v2103_v9, %v4981_v57  ;;  %v5440_v31 = vmul.f32 %v2284_v14, %v4906_v20 }
 0x252   :  { %4002 = vrot.lane.b32.xlu1 %v6685_v58, %s4299_s28  ;;  %6686 = vst [vmem:[#allocation57_spill] sm:$0xff] %v5407_v1  ;;  %6687 = vst [vmem:[#allocation58_spill] sm:$0xff] %v5411_v43  ;;  %v5426_v56 = vmul.f32 %v6691_v62, %v5004_v41  ;;  %v5446_v62 = vmul.f32 %v6679_v54, %v5128_v8  ;;  %v5449_v44 = vmul.f32 %v2285_v21, %v4908_v35  ;;  %v6721_v35 = vld [vmem:[#allocation44_spill] sm:$0xff] }
 0x253   :  { %4007 = vrot.lane.b32.xlu0 %v6688_v27, %s4298_s25  ;;  %6690 = vst [vmem:[#allocation12_spill] sm:$0xff] %v5422_v25  ;;  %6693 = vst [vmem:[#allocation59_spill] sm:$0xff] %v5440_v31  ;;  %v5456_v58 = vmul.f32 %v4929_v51, %v4998_v60  ;;  %v5460_v1 = vmul.f32 %v4933_v52, %v5004_v41  ;;  %v6698_v27 = vld [vmem:[#allocation31_spill] sm:$0xff]  ;;  %v6699_v25 = vld [vmem:[#allocation30_spill] sm:$0xff]  ;;  %v5474_v51 = vmul.f32 %v4990_v32, %v4992_v23 }
 0x254   :  { %6692 = vst [vmem:[#allocation14_spill] sm:$0xff] %v5426_v56  ;;  %6694 = vst [vmem:[#allocation60_spill] sm:$0xff] %v5446_v62  ;;  %v6700_v56 = vpack.i.bf16 %v6698_v27, %v6699_v25  ;;  %v5480_v29 = vmul.f32 %v5262_v7, %v4998_v60  ;;  %v5483_v25 = vmul.f32 %v2103_v9, %v5004_v41  ;;  %v6704_v62 = vld [vmem:[#allocation33_spill] sm:$0xff]  ;;  %v6710_v9 = vld [vmem:[#allocation40_spill] sm:$0xff] }
 0x255   :  { %6695 = vst [vmem:[#allocation61_spill] sm:$0xff] %v5449_v44  ;;  %6696 = vst [vmem:[#allocation62_spill] sm:$0xff] %v5456_v58  ;;  %v5488_v27 = vmul.f32 %v2284_v14, %v4946_v22  ;;  %v5491_v43 = vmul.f32 %v2285_v21, %v4951_v53  ;;  %v6706_v58 = vld [vmem:[#allocation38_spill] sm:$0xff]  ;;  %v5537_v44 = vmul.f32 %v5274_v17, %v4963_v36  ;;  %v6714_v31 = vld [vmem:[#allocation13_spill] sm:$0xff] }
 0x256   :  { %4012 = vrot.lane.b32.xlu1 %v4011_v47, %s4298_s25  ;;  %6697 = vst [vmem:[#allocation63_spill] sm:$0xff] %v5460_v1  ;;  %v5470_v47 = vmul.f32 %v4990_v32, %v4963_v36  ;;  %6702 = vst [vmem:[#allocation30_spill] sm:$0xff] %v5474_v51  ;;  %v6703_v32 = vld [vmem:[#allocation34_spill] sm:$0xff]  ;;  %v5509_v1 = vmul.f32 %v5274_v17, %v4896_v11  ;;  %v6711_v51 = vld [vmem:[#allocation39_spill] sm:$0xff] }
 0x257   :  { %4017 = vrot.lane.b32.xlu0 %v6700_v56, %s4302_s17  ;;  %v6705_v52 = vpack.i.bf16 %v6703_v32, %v6704_v62  ;;  %v6707_v56 = vld [vmem:[#allocation37_spill] sm:$0xff]  ;;  %v5513_v62 = vmul.f32 %v5274_v17, %v4939_v38  ;;  %v5519_v32 = vmul.f32 %v2285_v21, %v4981_v57  ;;  %v6712_v7 = vpack.i.bf16 %v6710_v9, %v6711_v51 }
 0x258   :  { %6701 = vst [vmem:[#allocation31_spill] sm:$0xff] %v5470_v47  ;;  %v6708_v47 = vpack.i.bf16 %v6706_v58, %v6707_v56  ;;  %v5527_v56 = vmul.f32 %v2285_v21, %v5004_v41  ;;  %v5541_v58 = vmul.f32 %v5274_v17, %v4992_v23  ;;  %v6720_v21 = vld [vmem:[#allocation16_spill] sm:$0xff] }
 0x25a   :  { %4022 = vrot.lane.b32.xlu1 %v6705_v52, %s4302_s17  ;;  %v5516_v52 = vmul.f32 %v2284_v14, %v4970_v34 }
 0x25b   :  { %4037 = vrot.lane.b32.xlu0 %v6708_v47, %s4300_s13  ;;  %v5524_v47 = vmul.f32 %v2284_v14, %v4998_v60  ;;  %v6713_v14 = vpack.i.bf16 %v5159_v4, %v5153_v5  ;;  %v6719_v4 = vld [vmem:[#allocation21_spill] sm:$0xff] }
 0x25c   :  { %6709 = vst [vmem:[#allocation34_spill] sm:$0xff] %v5516_v52  ;;  %v6717_v52 = vld [vmem:[#allocation42_spill] sm:$0xff]  ;;  %v1922_v5 = vsel %vm262_vm6, %v6720_v21, %v6719_v4 }
 0x25d   :  { %v6718_v9 = vpack.i.bf16 %v5178_v15, %v6717_v52  ;;  %v6725_v15 = vpack.i.bf16 %v5211_v6, %v5207_v37  ;;  %v6726_v52 = vpack.i.bf16 %v5223_v0, %v5219_v18  ;;  %v6730_v37 = vld [vmem:[#allocation49_spill] sm:$0xff]  ;;  %v6732_v6 = vpack.i.bf16 %v5257_v50, %v5253_v2  ;;  %v6739_v50 = vld [vmem:[#allocation52_spill] sm:$0xff] }
 0x25e   :  { %4027 = vrot.lane.b32.xlu1 %v6712_v7, %s4301_s14  ;;  %v6715_v7 = vld [vmem:[#allocation41_spill] sm:$0xff]  ;;  %v6731_v18 = vpack.i.bf16 %v5247_v40, %v6730_v37  ;;  %v6733_v0 = vpack.i.bf16 %v5272_v39, %v5268_v24  ;;  %v6741_v39 = vpack.i.bf16 %v5323_v55, %v5319_v59 }
 0x25f   :  { %4047 = vrot.lane.b32.xlu0 %v6713_v14, %s4299_s28  ;;  %v6716_v51 = vpack.i.bf16 %v5167_v49, %v6715_v7  ;;  %v6722_v14 = vld [vmem:[#allocation43_spill] sm:$0xff]  ;;  %v6724_v49 = vpack.i.bf16 %v5203_v63, %v5195_v28  ;;  %v1931_v7 = vmul.f32 %v1922_v5, %v6714_v31  ;;  %v6727_v28 = vld [vmem:[#allocation48_spill] sm:$0xff]  ;;  %v6738_v2 = vld [vmem:[#allocation53_spill] sm:$0xff] }
 0x260   :  { %v6723_v53 = vpack.i.bf16 %v6721_v35, %v6722_v14  ;;  %v1759_v35 = vmul.f32 %v6679_v54, %v4983_v3  ;;  %v6728_v63 = vld [vmem:[#allocation47_spill] sm:$0xff]  ;;  %v6734_v54 = vpack.i.bf16 %v5288_v13, %v5284_v48  ;;  %v6736_v14 = vld [vmem:[#allocation50_spill] sm:$0xff]  ;;  %v6742_v48 = vpack.i.bf16 %v5335_v19, %v5331_v10  ;;  %v6750_v19 = vld [vmem:[#allocation56_spill] sm:$0xff] }
 0x261   :  { %v6729_v21 = vpack.i.bf16 %v6727_v28, %v6728_v63  ;;  %v1941_v13 = vmul.f32 %v1922_v5, %v4983_v3  ;;  %v6748_v28 = vld [vmem:[#allocation32_spill] sm:$0xff]  ;;  %v6749_v63 = vld [vmem:[#allocation27_spill] sm:$0xff] }
 0x262   :  { %4032 = vrot.lane.b32.xlu1 %v6716_v51, %s4301_s14  ;;  %v1932_v51 = vmul.f32 0.0, %v6719_v4  ;;  %v6735_v4 = vld [vmem:[#allocation51_spill] sm:$0xff] }
 0x263   :  { %4057 = vrot.lane.b32.xlu0 %v6718_v9, %s4298_s25  ;;  %v4071_v9 = vpack.i.bf16 %v6689_v46, %v1759_v35  ;;  %v6737_v40 = vpack.i.bf16 %v6735_v4, %v6736_v14  ;;  %v6745_v35 = vld [vmem:[#allocation28_spill] sm:$0xff]  ;;  %v6751_v10 = vld [vmem:[#allocation55_spill] sm:$0xff]  ;;  %v6755_v4 = vld [vmem:[#allocation58_spill] sm:$0xff] }
 0x264   :  { %v4141_v55 = vpack.i.bf16 %v1932_v51, %v1941_v13  ;;  %v6756_v14 = vld [vmem:[#allocation57_spill] sm:$0xff] }
 0x266   :  { %4042 = vrot.lane.b32.xlu1 %v6723_v53, %s4300_s13  ;;  %v4091_v53 = vpack.i.bf16 %v1932_v51, %v1931_v7  ;;  %v6740_v7 = vpack.i.bf16 %v6738_v2, %v6739_v50  ;;  %v6759_v50 = vld [vmem:[#allocation12_spill] sm:$0xff] }
 0x267   :  { %4062 = vrot.lane.b32.xlu0 %v6724_v49, %s4298_s25  ;;  %v1936_v49 = vmul.f32 %v1922_v5, %v6678_v33 }
 0x269   :  { %v4116_v24 = vpack.i.bf16 %v1932_v51, %v1936_v49  ;;  %v2283_v49 = vpop.permute.xlu0 %2282 }
 0x26a   :  { %4052 = vrot.lane.b32.xlu1 %v6725_v15, %s4299_s28  ;;  %v6743_v15 = vld [vmem:[#allocation54_spill] sm:$0xff] }
 0x26b   :  { %4082 = vrot.lane.b32.xlu0 %v6726_v52, %s4297_s24  ;;  %v6744_v52 = vpack.i.bf16 %v5351_v26, %v6743_v15  ;;  %v2114_v26 = vmul.f32 0.0, %v6748_v28 }
 0x26e   :  { %4067 = vrot.lane.b32.xlu1 %v6729_v21, %s4302_s17  ;;  %v2104_v21 = vsel %vm188_vm5, %v6749_v63, %v6748_v28 }
 0x26f   :  { %4092 = vrot.lane.b32.xlu0 %v4091_v53, %s4297_s24  ;;  %v6746_v53 = vld [vmem:[#allocation29_spill] sm:$0xff]  ;;  %v2113_v37 = vmul.f32 %v2104_v21, %v6714_v31  ;;  %v2118_v2 = vmul.f32 %v2104_v21, %v6678_v33 }
 0x270   :  { %v6747_v59 = vpack.i.bf16 %v6745_v35, %v6746_v53  ;;  %v1946_v35 = vmul.f32 %v1922_v5, %v5128_v8  ;;  %v6764_v53 = vld [vmem:[#allocation63_spill] sm:$0xff] }
 0x272   :  { %4072 = vrot.lane.b32.xlu1 %v4071_v9, %s4298_s25  ;;  %v6752_v9 = vpack.i.bf16 %v6750_v19, %v6751_v10  ;;  %v4206_v10 = vpack.i.bf16 %v1932_v51, %v1946_v35  ;;  %v6771_v51 = vpack.i.bf16 %v5483_v25, %v5480_v29 }
 0x273   :  { %4097 = vrot.lane.b32.xlu0 %v6731_v18, %s4302_s17  ;;  %v6753_v18 = vpack.i.bf16 %v5390_v45, %v5383_v12  ;;  %v6758_v45 = vld [vmem:[#allocation14_spill] sm:$0xff] }
 0x276   :  { %4077 = vrot.lane.b32.xlu1 %v6732_v6, %s4297_s24  ;;  %v6754_v6 = vpack.i.bf16 %v5403_v61, %v5394_v30  ;;  %v6760_v30 = vpack.i.bf16 %v6758_v45, %v6759_v50  ;;  %v5680_v61 = vpop.permute.xlu0 %3897 }
 0x277   :  { %4102 = vrot.lane.b32.xlu0 %v6733_v0, %s4301_s14  ;;  %v4166_v0 = vpack.i.bf16 %v2114_v26, %v2113_v37 }
 0x27a   :  { %4087 = vrot.lane.b32.xlu1 %v6734_v54, %s4297_s24  ;;  %v5666_v54 = vpop.permute.xlu1 %3887  ;;  %v5693_v15 = vpop.permute.xlu0 %3907 }
 0x27b   :  { %4107 = vrot.lane.b32.xlu0 %v6737_v40, %s4301_s14  ;;  %v6757_v40 = vpack.i.bf16 %v6755_v4, %v6756_v14  ;;  %v6772_v4 = vpack.i.bf16 %v5491_v43, %v5488_v27  ;;  %v5729_v14 = vmul.f32 0.0, %v2283_v49  ;;  %v6773_v43 = vld [vmem:[#allocation61_spill] sm:$0xff]  ;;  %v6774_v27 = vld [vmem:[#allocation59_spill] sm:$0xff] }
 0x27e   :  { %4112 = vrot.lane.b32.xlu1 %v6740_v7, %s4300_s13  ;;  %v5674_v12 = vpop.permute.xlu1 %3892  ;;  %v6761_v7 = vpack.i.bf16 %v5437_v16, %v5434_v42  ;;  %v6765_v42 = vld [vmem:[#allocation62_spill] sm:$0xff] }
 0x27f   :  { %4122 = vrot.lane.b32.xlu0 %v6741_v39, %s4297_s24  ;;  %v4176_v39 = vpack.i.bf16 %v2114_v26, %v2118_v2  ;;  %v6766_v16 = vpack.i.bf16 %v6764_v53, %v6765_v42  ;;  %v6776_v42 = vpack.i.bf16 %v5513_v62, %v5509_v1  ;;  %v6777_v62 = vld [vmem:[#allocation34_spill] sm:$0xff] }
 0x282   :  { %4117 = vrot.lane.b32.xlu1 %v4116_v24, %s4297_s24  ;;  %v5687_v24 = vpop.permute.xlu1 %3902 }
 0x283   :  { %4127 = vrot.lane.b32.xlu0 %v6742_v48, %s4300_s13  ;;  %v6762_v48 = vld [vmem:[#allocation60_spill] sm:$0xff] }
 0x284   :  { %v6763_v13 = vpack.i.bf16 %v6689_v46, %v6762_v48 }
 0x286   :  { %4137 = vrot.lane.b32.xlu1 %v6744_v52, %s4299_s28  ;;  %v2123_v52 = vmul.f32 %v2104_v21, %v4983_v3 }
 0x287   :  { %4132 = vrot.lane.b32.xlu0 %v6747_v59, %s4297_s24  ;;  %v6767_v59 = vld [vmem:[#allocation30_spill] sm:$0xff] }
 0x288   :  { %v4201_v46 = vpack.i.bf16 %v2114_v26, %v2123_v52 }
 0x28a   :  { %4142 = vrot.lane.b32.xlu1 %v4141_v55, %s4297_s24  ;;  %v6768_v55 = vld [vmem:[#allocation31_spill] sm:$0xff] }
 0x28b   :  { %4152 = vrot.lane.b32.xlu0 %v6752_v9, %s4299_s28  ;;  %v6769_v28 = vpack.i.bf16 %v6767_v59, %v6768_v55  ;;  %v2421_v9 = vld [vmem:[%s6536_s4 + $0x8] sm:$0xff] }
 0x28c   :  { %2677 = vmatprep.mubr.f32.mxu0 %v2421_v9  ;;  %2855 = vmatprep.mubr.f32.mxu1 %v2421_v9 }
 0x28e   :  { %4147 = vrot.lane.b32.xlu1 %v6753_v18, %s4296_s19  ;;  %v2128_v18 = vmul.f32 %v2104_v21, %v5128_v8 }
 0x28f   :  { %4157 = vrot.lane.b32.xlu0 %v6754_v6, %s4296_s19  ;;  %v6770_v6 = vld [vmem:[#allocation15_spill] sm:$0xff] }
 0x290   :  { %v4231_v29 = vpack.i.bf16 %v2114_v26, %v2128_v18 }
 0x292   :  { %4162 = vrot.lane.b32.xlu1 %v6757_v40, %s4296_s19  ;;  %v3894_v40 = vunpack.i.l.bf16 %v5674_v12 }
 0x293   :  { %4167 = vrot.lane.b32.xlu0 %v4166_v0, %s4296_s19  ;;  %v2286_v0 = vsel %vm114_vm7, %v6770_v6, %v2283_v49  ;;  %v6775_v49 = vpack.i.bf16 %v6773_v43, %v6774_v27 }
 0x294   :  { %v2295_v2 = vmul.f32 %v2286_v0, %v6714_v31  ;;  %v2300_v48 = vmul.f32 %v2286_v0, %v6678_v33  ;;  %v2305_v9 = vmul.f32 %v2286_v0, %v4983_v3  ;;  %v2310_v18 = vmul.f32 %v2286_v0, %v5128_v8 }
 0x296   :  { %4172 = vrot.lane.b32.xlu1 %v6760_v30, %s4298_s25  ;;  %v4236_v35 = vpack.i.bf16 %v5729_v14, %v2295_v2  ;;  %v4241_v55 = vpack.i.bf16 %v5729_v14, %v2300_v48  ;;  %v6780_v2 = vld [vmem:[#allocation35_spill] sm:$0xff] }
 0x297   :  { %4182 = vrot.lane.b32.xlu0 %v6761_v7, %s4296_s19  ;;  %v3874_v0 = vunpack.i.l.bf16 %v6780_v2 }
 0x29a   :  { %4177 = vrot.lane.b32.xlu1 %v4176_v39, %s4296_s19 }
 0x29b   :  { %4187 = vrot.lane.b32.xlu0 %v6763_v13, %s4298_s25 }
 0x29e   :  { %4197 = vrot.lane.b32.xlu1 %v6766_v16, %s4297_s24 }
 0x29f   :  { %4192 = vrot.lane.b32.xlu0 %v6769_v28, %s4296_s19 }
 0x2a0   :  { %v5705_v63 = vpop.permute.xlu1 %3912 }
 0x2a1   :  { %v5707_v19 = vpop.permute.xlu0 %3917  ;;  %v3915_v6 = vunpack.i.h.bf16 %v5705_v63 }
 0x2a2   :  { %4202 = vrot.lane.b32.xlu1 %v4201_v46, %s4296_s19 }
 0x2a3   :  { %4207 = vrot.lane.b32.xlu0 %v4206_v10, %s4297_s24  ;;  %v6778_v10 = vpack.i.bf16 %v5519_v32, %v6777_v62  ;;  %v6783_v62 = vpack.i.bf16 %v5541_v58, %v5537_v44 }
 0x2a4   :  { %v5711_v5 = vpop.permute.xlu1 %3922 }
 0x2a5   :  { %v5716_v37 = vpop.permute.xlu0 %3927 }
 0x2a6   :  { %4212 = vrot.lane.b32.xlu1 %v6771_v51, %s4296_s19  ;;  %v3914_v51 = vunpack.i.l.bf16 %v5705_v63 }
 0x2a7   :  { %4222 = vrot.lane.b32.xlu0 %v6772_v4, %s4295_s7 }
 0x2a8   :  { %v5732_v21 = vpop.permute.xlu1 %3932 }
 0x2a9   :  { %v6612_v45 = vunpack.i.h.bf16 %v5732_v21  ;;  %v6611_v50 = vunpack.i.l.bf16 %v5732_v21  ;;  %v5737_v30 = vpop.permute.xlu0 %3937  ;;  %v6787_v11 = vunpack.i.h.bf16 %v5732_v21 }
 0x2aa   :  { %v6610_v25 = vunpack.i.l.bf16 %v5737_v30  ;;  %4217 = vrot.lane.b32.xlu1 %v6775_v49, %s4295_s7  ;;  %v3919_v49 = vunpack.i.l.bf16 %v5707_v19  ;;  %v3940_v8 = vunpack.i.h.bf16 %v5737_v30 }
 0x2ab   :  { %v5747_v7 = vsel %vm262_vm6, %v3894_v40, %v6611_v50  ;;  %4232 = vrot.lane.b32.xlu0 %v4231_v29, %s4296_s19  ;;  %v3875_v29 = vunpack.i.h.bf16 %v6780_v2  ;;  %v4266_v2 = vpack.i.bf16 %v5729_v14, %v2310_v18 }
 0x2ac   :  { %v5755_v26 = vsel %vm262_vm6, %v6612_v45, %v6610_v25  ;;  %v5757_v39 = vpop.permute.xlu1 %3942  ;;  %v1068_v58 = vsel %vm114_vm7, %v3915_v6, %v3919_v49 }
 0x2ad   :  { %v6608_v13 = vunpack.i.h.bf16 %v5757_v39  ;;  %v5761_v52 = vpop.permute.xlu0 %3947 }
 0x2ae   :  { %v6607_v53 = vunpack.i.l.bf16 %v5761_v52  ;;  %4227 = vrot.lane.b32.xlu1 %v6776_v42, %s4295_s7  ;;  %v3920_v42 = vunpack.i.h.bf16 %v5707_v19  ;;  %v1067_v19 = vsel %vm114_vm7, %v3914_v51, %v3915_v6 }
 0x2af   :  { %4237 = vrot.lane.b32.xlu0 %v4236_v35, %s4295_s7  ;;  %v6781_v35 = vpack.i.bf16 %v5527_v56, %v5524_v47 }
 0x2b0   :  { %v5775_v16 = vsel %vm336_vm4, %v6608_v13, %v6607_v53  ;;  %v5777_v59 = vpop.permute.xlu1 %3952  ;;  %v1069_v18 = vsel %vm114_vm7, %v3919_v49, %v3920_v42  ;;  %v3924_v53 = vunpack.i.l.bf16 %v5711_v5  ;;  %v3929_v13 = vunpack.i.l.bf16 %v5716_v37 }
 0x2b1   :  { %v6606_v28 = vunpack.i.h.bf16 %v5777_v59  ;;  %v5781_v46 = vpop.permute.xlu0 %3957  ;;  %v6604_v32 = vunpack.i.l.bf16 %v5777_v59 }
 0x2b2   :  { %v6603_v1 = vunpack.i.l.bf16 %v5781_v46  ;;  %4242 = vrot.lane.b32.xlu1 %v4241_v55, %s4295_s7 }
 0x2b3   :  { %4247 = vrot.lane.b32.xlu0 %v6778_v10, %s4295_s7  ;;  %v4261_v10 = vpack.i.bf16 %v5729_v14, %v2305_v9  ;;  %v2576_v9 = vld [vmem:[%s6537_s5] sm:$0xff] }
 0x2b4   :  { %v5798_v4 = vsel %vm307_vm3, %v6606_v28, %v6603_v1  ;;  %v3963_v40 = vpop.permute.xlu1 %3962  ;;  %v3925_v28 = vunpack.i.h.bf16 %v5711_v5 }
 0x2b5   :  { %6779 = vst [vmem:[#allocation33_spill] sm:$0xff] %v5798_v4  ;;  %v3964_v43 = vunpack.i.l.bf16 %v3963_v40  ;;  %v3968_v27 = vpop.permute.xlu0 %3967 }
 0x2b6   :  { %v3970_v48 = vunpack.i.h.bf16 %v3968_v27  ;;  %v3969_v63 = vunpack.i.l.bf16 %v3968_v27  ;;  %4257 = vrot.lane.b32.xlu1 %v6781_v35, %s4295_s7  ;;  %v1066_v27 = vsel %vm114_vm7, %v3874_v0, %v3914_v51 }
 0x2b7   :  { %v5812_v55 = vsel %vm307_vm3, %v3964_v43, %v6604_v32  ;;  %4252 = vrot.lane.b32.xlu0 %v6783_v62, %s4295_s7  ;;  %v3895_v62 = vunpack.i.h.bf16 %v5674_v12  ;;  %v2579_v12 = vld [vmem:[%s6537_s5 + $0x18] sm:$0xff] }
 0x2b8   :  { %6782 = vst [vmem:[#allocation38_spill] sm:$0xff] %v5812_v55  ;;  %v1070_v47 = vsel %vm114_vm7, %v3875_v29, %v3969_v63  ;;  %v3973_v56 = vpop.permute.xlu1 %3972  ;;  %v1071_v35 = vsel %vm114_vm7, %v3969_v63, %v3970_v48 }
 0x2b9   :  { %v3534_v43 = vpack.c.bf16 %v1070_v47, %v1066_v27  ;;  %v3975_v17 = vunpack.i.h.bf16 %v3973_v56  ;;  %v3974_v1 = vunpack.i.l.bf16 %v3973_v56  ;;  %v5824_v32 = vpop.permute.xlu0 %3977  ;;  %v3532_v44 = vpack.c.bf16 %v1071_v35, %v1067_v19  ;;  %v3018_v27 = vld [vmem:[#allocation5] sm:$0x1] }
 0x2ba   :  { %4262 = vrot.lane.b32.xlu1 %v4261_v10, %s4295_s7  ;;  %v3965_v19 = vunpack.i.h.bf16 %v3963_v40  ;;  %v3980_v57 = vunpack.i.h.bf16 %v5824_v32  ;;  %v3979_v5 = vunpack.i.l.bf16 %v5824_v32  ;;  %v1249_v32 = vsel %vm188_vm5, %v3924_v53, %v3925_v28 }
 0x2bb   :  { %v1072_v14 = vsel %vm114_vm7, %v3970_v48, %v3974_v1  ;;  %4267 = vrot.lane.b32.xlu0 %v4266_v2, %s4295_s7  ;;  %3533 = vmatprep.subr.bf16.mxu0 %v3532_v44  ;;  %v1073_v51 = vsel %vm114_vm7, %v3974_v1, %v3975_v17  ;;  %v2577_v48 = vld [vmem:[%s6537_s5 + $0x8] sm:$0xff]  ;;  %v2578_v17 = vld [vmem:[%s6537_s5 + $0x10] sm:$0xff] }
 0x2bc   :  { %v3606_v29 = vpack.c.bf16 %v1072_v14, %v1068_v58  ;;  %v5835_v0 = vpop.permute.xlu1 %3982  ;;  %3535 = vmatpush1.bf16.msra.mxu0 %v3534_v43  ;;  %v3604_v6 = vpack.c.bf16 %v1073_v51, %v1069_v18 }
 0x2bd   :  { %v5840_v63 = vpop.permute.xlu0 %3987 }
 0x2be   :  { %v6609_v10 = vunpack.i.l.bf16 %v5840_v63  ;;  %2582 = vperm.xlu1 %3870, %v2576_v9   ;;  %3605 = vmatprep.subr.bf16.mxu1 %v3604_v6  ;;  %v3990_v60 = vunpack.i.h.bf16 %v5840_v63 }
 0x2bf   :  { %2587 = vperm.xlu0 %3869, %v2577_v48   ;;  %3607 = vmatpush1.bf16.msra.mxu1 %v3606_v29 }
 0x2c0   :  { %v5850_v1 = vsel %vm262_vm6, %v3895_v62, %v6609_v10  ;;  %v5852_v49 = vpop.permute.xlu1 %3992  ;;  %v1253_v10 = vsel %vm188_vm5, %v3979_v5, %v3980_v57 }
 0x2c1   :  { %v5859_v2 = vpop.permute.xlu0 %3997 }
 0x2c2   :  { %2592 = vperm.xlu1 %3870, %v2578_v17   ;;  %v6785_v17 = vld [vmem:[#allocation45_spill] sm:$0xff] }
 0x2c3   :  { %2597 = vperm.xlu0 %3869, %v2579_v12   ;;  %v3880_v12 = vunpack.i.h.bf16 %v6785_v17 }
 0x2c4   :  { %v5861_v47 = vpop.permute.xlu1 %4002 }
 0x2c5   :  { %v5863_v56 = vpop.permute.xlu0 %4007 }
 0x2c6   :  { %v6605_v35 = vunpack.i.l.bf16 %v5863_v56  ;;  %3021 = vperm.xlu1 %3870, %v3018_v27   ;;  %v3879_v27 = vunpack.i.l.bf16 %v6785_v17  ;;  %v3930_v17 = vunpack.i.h.bf16 %v5716_v37  ;;  %v3984_v37 = vunpack.i.l.bf16 %v5835_v0 }
 0x2c8   :  { %v5869_v43 = vsel %vm307_vm3, %v3965_v19, %v6605_v35  ;;  %v5871_v44 = vpop.permute.xlu1 %4012  ;;  %v6786_v19 = vld [vmem:[#allocation46_spill] sm:$0xff]  ;;  %v1251_v25 = vsel %vm188_vm5, %v3929_v13, %v3930_v17 }
 0x2c9   :  { %6784 = vst [vmem:[#allocation37_spill] sm:$0xff] %v5869_v43  ;;  %v5875_v14 = vpop.permute.xlu0 %4017  ;;  %v3885_v58 = vunpack.i.h.bf16 %v6786_v19  ;;  %v3884_v35 = vunpack.i.l.bf16 %v6786_v19  ;;  %v5919_v19 = vsel %vm188_vm5, %v3925_v28, %v3929_v13 }
 0x2ca   :  { %v4019_v41 = vunpack.i.l.bf16 %v5875_v14  ;;  %v4020_v50 = vunpack.i.h.bf16 %v5875_v14  ;;  %v3985_v14 = vunpack.i.h.bf16 %v5835_v0 }
 0x2cb   :  { %v1248_v43 = vsel %vm188_vm5, %v3884_v35, %v3924_v53  ;;  %v1252_v33 = vsel %vm188_vm5, %v3885_v58, %v3979_v5 }
 0x2cc   :  { %v5877_v9 = vpop.permute.xlu1 %4022  ;;  %v1074_v35 = vsel %vm114_vm7, %v3879_v27, %v4019_v41  ;;  %v1075_v28 = vsel %vm114_vm7, %v4019_v41, %v4020_v50 }
 0x2cd   :  { %v5879_v18 = vpop.permute.xlu0 %4037  ;;  %v4024_v31 = vunpack.i.l.bf16 %v5877_v9  ;;  %v4025_v13 = vunpack.i.h.bf16 %v5877_v9  ;;  %v1254_v9 = vsel %vm188_vm5, %v3980_v57, %v3984_v37 }
 0x2cf   :  { %v1077_v57 = vsel %vm114_vm7, %v4024_v31, %v4025_v13 }
 0x2d0   :  { %v5881_v40 = vpop.permute.xlu1 %4027 }
 0x2d1   :  { %v5883_v51 = vpop.permute.xlu0 %4047  ;;  %v4029_v27 = vunpack.i.l.bf16 %v5881_v40 }
 0x2d4   :  { %v5885_v29 = vpop.permute.xlu1 %4032 }
 0x2d5   :  { %v5887_v6 = vpop.permute.xlu0 %4057 }
 0x2d8   :  { %v5889_v48 = vpop.permute.xlu1 %4042 }
 0x2d9   :  { %v5891_v62 = vpop.permute.xlu0 %4062 }
 0x2dc   :  { %v5900_v42 = vpop.permute.xlu1 %4052 }
 0x2dd   :  { %v5906_v45 = vpop.permute.xlu0 %4082 }
 0x2e0   :  { %v4068_v3 = vpop.permute.xlu1 %4067 }
 0x2e1   :  { %v4070_v36 = vunpack.i.h.bf16 %v4068_v3  ;;  %v4069_v55 = vunpack.i.l.bf16 %v4068_v3  ;;  %v5923_v23 = vpop.permute.xlu0 %4092 }
 0x2e3   :  { %v1078_v53 = vsel %vm114_vm7, %v3880_v12, %v4069_v55  ;;  %v1079_v3 = vsel %vm114_vm7, %v4069_v55, %v4070_v36  ;;  %v6788_v12 = vunpack.i.l.bf16 %v5732_v21  ;;  %v6789_v55 = vunpack.i.l.bf16 %v5737_v30 }
 0x2e4   :  { %v3538_v17 = vpack.c.bf16 %v1078_v53, %v1074_v35  ;;  %v5936_v34 = vpop.permute.xlu1 %4072  ;;  %v3536_v0 = vpack.c.bf16 %v1079_v3, %v1075_v28  ;;  %v3540_v53 = vpack.c.bf16 %v1253_v10, %v1249_v32  ;;  %v3542_v28 = vpack.c.bf16 %v1252_v33, %v1248_v43 }
 0x2e5   :  { %v4098_v4 = vpop.permute.xlu0 %4097  ;;  %v5945_v41 = vsel %vm262_vm6, %v6788_v12, %v6787_v11  ;;  %v5950_v58 = vsel %vm262_vm6, %v6789_v55, %v3940_v8  ;;  %v1076_v3 = vsel %vm114_vm7, %v4020_v50, %v4024_v31  ;;  %v1255_v11 = vsel %vm188_vm5, %v3984_v37, %v3985_v14 }
 0x2e6   :  { %v4100_v5 = vunpack.i.h.bf16 %v4098_v4  ;;  %v4099_v35 = vunpack.i.l.bf16 %v4098_v4  ;;  %3537 = vmatprep.subr.bf16.mxu0 %v3536_v0  ;;  %v4030_v21 = vunpack.i.h.bf16 %v5881_v40  ;;  %v3614_v33 = vpack.c.bf16 %v1254_v9, %v5919_v19 }
 0x2e7   :  { %3539 = vmatpush1.bf16.msra.mxu0 %v3538_v17  ;;  %v6790_v32 = vunpack.i.l.bf16 %v5840_v63  ;;  %v3995_v40 = vunpack.i.h.bf16 %v5852_v49  ;;  %v3999_v0 = vunpack.i.l.bf16 %v5859_v2  ;;  %v6791_v31 = vunpack.i.l.bf16 %v5666_v54 }
 0x2e8   :  { %v1080_v30 = vsel %vm114_vm7, %v4070_v36, %v4099_v35  ;;  %v5958_v8 = vpop.permute.xlu1 %4077  ;;  %3541 = vmatprep.subr.bf16.mxu0 %v3540_v53  ;;  %v1081_v4 = vsel %vm114_vm7, %v4099_v35, %v4100_v5  ;;  %v3994_v36 = vunpack.i.l.bf16 %v5852_v49  ;;  %v4034_v19 = vunpack.i.l.bf16 %v5885_v29 }
 0x2e9   :  { %v3610_v10 = vpack.c.bf16 %v1080_v30, %v1076_v3  ;;  %v4103_v50 = vpop.permute.xlu0 %4102  ;;  %v3608_v43 = vpack.c.bf16 %v1081_v4, %v1077_v57  ;;  %v1435_v37 = vsel %vm262_vm6, %v6790_v32, %v3990_v60  ;;  %v1256_v13 = vsel %vm188_vm5, %v6791_v31, %v4029_v27 }
 0x2ea   :  { %v4105_v14 = vunpack.i.h.bf16 %v4103_v50  ;;  %v4104_v17 = vunpack.i.l.bf16 %v4103_v50  ;;  %v3612_v12 = vpack.c.bf16 %v1255_v11, %v1251_v25  ;;  %v4035_v63 = vunpack.i.h.bf16 %v5885_v29 }
 0x2eb   :  { %3543 = vmatpush1.bf16.msra.mxu0 %v3542_v28  ;;  %3609 = vmatprep.subr.bf16.mxu1 %v3608_v43  ;;  %v6792_v55 = vunpack.i.h.bf16 %v5666_v54  ;;  %v1257_v5 = vsel %vm188_vm5, %v4029_v27, %v4030_v21  ;;  %v4000_v53 = vunpack.i.h.bf16 %v5859_v2  ;;  %v3548_v25 = vpack.c.bf16 %v1435_v37, %v5945_v41 }
 0x2ec   :  { %v5977_v49 = vpop.permute.xlu1 %4087  ;;  %3611 = vmatpush1.bf16.msra.mxu1 %v3610_v10  ;;  %v1261_v35 = vsel %vm188_vm5, %v4104_v17, %v4105_v14  ;;  %v1436_v29 = vsel %vm262_vm6, %v3990_v60, %v3994_v36  ;;  %v1437_v57 = vsel %vm262_vm6, %v3994_v36, %v3995_v40  ;;  %v6793_v4 = vunpack.i.h.bf16 %v5687_v24 }
 0x2ed   :  { %v1260_v9 = vsel %vm188_vm5, %v6792_v55, %v4104_v17  ;;  %v4108_v30 = vpop.permute.xlu0 %4107  ;;  %3613 = vmatprep.subr.bf16.mxu1 %v3612_v12  ;;  %v3544_v28 = vpack.c.bf16 %v1261_v35, %v1257_v5  ;;  %v4040_v10 = vunpack.i.h.bf16 %v5879_v18  ;;  %v4039_v50 = vunpack.i.l.bf16 %v5879_v18 }
 0x2ee   :  { %v3546_v3 = vpack.c.bf16 %v1260_v9, %v1256_v13  ;;  %v4110_v54 = vunpack.i.h.bf16 %v4108_v30  ;;  %v4109_v11 = vunpack.i.l.bf16 %v4108_v30  ;;  %v5988_v27 = vsel %vm336_vm4, %v6793_v4, %v3999_v0 }
 0x2ef   :  { %v1258_v43 = vsel %vm188_vm5, %v4030_v21, %v4034_v19  ;;  %3545 = vmatprep.subr.bf16.mxu0 %v3544_v28  ;;  %v3950_v41 = vunpack.i.h.bf16 %v5761_v52  ;;  %v1259_v37 = vsel %vm188_vm5, %v4034_v19, %v4035_v63  ;;  %v4005_v21 = vunpack.i.h.bf16 %v5861_v47 }
 0x2f0   :  { %v1262_v60 = vsel %vm188_vm5, %v4105_v14, %v4109_v11  ;;  %v4113_v32 = vpop.permute.xlu1 %4112  ;;  %3547 = vmatpush1.bf16.msra.mxu0 %v3546_v3  ;;  %3615 = vmatpush1.bf16.msra.mxu1 %v3614_v33  ;;  %v1263_v40 = vsel %vm188_vm5, %v4109_v11, %v4110_v54  ;;  %v4004_v12 = vunpack.i.l.bf16 %v5861_v47  ;;  %v3620_v14 = vpack.c.bf16 %v1437_v57, %v5950_v58 }
 0x2f1   :  { %v3618_v36 = vpack.c.bf16 %v1262_v60, %v1258_v43  ;;  %v4115_v17 = vunpack.i.h.bf16 %v4113_v32  ;;  %v4114_v31 = vunpack.i.l.bf16 %v4113_v32  ;;  %v5997_v13 = vpop.permute.xlu0 %4122  ;;  %3549 = vmatprep.subr.bf16.mxu0 %v3548_v25  ;;  %v3616_v18 = vpack.c.bf16 %v1263_v40, %v1259_v37 }
 0x2f2   :  { %v1617_v33 = vsel %vm336_vm4, %v3999_v0, %v4000_v53  ;;  %v4044_v19 = vunpack.i.l.bf16 %v5889_v48  ;;  %v6794_v63 = vunpack.i.h.bf16 %v5680_v61  ;;  %v1439_v9 = vsel %vm262_vm6, %v4039_v50, %v4040_v10 }
 0x2f3   :  { %3617 = vmatprep.subr.bf16.mxu1 %v3616_v18  ;;  %v1443_v5 = vsel %vm262_vm6, %v4114_v31, %v4115_v17  ;;  %v6795_v35 = vunpack.i.l.bf16 %v5757_v39  ;;  %v6796_v47 = vunpack.i.l.bf16 %v5687_v24  ;;  %v4045_v3 = vunpack.i.h.bf16 %v5889_v48 }
 0x2f4   :  { %v1442_v55 = vsel %vm262_vm6, %v6794_v63, %v4114_v31  ;;  %v6017_v0 = vpop.permute.xlu1 %4117  ;;  %v6797_v30 = vpack.c.bf16 %v5850_v1, %v5747_v7  ;;  %3619 = vmatpush1.bf16.msra.mxu1 %v3618_v36  ;;  %v3552_v28 = vpack.c.bf16 %v1443_v5, %v1439_v9  ;;  %v6798_v25 = vunpack.i.h.bf16 %v5757_v39 }
 0x2f5   :  { %v1612_v58 = vsel %vm336_vm4, %v6796_v47, %v6795_v35  ;;  %v6799_v54 = vmov %v6795_v35  ;;  %v3622_v24 = vpack.c.bf16 %v1436_v29, %v5755_v26  ;;  %v6800_v48 = vunpack.i.l.bf16 %v5680_v61  ;;  %v4128_v43 = vpop.permute.xlu0 %4127  ;;  %3621 = vmatprep.subr.bf16.mxu1 %v3620_v14 }
 0x2f6   :  { %3551 = vmatpush1.bf16.msra.mxu0 %v6797_v30  ;;  %v1613_v11 = vsel %vm336_vm4, %v6799_v54, %v6798_v25  ;;  %v3558_v57 = vpack.c.bf16 %v5988_v27, %v1612_v58  ;;  %v6801_v7 = vunpack.i.l.bf16 %v5761_v52  ;;  %v4130_v32 = vunpack.i.h.bf16 %v4128_v43 }
 0x2f7   :  { %v1438_v4 = vsel %vm262_vm6, %v6800_v48, %v4039_v50  ;;  %v4129_v37 = vunpack.i.l.bf16 %v4128_v43  ;;  %3553 = vmatprep.subr.bf16.mxu0 %v3552_v28  ;;  %v3556_v39 = vpack.c.bf16 %v1617_v33, %v1613_v11  ;;  %v4050_v40 = vunpack.i.h.bf16 %v5883_v51 }
 0x2f8   :  { %v1615_v1 = vsel %vm336_vm4, %v6801_v7, %v3950_v41  ;;  %v3554_v60 = vpack.c.bf16 %v1442_v55, %v1438_v4  ;;  %v4049_v26 = vunpack.i.l.bf16 %v5883_v51  ;;  %v1440_v29 = vsel %vm262_vm6, %v4040_v10, %v4044_v19  ;;  %v4138_v52 = vpop.permute.xlu1 %4137  ;;  %3623 = vmatpush1.bf16.msra.mxu1 %v3622_v24 }
 0x2f9   :  { %v1619_v61 = vsel %vm336_vm4, %v4004_v12, %v4005_v21  ;;  %v3960_v27 = vunpack.i.h.bf16 %v5781_v46  ;;  %v1444_v50 = vsel %vm262_vm6, %v4115_v17, %v4129_v37  ;;  %v1441_v41 = vsel %vm262_vm6, %v4044_v19, %v4045_v3  ;;  %v6043_v33 = vpop.permute.xlu0 %4132 }
 0x2fa   :  { %3555 = vmatpush1.bf16.msra.mxu0 %v3554_v60  ;;  %v1445_v36 = vsel %vm262_vm6, %v4129_v37, %v4130_v32  ;;  %v3626_v31 = vpack.c.bf16 %v1444_v50, %v1440_v29  ;;  %v4140_v18 = vunpack.i.h.bf16 %v4138_v52  ;;  %v4139_v14 = vunpack.i.l.bf16 %v4138_v52 }
 0x2fb   :  { %3557 = vmatprep.subr.bf16.mxu0 %v3556_v39  ;;  %v3624_v51 = vpack.c.bf16 %v1445_v36, %v1441_v41  ;;  %v1618_v10 = vsel %vm336_vm4, %v4000_v53, %v4004_v12  ;;  %v4010_v17 = vunpack.i.h.bf16 %v5863_v56  ;;  %v4014_v21 = vunpack.i.l.bf16 %v5871_v44 }
 0x2fc   :  { %v3628_v63 = vpack.c.bf16 %v1619_v61, %v1615_v1  ;;  %v4054_v19 = vunpack.i.l.bf16 %v5900_v42  ;;  %v6802_v55 = vunpack.i.h.bf16 %v5693_v15  ;;  %v1621_v5 = vsel %vm336_vm4, %v4049_v26, %v4050_v40  ;;  %v6057_v47 = vpop.permute.xlu1 %4142 }
 0x2fd   :  { %3625 = vmatprep.subr.bf16.mxu1 %v3624_v51  ;;  %v1625_v35 = vsel %vm336_vm4, %v4139_v14, %v4140_v18  ;;  %v4055_v2 = vunpack.i.h.bf16 %v5900_v42  ;;  %v4015_v12 = vunpack.i.h.bf16 %v5871_v44  ;;  %v6803_v58 = vunpack.i.l.bf16 %v5693_v15  ;;  %v4153_v30 = vpop.permute.xlu0 %4152 }
 0x2fe   :  { %v1624_v9 = vsel %vm336_vm4, %v6802_v55, %v4139_v14  ;;  %3559 = vmatpush1.bf16.msra.mxu0 %v3558_v57  ;;  %3627 = vmatpush1.bf16.msra.mxu1 %v3626_v31  ;;  %v3560_v53 = vpack.c.bf16 %v1625_v35, %v1621_v5  ;;  %v6804_v28 = vunpack.i.h.bf16 %v5777_v59  ;;  %v6805_v25 = vunpack.i.l.bf16 %v5777_v59 }
 0x2ff   :  { %v1620_v3 = vsel %vm336_vm4, %v6803_v58, %v4049_v26  ;;  %3629 = vmatprep.subr.bf16.mxu1 %v3628_v63  ;;  %v3630_v42 = vpack.c.bf16 %v1618_v10, %v5775_v16  ;;  %v4155_v24 = vunpack.i.h.bf16 %v4153_v30  ;;  %v4154_v57 = vunpack.i.l.bf16 %v4153_v30  ;;  %v6812_v10 = vld [vmem:[#allocation25_spill] sm:$0xff] }
 0x300   :  { %v6068_v54 = vsel %vm307_vm3, %v6805_v25, %v6804_v28  ;;  %v3562_v11 = vpack.c.bf16 %v1624_v9, %v1620_v3  ;;  %3561 = vmatprep.subr.bf16.mxu0 %v3560_v53  ;;  %v6072_v44 = vsel %vm307_vm3, %v4010_v17, %v4014_v21  ;;  %v1622_v15 = vsel %vm336_vm4, %v4050_v40, %v4054_v19  ;;  %v6084_v7 = vpop.permute.xlu1 %4147  ;;  %v6816_v63 = vld [vmem:[#allocation13_spill] sm:$0xff]  ;;  %v6818_v25 = vld [vmem:[#allocation24_spill] sm:$0xff] }
 0x301   :  { %v6806_v48 = vunpack.i.l.bf16 %v5863_v56  ;;  %v6807_v59 = vunpack.i.l.bf16 %v5781_v46  ;;  %v1626_v16 = vsel %vm336_vm4, %v4140_v18, %v4154_v57  ;;  %v1623_v1 = vsel %vm336_vm4, %v4054_v19, %v4055_v2  ;;  %v6089_v37 = vpop.permute.xlu0 %4157 }
 0x302   :  { %3563 = vmatpush1.bf16.msra.mxu0 %v3562_v11  ;;  %3631 = vmatpush1.bf16.msra.mxu1 %v3630_v42  ;;  %v1627_v60 = vsel %vm336_vm4, %v4154_v57, %v4155_v24  ;;  %v4060_v32 = vunpack.i.h.bf16 %v5887_v6  ;;  %v3634_v56 = vpack.c.bf16 %v1626_v16, %v1622_v15  ;;  %v6808_v46 = vpack.c.bf16 %v4946_v22, %v4906_v20  ;;  %v6821_v11 = vld [vmem:[#allocation17_spill] sm:$0xff]  ;;  %v6822_v24 = vld [vmem:[#allocation11_spill] sm:$0xff] }
 0x303   :  { %v1831_v4 = vsel %vm307_vm3, %v6806_v48, %v4010_v17  ;;  %v6081_v43 = vsel %vm307_vm3, %v6807_v59, %v3960_v27  ;;  %v3632_v39 = vpack.c.bf16 %v1627_v60, %v1623_v1  ;;  %v6095_v40 = vsel %vm307_vm3, %v4014_v21, %v4015_v12  ;;  %v6813_v17 = vld [vmem:[#allocation20_spill] sm:$0xff]  ;;  %v6825_v16 = vld [vmem:[#allocation23_spill] sm:$0xff] }
 0x304   :  { %3565 = vmatprep.subr.bf16.mxu0 %v6808_v46  ;;  %v4059_v26 = vunpack.i.l.bf16 %v5887_v6  ;;  %v4064_v29 = vunpack.i.l.bf16 %v5891_v62  ;;  %v4085_v61 = vunpack.i.h.bf16 %v5906_v45  ;;  %v4084_v27 = vunpack.i.l.bf16 %v5906_v45  ;;  %v6109_v18 = vpop.permute.xlu1 %4162  ;;  %v6809_v45 = vld [vmem:[#allocation10_spill] sm:$0xff] }
 0x305   :  { %v4095_v50 = vunpack.i.h.bf16 %v5923_v23  ;;  %v4094_v52 = vunpack.i.l.bf16 %v5923_v23  ;;  %v4075_v41 = vunpack.i.h.bf16 %v5936_v34  ;;  %v4074_v20 = vunpack.i.l.bf16 %v5936_v34  ;;  %3633 = vmatprep.subr.bf16.mxu1 %v3632_v39  ;;  %v6811_v23 = vld [vmem:[#allocation33_spill] sm:$0xff]  ;;  %v6116_v34 = vpop.permute.xlu0 %4167 }
 0x306   :  { %v4080_v22 = vunpack.i.h.bf16 %v5958_v8  ;;  %v4079_v36 = vunpack.i.l.bf16 %v5958_v8  ;;  %v4090_v6 = vunpack.i.h.bf16 %v5977_v49  ;;  %v4089_v31 = vunpack.i.l.bf16 %v5977_v49  ;;  %3635 = vmatpush1.bf16.msra.mxu1 %v3634_v56  ;;  %v6815_v8 = vld [vmem:[#allocation18_spill] sm:$0xff] }
 0x307   :  { %v6810_v14 = vpack.c.bf16 %v4939_v38, %v6809_v45  ;;  %v3646_v51 = vpack.c.bf16 %v6072_v44, %v6811_v23  ;;  %v6814_v21 = vpack.c.bf16 %v6812_v10, %v6813_v17  ;;  %v6817_v19 = vpack.c.bf16 %v6815_v8, %v6816_v63 }
 0x308   :  { %v3572_v49 = vpack.c.bf16 %v1831_v4, %v6068_v54  ;;  %v3644_v38 = vpack.c.bf16 %v6095_v40, %v6081_v43  ;;  %v1834_v55 = vsel %vm307_vm3, %v4064_v29, %v4059_v26  ;;  %v4120_v9 = vunpack.i.h.bf16 %v6017_v0  ;;  %v4173_v28 = vpop.permute.xlu1 %4172  ;;  %v6819_v54 = vld [vmem:[#allocation19_spill] sm:$0xff]  ;;  %v6824_v43 = vld [vmem:[#allocation36_spill] sm:$0xff] }
 0x309   :  { %3567 = vmatpush1.bf16.msra.mxu0 %v6810_v14  ;;  %3637 = vmatprep.subr.bf16.mxu1 %v6817_v19  ;;  %v4119_v5 = vunpack.i.l.bf16 %v6017_v0  ;;  %v1835_v35 = vsel %vm307_vm3, %v4059_v26, %v4060_v32  ;;  %v6132_v2 = vsel %vm307_vm3, %v4060_v32, %v4074_v20  ;;  %v2013_v53 = vsel %vm233_vm2, %v4084_v27, %v4085_v61  ;;  %v6157_v59 = vpop.permute.xlu0 %4182 }
 0x30a   :  { %3569 = vmatprep.subr.bf16.mxu0 %v6814_v21  ;;  %v6136_v12 = vsel %vm307_vm3, %v4074_v20, %v4075_v41  ;;  %v6139_v58 = vsel %vm233_vm2, %v4094_v52, %v4095_v50  ;;  %v4065_v3 = vunpack.i.h.bf16 %v5891_v62  ;;  %v6143_v30 = vsel %vm233_vm2, %v4090_v6, %v4084_v27  ;;  %v6828_v41 = vld [vmem:[#allocation38_spill] sm:$0xff] }
 0x30b   :  { %v6146_v0 = vsel %vm233_vm2, %v4089_v31, %v4079_v36  ;;  %v6820_v42 = vpack.c.bf16 %v6818_v25, %v6819_v54  ;;  %v6823_v57 = vpack.c.bf16 %v6821_v11, %v6822_v24  ;;  %v2009_v44 = vsel %vm233_vm2, %v4079_v36, %v4080_v22  ;;  %v6831_v36 = vld [vmem:[#allocation22_spill] sm:$0xff] }
 0x30c   :  { %v4125_v15 = vunpack.i.h.bf16 %v5997_v13  ;;  %v4124_v62 = vunpack.i.l.bf16 %v5997_v13  ;;  %v4175_v48 = vunpack.i.h.bf16 %v4173_v28  ;;  %v4174_v4 = vunpack.i.l.bf16 %v4173_v28  ;;  %v6174_v50 = vpop.permute.xlu1 %4177 }
 0x30d   :  { %3571 = vmatpush1.bf16.msra.mxu0 %v6820_v42  ;;  %3639 = vmatpush1.bf16.msra.mxu1 %v6823_v57  ;;  %v6826_v1 = vpack.c.bf16 %v6824_v43, %v6825_v16  ;;  %v6163_v60 = vsel %vm233_vm2, %v4080_v22, %v4094_v52  ;;  %v4150_v32 = vunpack.i.h.bf16 %v6084_v7  ;;  %v4149_v56 = vunpack.i.l.bf16 %v6084_v7  ;;  %v6827_v52 = vld [vmem:[#allocation37_spill] sm:$0xff]  ;;  %v6830_v22 = vld [vmem:[#allocation26_spill] sm:$0xff]  ;;  %v4188_v17 = vpop.permute.xlu0 %4187 }
 0x30e   :  { %3573 = vmatprep.subr.bf16.mxu0 %v3572_v49  ;;  %v2015_v46 = vsel %vm233_vm2, %v4119_v5, %v4120_v9  ;;  %v4160_v39 = vunpack.i.h.bf16 %v6089_v37  ;;  %v4159_v40 = vunpack.i.l.bf16 %v6089_v37  ;;  %v1838_v26 = vsel %vm307_vm3, %v4065_v3, %v4174_v4 }
 0x30f   :  { %3641 = vmatprep.subr.bf16.mxu1 %v6826_v1  ;;  %v1839_v29 = vsel %vm307_vm3, %v4174_v4, %v4175_v48  ;;  %v3582_v27 = vpack.c.bf16 %v6143_v30, %v6146_v0  ;;  %v6829_v20 = vpack.c.bf16 %v6827_v52, %v6828_v41  ;;  %v6832_v6 = vpack.c.bf16 %v6830_v22, %v6831_v36 }
 0x310   :  { %v3576_v31 = vpack.c.bf16 %v1839_v29, %v1835_v35  ;;  %v3580_v45 = vpack.c.bf16 %v2013_v53, %v2009_v44  ;;  %v6183_v14 = vsel %vm233_vm2, %v4085_v61, %v4119_v5  ;;  %v4135_v23 = vunpack.i.h.bf16 %v6043_v33  ;;  %v4198_v53 = vpop.permute.xlu1 %4197 }
 0x311   :  { %3575 = vmatpush1.bf16.msra.mxu0 %v6829_v20  ;;  %3643 = vmatpush1.bf16.msra.mxu1 %v6832_v6  ;;  %v4134_v10 = vunpack.i.l.bf16 %v6043_v33  ;;  %v2017_v21 = vsel %vm233_vm2, %v4124_v62, %v4125_v15  ;;  %v3578_v8 = vpack.c.bf16 %v1838_v26, %v1834_v55  ;;  %v4190_v63 = vunpack.i.h.bf16 %v4188_v17  ;;  %v4193_v0 = vpop.permute.xlu0 %4192 }
 0x312   :  { %3645 = vmatprep.subr.bf16.mxu1 %v3644_v38  ;;  %v4189_v19 = vunpack.i.l.bf16 %v4188_v17  ;;  %3577 = vmatprep.subr.bf16.mxu0 %v3576_v31  ;;  %v3652_v49 = vpack.c.bf16 %v2015_v46, %v6139_v58  ;;  %v4145_v61 = vunpack.i.h.bf16 %v6057_v47  ;;  %v4144_v9 = vunpack.i.l.bf16 %v6057_v47 }
 0x313   :  { %v2191_v33 = vsel %vm159_vm1, %v4149_v56, %v4150_v32  ;;  %v2195_v38 = vsel %vm159_vm1, %v4159_v40, %v4160_v39  ;;  %v4165_v5 = vunpack.i.h.bf16 %v6109_v18  ;;  %v4164_v55 = vunpack.i.l.bf16 %v6109_v18 }
 0x314   :  { %v1840_v35 = vsel %vm307_vm3, %v4175_v48, %v4189_v19  ;;  %v1841_v58 = vsel %vm307_vm3, %v4189_v19, %v4190_v63  ;;  %v4200_v3 = vunpack.i.h.bf16 %v4198_v53  ;;  %v4199_v30 = vunpack.i.l.bf16 %v4198_v53  ;;  %v4203_v44 = vpop.permute.xlu1 %4202 }
 0x315   :  { %3579 = vmatpush1.bf16.msra.mxu0 %v3578_v8  ;;  %3647 = vmatpush1.bf16.msra.mxu1 %v3646_v51  ;;  %v3650_v47 = vpack.c.bf16 %v1840_v35, %v6132_v2  ;;  %v3648_v28 = vpack.c.bf16 %v1841_v58, %v6136_v12  ;;  %v4170_v25 = vunpack.i.h.bf16 %v6116_v34  ;;  %v4169_v54 = vunpack.i.l.bf16 %v6116_v34  ;;  %v4208_v16 = vpop.permute.xlu0 %4207 }
 0x316   :  { %3581 = vmatprep.subr.bf16.mxu0 %v3580_v45  ;;  %v4185_v18 = vunpack.i.h.bf16 %v6157_v59  ;;  %v4184_v42 = vunpack.i.l.bf16 %v6157_v59  ;;  %v4180_v51 = vunpack.i.h.bf16 %v6174_v50  ;;  %v4179_v11 = vunpack.i.l.bf16 %v6174_v50 }
 0x317   :  { %v2020_v2 = vsel %vm233_vm2, %v4135_v23, %v4199_v30  ;;  %3649 = vmatprep.subr.bf16.mxu1 %v3648_v28  ;;  %v2021_v24 = vsel %vm233_vm2, %v4199_v30, %v4200_v3  ;;  %v2194_v57 = vsel %vm159_vm1, %v4165_v5, %v4159_v40  ;;  %v2190_v12 = vsel %vm159_vm1, %v4164_v55, %v4149_v56 }
 0x318   :  { %v3584_v34 = vpack.c.bf16 %v2021_v24, %v2017_v21  ;;  %v3654_v48 = vpack.c.bf16 %v6183_v14, %v6163_v60  ;;  %v2016_v4 = vsel %vm233_vm2, %v4134_v10, %v4124_v62  ;;  %v2018_v43 = vsel %vm233_vm2, %v4125_v15, %v4144_v9  ;;  %v4213_v52 = vpop.permute.xlu1 %4212 }
 0x319   :  { %3583 = vmatpush1.bf16.msra.mxu0 %v3582_v27  ;;  %3651 = vmatpush1.bf16.msra.mxu1 %v3650_v47  ;;  %v2019_v1 = vsel %vm233_vm2, %v4144_v9, %v4145_v61  ;;  %v3586_v56 = vpack.c.bf16 %v2020_v2, %v2016_v4  ;;  %v4210_v46 = vunpack.i.h.bf16 %v4208_v16  ;;  %v4209_v40 = vunpack.i.l.bf16 %v4208_v16  ;;  %v6233_v6 = vpop.permute.xlu0 %4222  ;;  %v2427_v16 = vld [vmem:[%s6536_s4 + $0x38] sm:$0xff] }
 0x31a   :  { %3653 = vmatprep.subr.bf16.mxu1 %v3652_v49  ;;  %3585 = vmatprep.subr.bf16.mxu0 %v3584_v34  ;;  %v3588_v26 = vpack.c.bf16 %v2195_v38, %v2191_v33  ;;  %v3590_v29 = vpack.c.bf16 %v2194_v57, %v2190_v12  ;;  %v2193_v60 = vsel %vm159_vm1, %v4169_v54, %v4170_v25  ;;  %v4195_v62 = vunpack.i.h.bf16 %v4193_v0  ;;  %v2423_v34 = vld [vmem:[%s6536_s4 + $0x18] sm:$0xff] }
 0x31b   :  { %v2197_v27 = vsel %vm159_vm1, %v4179_v11, %v4180_v51  ;;  %v2199_v13 = vsel %vm159_vm1, %v4184_v42, %v4185_v18  ;;  %v4194_v15 = vunpack.i.l.bf16 %v4193_v0  ;;  %v2022_v50 = vsel %vm233_vm2, %v4200_v3, %v4209_v40  ;;  %v2420_v0 = vld [vmem:[%s6536_s4] sm:$0xff] }
 0x31c   :  { %v2023_v41 = vsel %vm233_vm2, %v4209_v40, %v4210_v46  ;;  %v3658_v20 = vpack.c.bf16 %v2022_v50, %v2018_v43  ;;  %v4215_v22 = vunpack.i.h.bf16 %v4213_v52  ;;  %v4214_v36 = vunpack.i.l.bf16 %v4213_v52  ;;  %v4218_v19 = vpop.permute.xlu1 %4217  ;;  %v2424_v51 = vld [vmem:[%s6536_s4 + $0x20] sm:$0xff] }
 0x31d   :  { %3587 = vmatpush1.bf16.msra.mxu0 %v3586_v56  ;;  %3655 = vmatpush1.bf16.msra.mxu1 %v3654_v48  ;;  %v3656_v31 = vpack.c.bf16 %v2023_v41, %v2019_v1  ;;  %v2196_v45 = vsel %vm159_vm1, %v4160_v39, %v4179_v11  ;;  %v4205_v14 = vunpack.i.h.bf16 %v4203_v44  ;;  %v4204_v23 = vunpack.i.l.bf16 %v4203_v44  ;;  %v4233_v33 = vpop.permute.xlu0 %4232  ;;  %v2430_v41 = vld [vmem:[%s6536_s4 + $0x50] sm:$0xff] }
 0x31e   :  { %3589 = vmatprep.subr.bf16.mxu0 %v3588_v26  ;;  %v3660_v10 = vpack.c.bf16 %v2197_v27, %v2193_v60  ;;  %v2202_v17 = vsel %vm159_vm1, %v4195_v62, %v4214_v36  ;;  %v4225_v21 = vunpack.i.h.bf16 %v6233_v6  ;;  %v4224_v8 = vunpack.i.l.bf16 %v6233_v6  ;;  %v2426_v62 = vld [vmem:[%s6536_s4 + $0x30] sm:$0xff] }
 0x31f   :  { %3657 = vmatprep.subr.bf16.mxu1 %v3656_v31  ;;  %v2203_v63 = vsel %vm159_vm1, %v4214_v36, %v4215_v22  ;;  %v2192_v37 = vsel %vm159_vm1, %v4150_v32, %v4169_v54  ;;  %v2198_v39 = vsel %vm159_vm1, %v4194_v15, %v4184_v42  ;;  %v4220_v61 = vunpack.i.h.bf16 %v4218_v19 }
 0x320   :  { %v3592_v49 = vpack.c.bf16 %v2203_v63, %v2199_v13  ;;  %v4219_v9 = vunpack.i.l.bf16 %v4218_v19  ;;  %v3662_v38 = vpack.c.bf16 %v2196_v45, %v2192_v37  ;;  %v3594_v5 = vpack.c.bf16 %v2202_v17, %v2198_v39  ;;  %v4228_v3 = vpop.permute.xlu1 %4227 }
 0x321   :  { %3591 = vmatpush1.bf16.msra.mxu0 %v3590_v29  ;;  %3659 = vmatpush1.bf16.msra.mxu1 %v3658_v20  ;;  %v4235_v55 = vunpack.i.h.bf16 %v4233_v33  ;;  %v4234_v35 = vunpack.i.l.bf16 %v4233_v33  ;;  %v2200_v53 = vsel %vm159_vm1, %v4185_v18, %v4204_v23  ;;  %v2377_v7 = vsel %vm85_vm0, %v4224_v8, %v4225_v21  ;;  %v4238_v18 = vpop.permute.xlu0 %4237  ;;  %v2422_v33 = vld [vmem:[%s6536_s4 + $0x10] sm:$0xff] }
 0x322   :  { %3661 = vmatprep.subr.bf16.mxu1 %v3660_v10  ;;  %3593 = vmatprep.subr.bf16.mxu0 %v3592_v49  ;;  %v2373_v58 = vsel %vm85_vm0, %v4219_v9, %v4220_v61  ;;  %v2201_v32 = vsel %vm159_vm1, %v4204_v23, %v4205_v14  ;;  %v4230_v25 = vunpack.i.h.bf16 %v4228_v3  ;;  %v4229_v54 = vunpack.i.l.bf16 %v4228_v3  ;;  %v2429_v10 = vld [vmem:[%s6536_s4 + $0x48] sm:$0xff] }
 0x323   :  { %v2204_v47 = vsel %vm159_vm1, %v4215_v22, %v4234_v35  ;;  %v3596_v30 = vpack.c.bf16 %v2377_v7, %v2373_v58  ;;  %v2205_v59 = vsel %vm159_vm1, %v4234_v35, %v4235_v55  ;;  %v4240_v11 = vunpack.i.h.bf16 %v4238_v18  ;;  %v2425_v35 = vld [vmem:[%s6536_s4 + $0x28] sm:$0xff]  ;;  %v2431_v58 = vld [vmem:[%s6536_s4 + $0x58] sm:$0xff] }
 0x324   :  { %v3666_v28 = vpack.c.bf16 %v2204_v47, %v2200_v53  ;;  %v3664_v42 = vpack.c.bf16 %v2205_v59, %v2201_v32  ;;  %v4239_v2 = vunpack.i.l.bf16 %v4238_v18  ;;  %v2376_v24 = vsel %vm85_vm0, %v4230_v25, %v4224_v8  ;;  %v4243_v44 = vpop.permute.xlu1 %4242  ;;  %v2428_v53 = vld [vmem:[%s6536_s4 + $0x40] sm:$0xff] }
 0x325   :  { %3595 = vmatpush1.bf16.msra.mxu0 %v3594_v5  ;;  %3663 = vmatpush1.bf16.msra.mxu1 %v3662_v38  ;;  %v2372_v57 = vsel %vm85_vm0, %v4229_v54, %v4219_v9  ;;  %v4245_v48 = vunpack.i.h.bf16 %v4243_v44  ;;  %v4244_v4 = vunpack.i.l.bf16 %v4243_v44  ;;  %v4248_v43 = vpop.permute.xlu0 %4247  ;;  %v6833_v9 = vmov 0.0  }
 0x326   :  { %3597 = vmatprep.subr.bf16.mxu0 %v3596_v30  ;;  %3665 = vmatprep.subr.bf16.mxu1 %v3664_v42  ;;  %v3598_v12 = vpack.c.bf16 %v2376_v24, %v2372_v57  ;;  %v2374_v1 = vsel %vm85_vm0, %v4220_v61, %v4239_v2  ;;  %v2375_v56 = vsel %vm85_vm0, %v4239_v2, %v4240_v11  ;;  %v4250_v40 = vunpack.i.h.bf16 %v4248_v43 }
 0x327   :  { %v2378_v46 = vsel %vm85_vm0, %v4225_v21, %v4244_v4  ;;  %v4249_v26 = vunpack.i.l.bf16 %v4248_v43  ;;  %v2379_v29 = vsel %vm85_vm0, %v4244_v4, %v4245_v48 }
 0x328   :  { %2678 = vmatmul.mubr.f32.vlgmr.msra.gmra.mrb[8].mxu0 %v2420_v0  ;;  %v3670_v60 = vpack.c.bf16 %v2378_v46, %v2374_v1  ;;  %v4258_v27 = vpop.permute.xlu1 %4257  ;;  %v3668_v13 = vpack.c.bf16 %v2379_v29, %v2375_v56 }
 0x329   :  { %3667 = vmatpush1.bf16.msra.mxu1 %v3666_v28  ;;  %2683 = vmatprep.mubr.f32.mxu0 %v2424_v51  ;;  %v4260_v15 = vunpack.i.h.bf16 %v4258_v27  ;;  %v4259_v50 = vunpack.i.l.bf16 %v4258_v27  ;;  %v4253_v52 = vpop.permute.xlu0 %4252  ;;  %v2381_v36 = vsel %vm85_vm0, %v4249_v26, %v4250_v40 }
 0x32a   :  { %3599 = vmatpush1.bf16.msra.mxu0 %v3598_v12  ;;  %v4255_v20 = vunpack.i.h.bf16 %v4253_v52  ;;  %v4254_v22 = vunpack.i.l.bf16 %v4253_v52  ;;  %3669 = vmatprep.subr.bf16.mxu1 %v3668_v13 }
 0x32b   :  { %v2385_v6 = vsel %vm85_vm0, %v4259_v50, %v4260_v15 }
 0x32c   :  { %2684 = vmatmul.mubr.f32.gmra.mrb[10].mxu0 %v2423_v34  ;;  %2856 = vmatmul.mubr.f32.vlgmr.msra.gmra.mrb[8].mxu1 %v2420_v0  ;;  %v2380_v31 = vsel %vm85_vm0, %v4254_v22, %v4249_v26  ;;  %v2384_v45 = vsel %vm85_vm0, %v4255_v20, %v4259_v50  ;;  %v4263_v14 = vpop.permute.xlu1 %4262  ;;  %v3600_v23 = vpack.c.bf16 %v2385_v6, %v2381_v36 }
 0x32d   :  { %2689 = vmatprep.mubr.f32.mxu0 %v2427_v16  ;;  %2861 = vmatprep.mubr.f32.mxu1 %v2424_v51  ;;  %v3602_v17 = vpack.c.bf16 %v2384_v45, %v2380_v31  ;;  %v4265_v21 = vunpack.i.h.bf16 %v4263_v14  ;;  %v4264_v8 = vunpack.i.l.bf16 %v4263_v14  ;;  %v4268_v63 = vpop.permute.xlu0 %4267  ;;  %v3193_v14 = vld [vmem:[%s6540_s8 + $0x80] sm:$0xff] }
 0x32e   :  { %3671 = vmatpush1.bf16.msra.mxu1 %v3670_v60  ;;  %v4270_v19 = vunpack.i.h.bf16 %v4268_v63  ;;  %v4269_v49 = vunpack.i.l.bf16 %v4268_v63  ;;  %3601 = vmatprep.subr.bf16.mxu0 %v3600_v23  ;;  %v3194_v23 = vld [vmem:[%s6540_s8 + $0x88] sm:$0xff] }
 0x32f   :  { %v2382_v37 = vsel %vm85_vm0, %v4250_v40, %v4264_v8  ;;  %v2383_v39 = vsel %vm85_vm0, %v4264_v8, %v4265_v21  ;;  %3603 = vmatpush1.bf16.msra.mxu0 %v3602_v17 }
 0x330   :  { %2690 = vmatmul.mubr.f32.gmra.mrb[12].mxu0 %v2426_v62  ;;  %2862 = vmatmul.mubr.f32.gmra.mrb[10].mxu1 %v2423_v34  ;;  %v2386_v61 = vsel %vm85_vm0, %v4260_v15, %v4269_v49  ;;  %v2387_v38 = vsel %vm85_vm0, %v4269_v49, %v4270_v19 }
 0x331   :  { %2695 = vmatprep.mubr.f32.mxu0 %v2430_v41  ;;  %2867 = vmatprep.mubr.f32.mxu1 %v2427_v16  ;;  %v3674_v5 = vpack.c.bf16 %v2386_v61, %v2382_v37  ;;  %v3672_v55 = vpack.c.bf16 %v2387_v38, %v2383_v39  ;;  %v3692_v61 = vpack.c.bf16 %v3194_v23, %v3193_v14  ;;  %v3185_v14 = vld [vmem:[%s6540_s8 + $0x40] sm:$0xff]  ;;  %v3186_v23 = vld [vmem:[%s6540_s8 + $0x48] sm:$0xff] }
 0x333   :  { %3673 = vmatprep.subr.bf16.mxu1 %v3672_v55  ;;  %v3196_v55 = vld [vmem:[%s6540_s8 + $0x98] sm:$0xff] }
 0x334   :  { %2696 = vmatmul.mubr.f32.gmra.mrb[14].mxu0 %v2429_v10  ;;  %2868 = vmatmul.mubr.f32.gmra.mrb[12].mxu1 %v2426_v62 }
 0x335   :  { %2766 = vmatprep.mubr.f32.mxu0 %v6833_v9  ;;  %2873 = vmatprep.mubr.f32.mxu1 %v2430_v41 }
 0x336   :  { %3675 = vmatpush1.bf16.msra.mxu1 %v3674_v5  ;;  %v3195_v5 = vld [vmem:[%s6540_s8 + $0x90] sm:$0xff] }
 0x338   :  { %3420 = vmatmul.mubr.msk.f32.vlgmr.msra.gmra.mrb[8].mxu0 %vm2600_vm9, %v2422_v33  ;;  %2874 = vmatmul.mubr.f32.gmra.mrb[14].mxu1 %v2429_v10 }
 0x339   :  { %2772 = vmatprep.mubr.f32.mxu0 %v6833_v9  ;;  %2944 = vmatprep.mubr.f32.mxu1 %v6833_v9 }
 0x33c   :  { %3421 = vmatmul.mubr.msk.f32.gmra.mrb[10].mxu0 %vm2600_vm9, %v2425_v35  ;;  %3424 = vmatmul.mubr.msk.f32.vlgmr.msra.gmra.mrb[8].mxu1 %vm2600_vm9, %v2422_v33  ;;  %v3178_v33 = vld [vmem:[%s6540_s8 + $0x8] sm:$0xff] }
 0x33d   :  { %2778 = vmatprep.mubr.f32.mxu0 %v6833_v9  ;;  %2950 = vmatprep.mubr.f32.mxu1 %v6833_v9  ;;  %v2583_v47 = vpop.permute.xlu1 %2582 }
 0x33e   :  { %v2588_v30 = vpop.permute.xlu0 %2587 }
 0x340   :  { %3422 = vmatmul.mubr.msk.f32.gmra.mrb[12].mxu0 %vm2600_vm9, %v2428_v53  ;;  %3425 = vmatmul.mubr.msk.f32.gmra.mrb[10].mxu1 %vm2600_vm9, %v2425_v35 }
 0x341   :  { %2784 = vmatprep.mubr.f32.mxu0 %v6833_v9  ;;  %2956 = vmatprep.mubr.f32.mxu1 %v6833_v9  ;;  %v2593_v43 = vpop.permute.xlu1 %2592 }
 0x342   :  { %v2598_v26 = vpop.permute.xlu0 %2597 }
 0x344   :  { %3423 = vmatmul.mubr.msk.f32.gmra.mrb[14].mxu0 %vm2600_vm9, %v2431_v58  ;;  %3426 = vmatmul.mubr.msk.f32.gmra.mrb[12].mxu1 %vm2600_vm9, %v2428_v53 }
 0x345   :  { %3095 = vmatprep.mubr.f32.mxu0 %v6833_v9  ;;  %2962 = vmatprep.mubr.f32.mxu1 %v6833_v9 }
 0x348   :  { %3427 = vmatmul.mubr.msk.f32.gmra.mrb[14].mxu1 %vm2600_vm9, %v2431_v58  ;;  %v3225_v58 = vld [vmem:[%s6540_s8 + $0x180] sm:$0xff] }
 0x349   :  { %3166 = vmatprep.mubr.f32.mxu1 %v6833_v9  ;;  %v3177_v9 = vld [vmem:[%s6540_s8] sm:$0xff] }
 0x40b   :  { %v2768_v7 = vpop.f32.mrb[8].mxu0 }
 0x40c   :  { %v2770_v32 = vpop.f32.mrb[9].mxu0  ;;  %v3756_v3 = vadd.f32 %v2768_v7, %v2583_v47  ;;  %v3226_v7 = vld [vmem:[%s6540_s8 + $0x188] sm:$0xff] }
 0x40d   :  { %v3757_v0 = vadd.f32 %v2770_v32, %v2583_v47 }
 0x40e   :  { %v2969_v51 = vmax.f32 %v3756_v3, 0.0  ;;  %v3017_v3 = vld [vmem:[%s6538_s6] sm:$0x1] }
 0x40f   :  { %v2774_v59 = vpop.f32.mrb[10].mxu0  ;;  %v2946_v25 = vpop.f32.mrb[8].mxu1  ;;  %v2970_v2 = vmax.f32 %v3757_v0, 0.0 }
 0x410   :  { %v3758_v28 = vadd.f32 %v2774_v59, %v2588_v30  ;;  %v2776_v54 = vpop.f32.mrb[11].mxu0  ;;  %v2948_v42 = vpop.f32.mrb[9].mxu1  ;;  %v3764_v24 = vadd.f32 %v2946_v25, %v2583_v47  ;;  %v3696_v59 = vpack.c.bf16 %v3196_v55, %v3195_v5  ;;  %v3180_v25 = vld [vmem:[%s6540_s8 + $0x18] sm:$0xff]  ;;  %v3218_v55 = vld [vmem:[%s6540_s8 + $0x148] sm:$0xff] }
 0x411   :  { %v3759_v18 = vadd.f32 %v2776_v54, %v2588_v30  ;;  %v3765_v34 = vadd.f32 %v2948_v42, %v2583_v47  ;;  %v3209_v54 = vld [vmem:[%s6540_s8 + $0x100] sm:$0xff]  ;;  %v3724_v42 = vpack.c.bf16 %v3226_v7, %v3225_v58  ;;  %v3235_v58 = vld [vmem:[%s6540_s8 + $0x1d0] sm:$0xff]  ;;  %v3236_v7 = vld [vmem:[%s6540_s8 + $0x1d8] sm:$0xff] }
 0x412   :  { %v2973_v11 = vmax.f32 %v3758_v28, 0.0  ;;  %v2971_v29 = vmax.f32 %v3764_v24, 0.0  ;;  %v3179_v28 = vld [vmem:[%s6540_s8 + $0x10] sm:$0xff] }
 0x413   :  { %v2974_v57 = vmax.f32 %v3759_v18, 0.0  ;;  %v2780_v12 = vpop.f32.mrb[12].mxu0  ;;  %v2952_v48 = vpop.f32.mrb[10].mxu1  ;;  %v2972_v62 = vmax.f32 %v3765_v34, 0.0  ;;  %v3227_v24 = vld [vmem:[%s6540_s8 + $0x190] sm:$0xff] }
 0x414   :  { %v3678_v44 = vpack.c.bf16 %v2973_v11, %v2969_v51  ;;  %v2782_v4 = vpop.f32.mrb[13].mxu0  ;;  %v3766_v1 = vadd.f32 %v2952_v48, %v2588_v30  ;;  %v2954_v56 = vpop.f32.mrb[11].mxu1  ;;  %v3760_v46 = vadd.f32 %v2780_v12, %v2593_v43  ;;  %v3210_v51 = vld [vmem:[%s6540_s8 + $0x108] sm:$0xff]  ;;  %v3197_v11 = vld [vmem:[%s6540_s8 + $0xa0] sm:$0xff]  ;;  %v3698_v12 = vpack.c.bf16 %v3180_v25, %v3179_v28  ;;  %v3219_v28 = vld [vmem:[%s6540_s8 + $0x150] sm:$0xff] }
 0x415   :  { %v3676_v16 = vpack.c.bf16 %v2974_v57, %v2970_v2  ;;  %v3767_v40 = vadd.f32 %v2954_v56, %v2588_v30  ;;  %v3761_v27 = vadd.f32 %v2782_v4, %v2593_v43  ;;  %v3694_v30 = vpack.c.bf16 %v3178_v33, %v3177_v9  ;;  %v3198_v2 = vld [vmem:[%s6540_s8 + $0xa8] sm:$0xff]  ;;  %v3228_v57 = vld [vmem:[%s6540_s8 + $0x198] sm:$0xff]  ;;  %v3181_v48 = vld [vmem:[%s6540_s8 + $0x20] sm:$0xff] }
 0x416   :  { %v2975_v60 = vmax.f32 %v3766_v1, 0.0  ;;  %v2977_v6 = vmax.f32 %v3760_v46, 0.0  ;;  %v3700_v34 = vpack.c.bf16 %v3198_v2, %v3197_v11  ;;  %v3182_v4 = vld [vmem:[%s6540_s8 + $0x28] sm:$0xff]  ;;  %v3212_v1 = vld [vmem:[%s6540_s8 + $0x118] sm:$0xff]  ;;  %v3199_v56 = vld [vmem:[%s6540_s8 + $0xb0] sm:$0xff] }
 0x417   :  { %v2786_v13 = vpop.f32.mrb[14].mxu0  ;;  %3677 = vmatprep.subr.bf16.mxu0 %v3676_v16  ;;  %v2976_v15 = vmax.f32 %v3767_v40, 0.0  ;;  %v2958_v52 = vpop.f32.mrb[12].mxu1  ;;  %v2978_v10 = vmax.f32 %v3761_v27, 0.0  ;;  %v3728_v16 = vpack.c.bf16 %v3228_v57, %v3227_v24  ;;  %v3200_v46 = vld [vmem:[%s6540_s8 + $0xb8] sm:$0xff]  ;;  %v3229_v40 = vld [vmem:[%s6540_s8 + $0x1a0] sm:$0xff] }
 0x418   :  { %v3762_v50 = vadd.f32 %v2786_v13, %v2598_v26  ;;  %v2788_v41 = vpop.f32.mrb[15].mxu0  ;;  %3679 = vmatpush1.bf16.msra.mxu0 %v3678_v44  ;;  %v3686_v20 = vpack.c.bf16 %v2975_v60, %v2971_v29  ;;  %v2960_v36 = vpop.f32.mrb[13].mxu1  ;;  %v3768_v17 = vadd.f32 %v2958_v52, %v2593_v43  ;;  %v3726_v44 = vpack.c.bf16 %v3210_v51, %v3209_v54  ;;  %v3183_v13 = vld [vmem:[%s6540_s8 + $0x30] sm:$0xff]  ;;  %v3214_v52 = vld [vmem:[%s6540_s8 + $0x128] sm:$0xff]  ;;  %v3188_v33 = vld [vmem:[%s6540_s8 + $0x58] sm:$0xff] }
 0x419   :  { %v3763_v22 = vadd.f32 %v2788_v41, %v2598_v26  ;;  %v3684_v31 = vpack.c.bf16 %v2976_v15, %v2972_v62  ;;  %v3769_v63 = vadd.f32 %v2960_v36, %v2593_v43  ;;  %v3211_v43 = vld [vmem:[%s6540_s8 + $0x110] sm:$0xff]  ;;  %v3702_v29 = vpack.c.bf16 %v3182_v4, %v3181_v48  ;;  %v3184_v62 = vld [vmem:[%s6540_s8 + $0x38] sm:$0xff]  ;;  %v3213_v15 = vld [vmem:[%s6540_s8 + $0x120] sm:$0xff] }
 0x41a   :  { %v2981_v45 = vmax.f32 %v3762_v50, 0.0  ;;  %v2979_v35 = vmax.f32 %v3768_v17, 0.0  ;;  %v3730_v60 = vpack.c.bf16 %v3212_v1, %v3211_v43  ;;  %v3704_v27 = vpack.c.bf16 %v3200_v46, %v3199_v56  ;;  %v3201_v41 = vld [vmem:[%s6540_s8 + $0xc0] sm:$0xff]  ;;  %v3232_v36 = vld [vmem:[%s6540_s8 + $0x1b8] sm:$0xff]  ;;  %v3187_v9 = vld [vmem:[%s6540_s8 + $0x50] sm:$0xff] }
 0x41b   :  { %v2982_v21 = vmax.f32 %v3763_v22, 0.0  ;;  %v2964_v19 = vpop.f32.mrb[14].mxu1  ;;  %3685 = vmatprep.subr.bf16.mxu1 %v3684_v31  ;;  %v2980_v32 = vmax.f32 %v3769_v63, 0.0  ;;  %v3231_v22 = vld [vmem:[%s6540_s8 + $0x1b0] sm:$0xff]  ;;  %v3734_v31 = vpack.c.bf16 %v3214_v52, %v3213_v15  ;;  %v3204_v63 = vld [vmem:[%s6540_s8 + $0xd8] sm:$0xff]  ;;  %v3237_v2 = vld [vmem:[%s6540_s8 + $0x1e0] sm:$0xff] }
 0x41c   :  { %v3682_v8 = vpack.c.bf16 %v2981_v45, %v2977_v6  ;;  %v3770_v37 = vadd.f32 %v2964_v19, %v2598_v26  ;;  %v2966_v39 = vpop.f32.mrb[15].mxu1  ;;  %3687 = vmatpush1.bf16.msra.mxu1 %v3686_v20  ;;  %v3202_v20 = vld [vmem:[%s6540_s8 + $0xc8] sm:$0xff]  ;;  %v3706_v6 = vpack.c.bf16 %v3184_v62, %v3183_v13  ;;  %v3736_v17 = vpack.c.bf16 %v3232_v36, %v3231_v22  ;;  %v3233_v19 = vld [vmem:[%s6540_s8 + $0x1c0] sm:$0xff]  ;;  %v3220_v54 = vld [vmem:[%s6540_s8 + $0x158] sm:$0xff] }
 0x41d   :  { %v3680_v49 = vpack.c.bf16 %v2982_v21, %v2978_v10  ;;  %v3771_v38 = vadd.f32 %v2966_v39, %v2598_v26  ;;  %v3230_v26 = vld [vmem:[%s6540_s8 + $0x1a8] sm:$0xff]  ;;  %v3708_v45 = vpack.c.bf16 %v3202_v20, %v3201_v41  ;;  %v3215_v10 = vld [vmem:[%s6540_s8 + $0x130] sm:$0xff]  ;;  %v3216_v21 = vld [vmem:[%s6540_s8 + $0x138] sm:$0xff]  ;;  %v3746_v51 = vpack.c.bf16 %v3220_v54, %v3219_v28 }
 0x41e   :  { %v2983_v53 = vmax.f32 %v3770_v37, 0.0  ;;  %v3732_v50 = vpack.c.bf16 %v3230_v26, %v3229_v40  ;;  %v3710_v37 = vpack.c.bf16 %v3186_v23, %v3185_v14  ;;  %v3738_v39 = vpack.c.bf16 %v3216_v21, %v3215_v10  ;;  %v3238_v24 = vld [vmem:[%s6540_s8 + $0x1e8] sm:$0xff]  ;;  %v3239_v43 = vld [vmem:[%s6540_s8 + $0x1f0] sm:$0xff]  ;;  %v3224_v40 = vld [vmem:[%s6540_s8 + $0x178] sm:$0xff] }
 0x41f   :  { %3681 = vmatprep.subr.bf16.mxu0 %v3680_v49  ;;  %v2984_v47 = vmax.f32 %v3771_v38, 0.0  ;;  %v3234_v49 = vld [vmem:[%s6540_s8 + $0x1c8] sm:$0xff]  ;;  %v3217_v38 = vld [vmem:[%s6540_s8 + $0x140] sm:$0xff]  ;;  %v3748_v57 = vpack.c.bf16 %v3238_v24, %v3237_v2  ;;  %v3223_v46 = vld [vmem:[%s6540_s8 + $0x170] sm:$0xff] }
 0x420   :  { %3683 = vmatpush1.bf16.msra.mxu0 %v3682_v8  ;;  %v3690_v0 = vpack.c.bf16 %v2983_v53, %v2979_v35  ;;  %v3203_v8 = vld [vmem:[%s6540_s8 + $0xd0] sm:$0xff]  ;;  %v3740_v5 = vpack.c.bf16 %v3234_v49, %v3233_v19  ;;  %v3205_v35 = vld [vmem:[%s6540_s8 + $0xe0] sm:$0xff]  ;;  %v3206_v53 = vld [vmem:[%s6540_s8 + $0xe8] sm:$0xff]  ;;  %v3754_v26 = vpack.c.bf16 %v3224_v40, %v3223_v46 }
 0x421   :  { %3693 = vmatprep.subr.bf16.mxu0 %v3692_v61  ;;  %v3688_v18 = vpack.c.bf16 %v2984_v47, %v2980_v32  ;;  %v3712_v61 = vpack.c.bf16 %v3204_v63, %v3203_v8  ;;  %v3714_v32 = vpack.c.bf16 %v3188_v33, %v3187_v9  ;;  %v3742_v47 = vpack.c.bf16 %v3218_v55, %v3217_v38  ;;  %v3222_v4 = vld [vmem:[%s6540_s8 + $0x168] sm:$0xff] }
 0x423   :  { %3428 = vmatmul.mubr.msk.f32.vlgmr.msra.gmra.mrb[16].mxu0 %vm2600_vm9, %v3017_v3  ;;  %3689 = vmatprep.subr.bf16.mxu1 %v3688_v18  ;;  %v3207_v18 = vld [vmem:[%s6540_s8 + $0xf0] sm:$0xff] }
 0x424   :  { %3695 = vmatpush3.bf16.msra.mxu0 %v3694_v30  ;;  %3691 = vmatpush1.bf16.msra.mxu1 %v3690_v0  ;;  %v3744_v30 = vpack.c.bf16 %v3236_v7, %v3235_v58  ;;  %v3189_v0 = vld [vmem:[%s6540_s8 + $0x60] sm:$0xff] }
 0x425   :  { %3697 = vmatprep.subr.bf16.mxu0 %v3696_v59  ;;  %3725 = vmatprep.subr.bf16.mxu1 %v3724_v42  ;;  %v3190_v59 = vld [vmem:[%s6540_s8 + $0x68] sm:$0xff]  ;;  %v3208_v42 = vld [vmem:[%s6540_s8 + $0xf8] sm:$0xff] }
 0x426   :  { %v3718_v25 = vpack.c.bf16 %v3190_v59, %v3189_v0  ;;  %v3720_v11 = vpack.c.bf16 %v3208_v42, %v3207_v18 }
 0x427   :  { %3429 = vmatmul.mubr.msk.f32.vlgmr.msra.gmra.mrb[16].mxu1 %vm2600_vm9, %v3017_v3  ;;  %v3716_v3 = vpack.c.bf16 %v3206_v53, %v3205_v35 }
 0x428   :  { %3699 = vmatpush3.bf16.msra.mxu0 %v3698_v12  ;;  %3727 = vmatpush3.bf16.msra.mxu1 %v3726_v44  ;;  %v3191_v12 = vld [vmem:[%s6540_s8 + $0x70] sm:$0xff]  ;;  %v3192_v44 = vld [vmem:[%s6540_s8 + $0x78] sm:$0xff] }
 0x429   :  { %3701 = vmatprep.subr.bf16.mxu0 %v3700_v34  ;;  %3729 = vmatprep.subr.bf16.mxu1 %v3728_v16  ;;  %v3221_v34 = vld [vmem:[%s6540_s8 + $0x160] sm:$0xff]  ;;  %v3722_v48 = vpack.c.bf16 %v3192_v44, %v3191_v12  ;;  %v3240_v16 = vld [vmem:[%s6540_s8 + $0x1f8] sm:$0xff] }
 0x42a   :  { %v3750_v1 = vpack.c.bf16 %v3222_v4, %v3221_v34  ;;  %v3752_v56 = vpack.c.bf16 %v3240_v16, %v3239_v43 }
 0x42c   :  { %3703 = vmatpush3.bf16.msra.mxu0 %v3702_v29  ;;  %3731 = vmatpush3.bf16.msra.mxu1 %v3730_v60  ;;  %v3022_v29 = vpop.permute.xlu1 %3021  ;;  %v6834_v60 = vld [vmem:[#allocation9_spill] sm:$0xff] }
 0x42d   :  { %3705 = vmatprep.subr.bf16.mxu0 %v3704_v27  ;;  %3733 = vmatprep.subr.bf16.mxu1 %v3732_v50  ;;  %v3027_v27 = vrot.slane %v3022_v29, %v6834_v60 }
 0x430   :  { %3707 = vmatpush3.bf16.msra.mxu0 %v3706_v6  ;;  %3735 = vmatpush3.bf16.msra.mxu1 %v3734_v31 }
 0x431   :  { %3709 = vmatprep.subr.bf16.mxu0 %v3708_v45  ;;  %3737 = vmatprep.subr.bf16.mxu1 %v3736_v17  ;;  %v3241_v17 = vld [vmem:[%s6541_s9] sm:$0x1] }
 0x434   :  { %3711 = vmatpush3.bf16.msra.mxu0 %v3710_v37  ;;  %3739 = vmatpush3.bf16.msra.mxu1 %v3738_v39 }
 0x435   :  { %3713 = vmatprep.subr.bf16.mxu0 %v3712_v61  ;;  %3741 = vmatprep.subr.bf16.mxu1 %v3740_v5 }
 0x438   :  { %3715 = vmatpush3.bf16.msra.mxu0 %v3714_v32  ;;  %3743 = vmatpush3.bf16.msra.mxu1 %v3742_v47 }
 0x439   :  { %3717 = vmatprep.subr.bf16.mxu0 %v3716_v3  ;;  %3745 = vmatprep.subr.bf16.mxu1 %v3744_v30 }
 0x43c   :  { %3719 = vmatpush3.bf16.msra.mxu0 %v3718_v25  ;;  %3747 = vmatpush3.bf16.msra.mxu1 %v3746_v51 }
 0x43d   :  { %3721 = vmatprep.subr.bf16.mxu0 %v3720_v11  ;;  %3749 = vmatprep.subr.bf16.mxu1 %v3748_v57 }
 0x440   :  { %3723 = vmatpush3.bf16.msra.mxu0 %v3722_v48  ;;  %3751 = vmatpush3.bf16.msra.mxu1 %v3750_v1 }
 0x441   :  { %3753 = vmatprep.subr.bf16.mxu1 %v3752_v56 }
 0x444   :  { %3755 = vmatpush3.bf16.msra.mxu1 %v3754_v26 }
 0x4f6   :  { %v3097_v13 = vpop.f32.mrb[16].mxu0 }
 0x4f7   :  { %v3098_v62 = vadd.f32 %v3097_v13, %v3027_v27  ;;  %v3099_v15 = vpop.f32.mrb[17].mxu0 }
 0x4f8   :  { %v3100_v50 = vadd.f32 %v3099_v15, %v3027_v27 }
 0x4f9   :  { %v3173_v41 = vmax.f32 %v3098_v62, 0.0 }
 0x4fa   :  { %v3174_v52 = vmax.f32 %v3100_v50, 0.0  ;;  %v3168_v20 = vpop.f32.mrb[16].mxu1 }
 0x4fb   :  { %v3169_v22 = vadd.f32 %v3168_v20, %v3027_v27  ;;  %v3170_v36 = vpop.f32.mrb[17].mxu1 }
 0x4fc   :  { %3306 = vmatprep.mubr.f32.mxu0 %v3174_v52  ;;  %v3171_v6 = vadd.f32 %v3170_v36, %v3027_v27 }
 0x4fd   :  { %3307 = vmatmul.mubr.f32.vlgmr.msra.gmra.mrb[18].mxu0 %v3173_v41  ;;  %v3175_v45 = vmax.f32 %v3169_v22, 0.0 }
 0x4fe   :  { %v3176_v31 = vmax.f32 %v3171_v6, 0.0 }
 0x500   :  { %3376 = vmatprep.mubr.f32.mxu1 %v3176_v31 }
 0x501   :  { %3377 = vmatmul.mubr.f32.vlgmr.msra.gmra.mrb[18].mxu1 %v3175_v45 }
 0x5d0   :  { %v3462_v14 = vpop.f32.mrb[18].mxu0 }
 0x5d1   :  { %v3463_v23 = vpop.f32.mrb[19].mxu0 }
 0x5d2   :  { %v3464_v10 = vadd.f32 %v3463_v23, %v3462_v14 }
 0x5d4   :  { %v3497_v21 = vpop.f32.mrb[18].mxu1  ;;  %v3309_v63 = vadd.f32 %v3464_v10, %v3241_v17 }
 0x5d5   :  { %v3498_v8 = vpop.f32.mrb[19].mxu1 }
 0x5d6   :  { %v3499_v19 = vadd.f32 %v3498_v8, %v3497_v21 }
 0x5d8   :  { %v3379_v49 = vadd.f32 %v3499_v19, %v3309_v63 }
 0x5da   :  { %3383 = vst.msk [vmem:[#allocation6] sm:$0x1] %vm3382_vm10, %v3379_v49 }
 0x5db   :  { %4282 = shalt.err (!%p4279_p4)
}
 0x5dc   :  { %s4283_s24 = scalar_lea.hbm %s6542_s10, 16 }
 0x5dd   :  { %p4284_p5 = scmp.ne.s32.totalorder %s6542_s10, %s4283_s24  ;;  %p4287_p6 = scmp.lt.u32.totalorder %s4283_s24, %s6542_s10 }
 0x5df   :  { %p4289_p7 = pnand %p4287_p6, %p4284_p5 }
 0x5e1   :  { %4292 = shalt.err (!%p4289_p7)
}
 0x5e2   :  { %3393 = dma.vmem_to_hbm [thread:$0]  %s3391_s16, 16, %s6542_s10, [#allocation7]  }
 0x5e3   :  { %4293 = dma.done.wait [#allocation7], 16  }
 0x5e4   :  { %4294 = vsyncadd [#allocation7], 4294967280 }
 0x5e5   :  { %3397 = vsyncpa [#allocation7], 1 }

</bundles_post_ra>
